<compile_context>
chip_gen: v7x
topology: tpu7x:2x2x1
jax: 0.10.0
libtpu: 0.0.40
codegen_flags: <defaults>
</compile_context>

<pallas_src>
import math
import functools
import numpy as np
import jax
import jax.numpy as jnp
from jax.experimental import pallas as pl
from jax.experimental.pallas import tpu as pltpu

# ----- configuration (opt.*) -----
MODEL_SIZE = 32      # opt.model_size
N_HEADS = 4          # opt.n_heads
INNER_SIZE = 64      # opt.inner_size
N_LAYERS = 2         # opt.layers
VOCAB = 50           # embedding vocab
LEN_MAX = 64         # positional_encoder.len_max
PAD = 0              # onmt.Constants.PAD
LN_EPS = 1e-5        # nn.LayerNorm default eps
NEG_INF = -1e30      # finite "masked" value (avoids NaN if a row is fully masked)


# =====================  fused whole-decoder kernel  =====================

def _layernorm(v, g, b):
    m = jnp.mean(v, axis=-1, keepdims=True)
    c = v - m
    var = jnp.mean(c * c, axis=-1, keepdims=True)
    return c * jax.lax.rsqrt(var + LN_EPS) * g + b


def _softmax_rows(s):
    mx = jnp.max(s, axis=-1, keepdims=True)
    e = jnp.exp(s - mx)
    denom = jnp.sum(e, axis=-1, keepdims=True)
    return e * pl.reciprocal(denom, approx=True)          # EUP, overlaps with VPU work


def _decoder_kernel(x_ref, ctx_ref, bias_tgt_ref, bias_src_ref,
                    wbig_ref, w2s_ref, vecs_ref, lnf_ref,
                    xout_ref, cov_ref,
                    *, L, B, T, Lk, H, Dh, F):
    D = H * Dh
    N = B * T

    x = x_ref[...]                                         # (N, D) f32 residual stream
    ctx = ctx_ref[...].astype(jnp.bfloat16)                # (B*Lk, D), reused by every layer
    bias_t = bias_tgt_ref[...]                             # (N, N)     block-diag additive bias
    bias_s = bias_src_ref[...]                             # (N, B*Lk)  block-diag additive bias

    cov = None
    for l in range(L):                                     # layers statically unrolled
        wl = wbig_ref[l]                                   # (D, 8D+F) bf16
        w2l = w2s_ref[l]                                   # (F, D)    bf16
        vl = vecs_ref[l]                                   # (13, max(3D,F)) f32

        ln1_g = vl[0:1, 0:D];   ln1_b = vl[1:2, 0:D]
        bqkv  = vl[2:3, 0:3 * D]
        bo1   = vl[3:4, 0:D]
        ln2_g = vl[4:5, 0:D];   ln2_b = vl[5:6, 0:D]
        bq2   = vl[6:7, 0:D]
        bkv2  = vl[7:8, 0:2 * D]
        bo2   = vl[8:9, 0:D]
        ln3_g = vl[9:10, 0:D];  ln3_b = vl[10:11, 0:D]
        b1    = vl[11:12, 0:F]
        b2    = vl[12:13, 0:D]

        wqkv = wl[:, 0:3 * D]          # head-major [q|k|v] per head, scale folded into q
        wo1  = wl[:, 3 * D:4 * D]
        wq2  = wl[:, 4 * D:5 * D]      # scale folded in
        wkv2 = wl[:, 5 * D:7 * D]      # head-major [k|v] per head
        wo2  = wl[:, 7 * D:8 * D]
        w1   = wl[:, 8 * D:8 * D + F]

        # ---------------- self attention (pre-LN, fused Q|K|V projection) ----------------
        xn = _layernorm(x, ln1_g, ln1_b).astype(jnp.bfloat16)
        qkv = jnp.dot(xn, wqkv, preferred_element_type=jnp.float32) + bqkv      # (N, 3D)
        heads = []
        for h in range(H):
            o = 3 * Dh * h
            q = qkv[:, o:o + Dh].astype(jnp.bfloat16)
            k = qkv[:, o + Dh:o + 2 * Dh].astype(jnp.bfloat16)
            v = qkv[:, o + 2 * Dh:o + 3 * Dh].astype(jnp.bfloat16)
            s = jax.lax.dot_general(q, k, (((1,), (1,)), ((), ())),
                                    preferred_element_type=jnp.float32) + bias_t
            p = _softmax_rows(s)
            heads.append(jnp.dot(p.astype(jnp.bfloat16), v,
                                 preferred_element_type=jnp.float32))
        attn = jnp.concatenate(heads, axis=1).astype(jnp.bfloat16)              # (N, D)
        x = x + jnp.dot(attn, wo1, preferred_element_type=jnp.float32) + bo1

        # ---------------- source attention (fused K|V projection of the context) ----------------
        xn = _layernorm(x, ln2_g, ln2_b).astype(jnp.bfloat16)
        q2 = jnp.dot(xn, wq2, preferred_element_type=jnp.float32) + bq2         # (N, D)
        kv2 = jnp.dot(ctx, wkv2, preferred_element_type=jnp.float32) + bkv2     # (B*Lk, 2D)
        heads = []
        cov_acc = None
        for h in range(H):
            o = 2 * Dh * h
            q = q2[:, h * Dh:(h + 1) * Dh].astype(jnp.bfloat16)
            k = kv2[:, o:o + Dh].astype(jnp.bfloat16)
            v = kv2[:, o + Dh:o + 2 * Dh].astype(jnp.bfloat16)
            s = jax.lax.dot_general(q, k, (((1,), (1,)), ((), ())),
                                    preferred_element_type=jnp.float32) + bias_s
            p = _softmax_rows(s)
            if l == L - 1:                                   # coverage only needed from last layer
                cov_acc = p if cov_acc is None else cov_acc + p
            heads.append(jnp.dot(p.astype(jnp.bfloat16), v,
                                 preferred_element_type=jnp.float32))
        attn = jnp.concatenate(heads, axis=1).astype(jnp.bfloat16)
        x = x + jnp.dot(attn, wo2, preferred_element_type=jnp.float32) + bo2
        if l == L - 1:
            cov = cov_acc * (1.0 / H)                        # mean over heads, in-kernel

        # ---------------- feed forward ----------------
        xn = _layernorm(x, ln3_g, ln3_b).astype(jnp.bfloat16)
        h1 = jnp.maximum(jnp.dot(xn, w1, preferred_element_type=jnp.float32) + b1, 0.0)
        x = x + jnp.dot(h1.astype(jnp.bfloat16), w2l,
                        preferred_element_type=jnp.float32) + b2

    # decoder postprocess LayerNorm fused into the same kernel
    lnf = lnf_ref[...]
    x = _layernorm(x, lnf[0:1, :], lnf[1:2, :])
    xout_ref[...] = x
    cov_ref[...] = cov


# =====================  model (glue around the fused kernel)  =====================

def transformer_decoder_forward(params, input_ids, context, src):
    B, T = input_ids.shape
    D, H, F, L = MODEL_SIZE, N_HEADS, INNER_SIZE, N_LAYERS
    Dh = D // H
    Ls = src.shape[1]
    Lk = ((Ls + 7) // 8) * 8                                   # sublane-align source length

    # process_embedding: word_lut gather * sqrt(D) + positional encoding (JAX glue)
    emb = params['word_lut'][input_ids] * math.sqrt(D)          # (B, T, D)
    emb = emb + params['pos_emb'][:T][None, :, :]
    x = emb.reshape(B * T, D).astype(jnp.float32)               # batch-first token rows

    # context (Ls, B, D) time-first -> batch-first (B*Lk, D), zero-padded keys
    ctx = jnp.transpose(context, (1, 0, 2))                     # (B, Ls, D)
    ctx = jnp.pad(ctx, ((0, 0), (0, Lk - Ls), (0, 0))).reshape(B * Lk, D)

    # masks -> block-diagonal additive biases shared by all heads & layers
    causal = jnp.triu(jnp.ones((T, T), dtype=jnp.bool_), k=1)
    m_tgt = (input_ids == PAD)[:, None, :] | causal[None, :, :]               # (B, T, T)
    tgt_blk = jnp.where(m_tgt, NEG_INF, 0.0).astype(jnp.float32)
    m_src = jnp.pad(src == PAD, ((0, 0), (0, Lk - Ls)), constant_values=True)  # (B, Lk)
    src_blk = jnp.where(m_src, NEG_INF, 0.0).astype(jnp.float32)

    eye = jnp.eye(B, dtype=jnp.float32)
    off = (1.0 - eye) * NEG_INF
    bias_tgt = (eye[:, None, :, None] * tgt_blk[:, :, None, :]
                + off[:, None, :, None]).reshape(B * T, B * T)
    bias_src = (eye[:, None, :, None] * src_blk[None, None, :, :]
                + off[:, None, :, None])                                       # (B,1,B,Lk)
    bias_src = jnp.broadcast_to(bias_src, (B, T, B, Lk)).reshape(B * T, B * Lk)

    kernel = functools.partial(_decoder_kernel, L=L, B=B, T=T, Lk=Lk, H=H, Dh=Dh, F=F)
    vmem = pl.BlockSpec(memory_space=pltpu.MemorySpace.VMEM)
    x_out, cov_full = pl.pallas_call(
        kernel,
        out_shape=[jax.ShapeDtypeStruct((B * T, D), jnp.float32),
                   jax.ShapeDtypeStruct((B * T, B * Lk), jnp.float32)],
        in_specs=[vmem] * 8,
        out_specs=[vmem, vmem],
    )(x, ctx, bias_tgt, bias_src,
      params['w_big'], params['w2s'], params['vecs'], params['lnf'])

    hidden = jnp.transpose(x_out.reshape(B, T, D), (1, 0, 2))   # (T, B, D) time-first
    cov = cov_full.reshape(B, T, B, Lk)[jnp.arange(B), :, jnp.arange(B), :]     # diag blocks
    coverage = cov[:, :, :Ls]                                   # (B, T, Ls), last layer
    return {'hidden': hidden, 'coverage': coverage, 'context': context}


# =====================  deterministic parameter init + offline packing  =====================

def init_params(key):
    D, F, H, L = MODEL_SIZE, INNER_SIZE, N_HEADS, N_LAYERS
    Dh = D // H
    scale = 1.0 / math.sqrt(Dh)
    keys = jax.random.split(key, 2 + L)

    def dense(k, din, dout):
        return jax.random.normal(k, (din, dout), jnp.float32) * 0.02

    params = {}
    params['word_lut'] = jax.random.normal(keys[0], (VOCAB, D), jnp.float32) * 0.02

    # sinusoidal positional encoding (len_max x D)
    pos = np.arange(LEN_MAX)[:, None].astype(np.float32)
    div = np.exp(np.arange(0, D, 2).astype(np.float32) * -(math.log(10000.0) / D))
    pe = np.zeros((LEN_MAX, D), np.float32)
    pe[:, 0::2] = np.sin(pos * div)
    pe[:, 1::2] = np.cos(pos * div)
    params['pos_emb'] = jnp.asarray(pe)

    # postprocess LayerNorm gamma/beta stacked into one (2, D) slab
    params['lnf'] = jnp.concatenate(
        [jnp.ones((1, D), jnp.float32), jnp.zeros((1, D), jnp.float32)], axis=0)

    VW = max(3 * D, F)

    def row(v):
        v = jnp.asarray(v, jnp.float32).reshape(1, -1)
        return jnp.pad(v, ((0, 0), (0, VW - v.shape[1])))

    w_big, w2s, vecs = [], [], []
    for i in range(L):
        lk = jax.random.split(keys[2 + i], 10)
        wq, wk, wv, wo = (dense(lk[0], D, D), dense(lk[1], D, D),
                          dense(lk[2], D, D), dense(lk[3], D, D))
        sq, sk, sv, so = (dense(lk[4], D, D), dense(lk[5], D, D),
                          dense(lk[6], D, D), dense(lk[7], D, D))
        w1, w2 = dense(lk[8], D, F), dense(lk[9], F, D)
        bq = bk = bv = jnp.zeros((D,), jnp.float32)
        bk2 = bv2 = bq2 = jnp.zeros((D,), jnp.float32)
        bo1 = bo2 = b2 = jnp.zeros((D,), jnp.float32)
        b1 = jnp.zeros((F,), jnp.float32)
        ln_g = jnp.ones((D,), jnp.float32)
        ln_b = jnp.zeros((D,), jnp.float32)

        # head-major fused QKV / KV, 1/sqrt(Dh) folded into the Q path (one-time transform)
        qkv_cols, qkv_b, kv2_cols, kv2_b = [], [], [], []
        for h in range(H):
            sl = slice(h * Dh, (h + 1) * Dh)
            qkv_cols += [wq[:, sl] * scale, wk[:, sl], wv[:, sl]]
            qkv_b += [bq[sl] * scale, bk[sl], bv[sl]]
            kv2_cols += [sk[:, sl], sv[:, sl]]
            kv2_b += [bk2[sl], bv2[sl]]
        wqkv = jnp.concatenate(qkv_cols, axis=1)         # (D, 3D)
        bqkv = jnp.concatenate(qkv_b)                    # (3D,)
        wkv2 = jnp.concatenate(kv2_cols, axis=1)         # (D, 2D)
        bkv2 = jnp.concatenate(kv2_b)                    # (2D,)

        w_big.append(jnp.concatenate([wqkv, wo, sq * scale, wkv2, so, w1], axis=1))
        w2s.append(w2)
        vecs.append(jnp.concatenate([
            row(ln_g), row(ln_b), row(bqkv), row(bo1),
            row(ln_g), row(ln_b), row(bq2 * scale), row(bkv2), row(bo2),
            row(ln_g), row(ln_b), row(b1), row(b2)], axis=0))

    params['w_big'] = jnp.stack(w_big).astype(jnp.bfloat16)    # (L, D, 8D+F)
    params['w2s'] = jnp.stack(w2s).astype(jnp.bfloat16)        # (L, F, D)
    params['vecs'] = jnp.stack(vecs)                           # (L, 13, max(3D,F)) f32
    return params


# =====================  main  =====================

if __name__ == "__main__":
    key = jax.random.PRNGKey(0)
    pkey, ikey, skey, ckey = jax.random.split(key, 4)
    params = init_params(pkey)

    B, T, Ls = 2, 8, 10
    input_ids = jax.random.randint(ikey, (B, T), 1, VOCAB)          # keep > PAD
    src = jax.random.randint(skey, (B, Ls), 1, VOCAB)
    src = src.at[0, -2:].set(PAD)                                   # exercise source pad mask
    context = jax.random.normal(ckey, (Ls, B, MODEL_SIZE), jnp.float32)

    fwd = jax.jit(transformer_decoder_forward)
    out = fwd(params, input_ids, context, src)
    jax.block_until_ready(out['hidden'])
    jax.block_until_ready(out['coverage'])
    assert out['hidden'].shape == (T, B, MODEL_SIZE)
    assert out['coverage'].shape == (B, T, Ls)
    assert bool(jnp.all(jnp.isfinite(out['hidden'])))
    assert bool(jnp.all(jnp.isfinite(out['coverage'])))
    print("KERNEL_OK")
</pallas_src>

<mosaic_0001>
module attributes {stable_mosaic.version = 11 : i64} {
  func.func @_decoder_kernel(%arg0: memref<16x32xf32, #tpu.memory_space<vmem>>, %arg1: memref<32x32xf32, #tpu.memory_space<vmem>>, %arg2: memref<16x16xf32, #tpu.memory_space<vmem>>, %arg3: memref<16x32xf32, #tpu.memory_space<vmem>>, %arg4: memref<2x32x320xbf16, #tpu.memory_space<vmem>>, %arg5: memref<2x64x32xbf16, #tpu.memory_space<vmem>>, %arg6: memref<2x13x96xf32, #tpu.memory_space<vmem>>, %arg7: memref<2x32xf32, #tpu.memory_space<vmem>>, %arg8: memref<16x32xf32, #tpu.memory_space<vmem>>, %arg9: memref<16x32xf32, #tpu.memory_space<vmem>>) attributes {dimension_semantics = [], scalar_prefetch = 0 : i64, scratch_operands = 0 : i64, tpu.core_type = #tpu.core_type<tc>} {
    %c0 = arith.constant 0 : index
    %c0_0 = arith.constant 0 : index
    %0 = vector.load %arg0[%c0, %c0_0] : memref<16x32xf32, #tpu.memory_space<vmem>>, vector<16x32xf32>
    %c0_1 = arith.constant 0 : index
    %c0_2 = arith.constant 0 : index
    %1 = vector.load %arg1[%c0_1, %c0_2] : memref<32x32xf32, #tpu.memory_space<vmem>>, vector<32x32xf32>
    %2 = arith.truncf %1 : vector<32x32xf32> to vector<32x32xbf16>
    %c0_3 = arith.constant 0 : index
    %c0_4 = arith.constant 0 : index
    %3 = vector.load %arg2[%c0_3, %c0_4] : memref<16x16xf32, #tpu.memory_space<vmem>>, vector<16x16xf32>
    %c0_5 = arith.constant 0 : index
    %c0_6 = arith.constant 0 : index
    %4 = vector.load %arg3[%c0_5, %c0_6] : memref<16x32xf32, #tpu.memory_space<vmem>>, vector<16x32xf32>
    %c0_7 = arith.constant 0 : index
    %c0_8 = arith.constant 0 : index
    %c0_9 = arith.constant 0 : index
    %5 = vector.load %arg4[%c0_7, %c0_8, %c0_9] : memref<2x32x320xbf16, #tpu.memory_space<vmem>>, vector<1x32x320xbf16>
    %6 = vector.shape_cast %5 : vector<1x32x320xbf16> to vector<32x320xbf16>
    %c0_10 = arith.constant 0 : index
    %c0_11 = arith.constant 0 : index
    %c0_12 = arith.constant 0 : index
    %7 = vector.load %arg5[%c0_10, %c0_11, %c0_12] : memref<2x64x32xbf16, #tpu.memory_space<vmem>>, vector<1x64x32xbf16>
    %8 = vector.shape_cast %7 : vector<1x64x32xbf16> to vector<64x32xbf16>
    %c0_13 = arith.constant 0 : index
    %c0_14 = arith.constant 0 : index
    %c0_15 = arith.constant 0 : index
    %9 = vector.load %arg6[%c0_13, %c0_14, %c0_15] : memref<2x13x96xf32, #tpu.memory_space<vmem>>, vector<1x13x96xf32>
    %10 = vector.shape_cast %9 : vector<1x13x96xf32> to vector<13x96xf32>
    %11 = vector.extract_strided_slice %10 {offsets = [0, 0], sizes = [1, 32], strides = [1, 1]} : vector<13x96xf32> to vector<1x32xf32>
    %12 = vector.extract_strided_slice %10 {offsets = [1, 0], sizes = [1, 32], strides = [1, 1]} : vector<13x96xf32> to vector<1x32xf32>
    %13 = vector.extract_strided_slice %10 {offsets = [2, 0], sizes = [1, 96], strides = [1, 1]} : vector<13x96xf32> to vector<1x96xf32>
    %14 = vector.extract_strided_slice %10 {offsets = [3, 0], sizes = [1, 32], strides = [1, 1]} : vector<13x96xf32> to vector<1x32xf32>
    %15 = vector.extract_strided_slice %10 {offsets = [4, 0], sizes = [1, 32], strides = [1, 1]} : vector<13x96xf32> to vector<1x32xf32>
    %16 = vector.extract_strided_slice %10 {offsets = [5, 0], sizes = [1, 32], strides = [1, 1]} : vector<13x96xf32> to vector<1x32xf32>
    %17 = vector.extract_strided_slice %10 {offsets = [6, 0], sizes = [1, 32], strides = [1, 1]} : vector<13x96xf32> to vector<1x32xf32>
    %18 = vector.extract_strided_slice %10 {offsets = [7, 0], sizes = [1, 64], strides = [1, 1]} : vector<13x96xf32> to vector<1x64xf32>
    %19 = vector.extract_strided_slice %10 {offsets = [8, 0], sizes = [1, 32], strides = [1, 1]} : vector<13x96xf32> to vector<1x32xf32>
    %20 = vector.extract_strided_slice %10 {offsets = [9, 0], sizes = [1, 32], strides = [1, 1]} : vector<13x96xf32> to vector<1x32xf32>
    %21 = vector.extract_strided_slice %10 {offsets = [10, 0], sizes = [1, 32], strides = [1, 1]} : vector<13x96xf32> to vector<1x32xf32>
    %22 = vector.extract_strided_slice %10 {offsets = [11, 0], sizes = [1, 64], strides = [1, 1]} : vector<13x96xf32> to vector<1x64xf32>
    %23 = vector.extract_strided_slice %10 {offsets = [12, 0], sizes = [1, 32], strides = [1, 1]} : vector<13x96xf32> to vector<1x32xf32>
    %24 = vector.extract_strided_slice %6 {offsets = [0, 0], sizes = [32, 96], strides = [1, 1]} : vector<32x320xbf16> to vector<32x96xbf16>
    %25 = vector.extract_strided_slice %6 {offsets = [0, 96], sizes = [32, 32], strides = [1, 1]} : vector<32x320xbf16> to vector<32x32xbf16>
    %26 = vector.extract_strided_slice %6 {offsets = [0, 128], sizes = [32, 32], strides = [1, 1]} : vector<32x320xbf16> to vector<32x32xbf16>
    %27 = vector.extract_strided_slice %6 {offsets = [0, 160], sizes = [32, 64], strides = [1, 1]} : vector<32x320xbf16> to vector<32x64xbf16>
    %28 = vector.extract_strided_slice %6 {offsets = [0, 224], sizes = [32, 32], strides = [1, 1]} : vector<32x320xbf16> to vector<32x32xbf16>
    %29 = vector.extract_strided_slice %6 {offsets = [0, 256], sizes = [32, 64], strides = [1, 1]} : vector<32x320xbf16> to vector<32x64xbf16>
    %cst = arith.constant dense<0.000000e+00> : vector<16xf32>
    %30 = vector.multi_reduction <add>, %0, %cst [1] : vector<16x32xf32> to vector<16xf32>
    %31 = vector.shape_cast %30 : vector<16xf32> to vector<16x1xf32>
    %cst_16 = arith.constant 3.200000e+01 : f32
    %32 = vector.broadcast %cst_16 : f32 to vector<16x1xf32>
    %33 = arith.divf %31, %32 : vector<16x1xf32>
    %34 = vector.broadcast %33 : vector<16x1xf32> to vector<16x32xf32>
    %35 = arith.subf %0, %34 : vector<16x32xf32>
    %36 = arith.mulf %35, %35 : vector<16x32xf32>
    %cst_17 = arith.constant dense<0.000000e+00> : vector<16xf32>
    %37 = vector.multi_reduction <add>, %36, %cst_17 [1] : vector<16x32xf32> to vector<16xf32>
    %38 = vector.shape_cast %37 : vector<16xf32> to vector<16x1xf32>
    %cst_18 = arith.constant 3.200000e+01 : f32
    %39 = vector.broadcast %cst_18 : f32 to vector<16x1xf32>
    %40 = arith.divf %38, %39 : vector<16x1xf32>
    %cst_19 = arith.constant 9.99999974E-6 : f32
    %41 = vector.broadcast %cst_19 : f32 to vector<16x1xf32>
    %42 = arith.addf %40, %41 : vector<16x1xf32>
    %43 = math.rsqrt %42 : vector<16x1xf32>
    %44 = vector.broadcast %43 : vector<16x1xf32> to vector<16x32xf32>
    %45 = arith.mulf %35, %44 : vector<16x32xf32>
    %46 = vector.broadcast %11 : vector<1x32xf32> to vector<16x32xf32>
    %47 = arith.mulf %45, %46 : vector<16x32xf32>
    %48 = vector.broadcast %12 : vector<1x32xf32> to vector<16x32xf32>
    %49 = arith.addf %47, %48 : vector<16x32xf32>
    %50 = arith.truncf %49 : vector<16x32xf32> to vector<16x32xbf16>
    %cst_20 = arith.constant dense<0.000000e+00> : vector<16x96xf32>
    %51 = tpu.matmul %50, %24, %cst_20 {dimension_numbers = #tpu.dot_dimension_numbers<[1], [0], [0], [1], [0, 0, 1, 1], [], []>} : vector<16x32xbf16>, vector<32x96xbf16>, vector<16x96xf32> -> vector<16x96xf32>
    %52 = vector.broadcast %13 : vector<1x96xf32> to vector<16x96xf32>
    %53 = arith.addf %51, %52 : vector<16x96xf32>
    %54 = vector.extract_strided_slice %53 {offsets = [0, 0], sizes = [16, 8], strides = [1, 1]} : vector<16x96xf32> to vector<16x8xf32>
    %55 = arith.truncf %54 : vector<16x8xf32> to vector<16x8xbf16>
    %56 = vector.extract_strided_slice %53 {offsets = [0, 8], sizes = [16, 8], strides = [1, 1]} : vector<16x96xf32> to vector<16x8xf32>
    %57 = arith.truncf %56 : vector<16x8xf32> to vector<16x8xbf16>
    %58 = vector.extract_strided_slice %53 {offsets = [0, 16], sizes = [16, 8], strides = [1, 1]} : vector<16x96xf32> to vector<16x8xf32>
    %59 = arith.truncf %58 : vector<16x8xf32> to vector<16x8xbf16>
    %cst_21 = arith.constant dense<0.000000e+00> : vector<16x16xf32>
    %60 = tpu.matmul %55, %57, %cst_21 {dimension_numbers = #tpu.dot_dimension_numbers<[1], [1], [0], [0], [0, 0, 1, 0], [], []>} : vector<16x8xbf16>, vector<16x8xbf16>, vector<16x16xf32> -> vector<16x16xf32>
    %61 = arith.addf %60, %3 : vector<16x16xf32>
    %cst_22 = arith.constant dense<0xFF800000> : vector<16xf32>
    %62 = vector.multi_reduction <maximumf>, %61, %cst_22 [1] : vector<16x16xf32> to vector<16xf32>
    %63 = vector.shape_cast %62 : vector<16xf32> to vector<16x1xf32>
    %64 = vector.broadcast %63 : vector<16x1xf32> to vector<16x16xf32>
    %65 = arith.subf %61, %64 : vector<16x16xf32>
    %66 = math.exp %65 : vector<16x16xf32>
    %cst_23 = arith.constant dense<0.000000e+00> : vector<16xf32>
    %67 = vector.multi_reduction <add>, %66, %cst_23 [1] : vector<16x16xf32> to vector<16xf32>
    %68 = vector.shape_cast %67 : vector<16xf32> to vector<16x1xf32>
    %69 = tpu.reciprocal %68 {approx = true} : vector<16x1xf32> -> vector<16x1xf32>
    %70 = vector.broadcast %69 : vector<16x1xf32> to vector<16x16xf32>
    %71 = arith.mulf %66, %70 : vector<16x16xf32>
    %72 = arith.truncf %71 : vector<16x16xf32> to vector<16x16xbf16>
    %cst_24 = arith.constant dense<0.000000e+00> : vector<16x8xf32>
    %73 = tpu.matmul %72, %59, %cst_24 {dimension_numbers = #tpu.dot_dimension_numbers<[1], [0], [0], [1], [0, 0, 1, 1], [], []>} : vector<16x16xbf16>, vector<16x8xbf16>, vector<16x8xf32> -> vector<16x8xf32>
    %74 = vector.extract_strided_slice %53 {offsets = [0, 24], sizes = [16, 8], strides = [1, 1]} : vector<16x96xf32> to vector<16x8xf32>
    %75 = arith.truncf %74 : vector<16x8xf32> to vector<16x8xbf16>
    %76 = vector.extract_strided_slice %53 {offsets = [0, 32], sizes = [16, 8], strides = [1, 1]} : vector<16x96xf32> to vector<16x8xf32>
    %77 = arith.truncf %76 : vector<16x8xf32> to vector<16x8xbf16>
    %78 = vector.extract_strided_slice %53 {offsets = [0, 40], sizes = [16, 8], strides = [1, 1]} : vector<16x96xf32> to vector<16x8xf32>
    %79 = arith.truncf %78 : vector<16x8xf32> to vector<16x8xbf16>
    %cst_25 = arith.constant dense<0.000000e+00> : vector<16x16xf32>
    %80 = tpu.matmul %75, %77, %cst_25 {dimension_numbers = #tpu.dot_dimension_numbers<[1], [1], [0], [0], [0, 0, 1, 0], [], []>} : vector<16x8xbf16>, vector<16x8xbf16>, vector<16x16xf32> -> vector<16x16xf32>
    %81 = arith.addf %80, %3 : vector<16x16xf32>
    %cst_26 = arith.constant dense<0xFF800000> : vector<16xf32>
    %82 = vector.multi_reduction <maximumf>, %81, %cst_26 [1] : vector<16x16xf32> to vector<16xf32>
    %83 = vector.shape_cast %82 : vector<16xf32> to vector<16x1xf32>
    %84 = vector.broadcast %83 : vector<16x1xf32> to vector<16x16xf32>
    %85 = arith.subf %81, %84 : vector<16x16xf32>
    %86 = math.exp %85 : vector<16x16xf32>
    %cst_27 = arith.constant dense<0.000000e+00> : vector<16xf32>
    %87 = vector.multi_reduction <add>, %86, %cst_27 [1] : vector<16x16xf32> to vector<16xf32>
    %88 = vector.shape_cast %87 : vector<16xf32> to vector<16x1xf32>
    %89 = tpu.reciprocal %88 {approx = true} : vector<16x1xf32> -> vector<16x1xf32>
    %90 = vector.broadcast %89 : vector<16x1xf32> to vector<16x16xf32>
    %91 = arith.mulf %86, %90 : vector<16x16xf32>
    %92 = arith.truncf %91 : vector<16x16xf32> to vector<16x16xbf16>
    %cst_28 = arith.constant dense<0.000000e+00> : vector<16x8xf32>
    %93 = tpu.matmul %92, %79, %cst_28 {dimension_numbers = #tpu.dot_dimension_numbers<[1], [0], [0], [1], [0, 0, 1, 1], [], []>} : vector<16x16xbf16>, vector<16x8xbf16>, vector<16x8xf32> -> vector<16x8xf32>
    %94 = vector.extract_strided_slice %53 {offsets = [0, 48], sizes = [16, 8], strides = [1, 1]} : vector<16x96xf32> to vector<16x8xf32>
    %95 = arith.truncf %94 : vector<16x8xf32> to vector<16x8xbf16>
    %96 = vector.extract_strided_slice %53 {offsets = [0, 56], sizes = [16, 8], strides = [1, 1]} : vector<16x96xf32> to vector<16x8xf32>
    %97 = arith.truncf %96 : vector<16x8xf32> to vector<16x8xbf16>
    %98 = vector.extract_strided_slice %53 {offsets = [0, 64], sizes = [16, 8], strides = [1, 1]} : vector<16x96xf32> to vector<16x8xf32>
    %99 = arith.truncf %98 : vector<16x8xf32> to vector<16x8xbf16>
    %cst_29 = arith.constant dense<0.000000e+00> : vector<16x16xf32>
    %100 = tpu.matmul %95, %97, %cst_29 {dimension_numbers = #tpu.dot_dimension_numbers<[1], [1], [0], [0], [0, 0, 1, 0], [], []>} : vector<16x8xbf16>, vector<16x8xbf16>, vector<16x16xf32> -> vector<16x16xf32>
    %101 = arith.addf %100, %3 : vector<16x16xf32>
    %cst_30 = arith.constant dense<0xFF800000> : vector<16xf32>
    %102 = vector.multi_reduction <maximumf>, %101, %cst_30 [1] : vector<16x16xf32> to vector<16xf32>
    %103 = vector.shape_cast %102 : vector<16xf32> to vector<16x1xf32>
    %104 = vector.broadcast %103 : vector<16x1xf32> to vector<16x16xf32>
    %105 = arith.subf %101, %104 : vector<16x16xf32>
    %106 = math.exp %105 : vector<16x16xf32>
    %cst_31 = arith.constant dense<0.000000e+00> : vector<16xf32>
    %107 = vector.multi_reduction <add>, %106, %cst_31 [1] : vector<16x16xf32> to vector<16xf32>
    %108 = vector.shape_cast %107 : vector<16xf32> to vector<16x1xf32>
    %109 = tpu.reciprocal %108 {approx = true} : vector<16x1xf32> -> vector<16x1xf32>
    %110 = vector.broadcast %109 : vector<16x1xf32> to vector<16x16xf32>
    %111 = arith.mulf %106, %110 : vector<16x16xf32>
    %112 = arith.truncf %111 : vector<16x16xf32> to vector<16x16xbf16>
    %cst_32 = arith.constant dense<0.000000e+00> : vector<16x8xf32>
    %113 = tpu.matmul %112, %99, %cst_32 {dimension_numbers = #tpu.dot_dimension_numbers<[1], [0], [0], [1], [0, 0, 1, 1], [], []>} : vector<16x16xbf16>, vector<16x8xbf16>, vector<16x8xf32> -> vector<16x8xf32>
    %114 = vector.extract_strided_slice %53 {offsets = [0, 72], sizes = [16, 8], strides = [1, 1]} : vector<16x96xf32> to vector<16x8xf32>
    %115 = arith.truncf %114 : vector<16x8xf32> to vector<16x8xbf16>
    %116 = vector.extract_strided_slice %53 {offsets = [0, 80], sizes = [16, 8], strides = [1, 1]} : vector<16x96xf32> to vector<16x8xf32>
    %117 = arith.truncf %116 : vector<16x8xf32> to vector<16x8xbf16>
    %118 = vector.extract_strided_slice %53 {offsets = [0, 88], sizes = [16, 8], strides = [1, 1]} : vector<16x96xf32> to vector<16x8xf32>
    %119 = arith.truncf %118 : vector<16x8xf32> to vector<16x8xbf16>
    %cst_33 = arith.constant dense<0.000000e+00> : vector<16x16xf32>
    %120 = tpu.matmul %115, %117, %cst_33 {dimension_numbers = #tpu.dot_dimension_numbers<[1], [1], [0], [0], [0, 0, 1, 0], [], []>} : vector<16x8xbf16>, vector<16x8xbf16>, vector<16x16xf32> -> vector<16x16xf32>
    %121 = arith.addf %120, %3 : vector<16x16xf32>
    %cst_34 = arith.constant dense<0xFF800000> : vector<16xf32>
    %122 = vector.multi_reduction <maximumf>, %121, %cst_34 [1] : vector<16x16xf32> to vector<16xf32>
    %123 = vector.shape_cast %122 : vector<16xf32> to vector<16x1xf32>
    %124 = vector.broadcast %123 : vector<16x1xf32> to vector<16x16xf32>
    %125 = arith.subf %121, %124 : vector<16x16xf32>
    %126 = math.exp %125 : vector<16x16xf32>
    %cst_35 = arith.constant dense<0.000000e+00> : vector<16xf32>
    %127 = vector.multi_reduction <add>, %126, %cst_35 [1] : vector<16x16xf32> to vector<16xf32>
    %128 = vector.shape_cast %127 : vector<16xf32> to vector<16x1xf32>
    %129 = tpu.reciprocal %128 {approx = true} : vector<16x1xf32> -> vector<16x1xf32>
    %130 = vector.broadcast %129 : vector<16x1xf32> to vector<16x16xf32>
    %131 = arith.mulf %126, %130 : vector<16x16xf32>
    %132 = arith.truncf %131 : vector<16x16xf32> to vector<16x16xbf16>
    %cst_36 = arith.constant dense<0.000000e+00> : vector<16x8xf32>
    %133 = tpu.matmul %132, %119, %cst_36 {dimension_numbers = #tpu.dot_dimension_numbers<[1], [0], [0], [1], [0, 0, 1, 1], [], []>} : vector<16x16xbf16>, vector<16x8xbf16>, vector<16x8xf32> -> vector<16x8xf32>
    %134 = tpu.concatenate %73, %93, %113, %133 in 1 : vector<16x8xf32>, vector<16x8xf32>, vector<16x8xf32>, vector<16x8xf32> -> vector<16x32xf32>
    %135 = arith.truncf %134 : vector<16x32xf32> to vector<16x32xbf16>
    %cst_37 = arith.constant dense<0.000000e+00> : vector<16x32xf32>
    %136 = tpu.matmul %135, %25, %cst_37 {dimension_numbers = #tpu.dot_dimension_numbers<[1], [0], [0], [1], [0, 0, 1, 1], [], []>} : vector<16x32xbf16>, vector<32x32xbf16>, vector<16x32xf32> -> vector<16x32xf32>
    %137 = arith.addf %0, %136 : vector<16x32xf32>
    %138 = vector.broadcast %14 : vector<1x32xf32> to vector<16x32xf32>
    %139 = arith.addf %137, %138 : vector<16x32xf32>
    %cst_38 = arith.constant dense<0.000000e+00> : vector<16xf32>
    %140 = vector.multi_reduction <add>, %139, %cst_38 [1] : vector<16x32xf32> to vector<16xf32>
    %141 = vector.shape_cast %140 : vector<16xf32> to vector<16x1xf32>
    %cst_39 = arith.constant 3.200000e+01 : f32
    %142 = vector.broadcast %cst_39 : f32 to vector<16x1xf32>
    %143 = arith.divf %141, %142 : vector<16x1xf32>
    %144 = vector.broadcast %143 : vector<16x1xf32> to vector<16x32xf32>
    %145 = arith.subf %139, %144 : vector<16x32xf32>
    %146 = arith.mulf %145, %145 : vector<16x32xf32>
    %cst_40 = arith.constant dense<0.000000e+00> : vector<16xf32>
    %147 = vector.multi_reduction <add>, %146, %cst_40 [1] : vector<16x32xf32> to vector<16xf32>
    %148 = vector.shape_cast %147 : vector<16xf32> to vector<16x1xf32>
    %cst_41 = arith.constant 3.200000e+01 : f32
    %149 = vector.broadcast %cst_41 : f32 to vector<16x1xf32>
    %150 = arith.divf %148, %149 : vector<16x1xf32>
    %cst_42 = arith.constant 9.99999974E-6 : f32
    %151 = vector.broadcast %cst_42 : f32 to vector<16x1xf32>
    %152 = arith.addf %150, %151 : vector<16x1xf32>
    %153 = math.rsqrt %152 : vector<16x1xf32>
    %154 = vector.broadcast %153 : vector<16x1xf32> to vector<16x32xf32>
    %155 = arith.mulf %145, %154 : vector<16x32xf32>
    %156 = vector.broadcast %15 : vector<1x32xf32> to vector<16x32xf32>
    %157 = arith.mulf %155, %156 : vector<16x32xf32>
    %158 = vector.broadcast %16 : vector<1x32xf32> to vector<16x32xf32>
    %159 = arith.addf %157, %158 : vector<16x32xf32>
    %160 = arith.truncf %159 : vector<16x32xf32> to vector<16x32xbf16>
    %cst_43 = arith.constant dense<0.000000e+00> : vector<16x32xf32>
    %161 = tpu.matmul %160, %26, %cst_43 {dimension_numbers = #tpu.dot_dimension_numbers<[1], [0], [0], [1], [0, 0, 1, 1], [], []>} : vector<16x32xbf16>, vector<32x32xbf16>, vector<16x32xf32> -> vector<16x32xf32>
    %162 = vector.broadcast %17 : vector<1x32xf32> to vector<16x32xf32>
    %163 = arith.addf %161, %162 : vector<16x32xf32>
    %cst_44 = arith.constant dense<0.000000e+00> : vector<32x64xf32>
    %164 = tpu.matmul %2, %27, %cst_44 {dimension_numbers = #tpu.dot_dimension_numbers<[1], [0], [0], [1], [0, 0, 1, 1], [], []>} : vector<32x32xbf16>, vector<32x64xbf16>, vector<32x64xf32> -> vector<32x64xf32>
    %165 = vector.broadcast %18 : vector<1x64xf32> to vector<32x64xf32>
    %166 = arith.addf %164, %165 : vector<32x64xf32>
    %167 = vector.extract_strided_slice %163 {offsets = [0, 0], sizes = [16, 8], strides = [1, 1]} : vector<16x32xf32> to vector<16x8xf32>
    %168 = arith.truncf %167 : vector<16x8xf32> to vector<16x8xbf16>
    %169 = vector.extract_strided_slice %166 {offsets = [0, 0], sizes = [32, 8], strides = [1, 1]} : vector<32x64xf32> to vector<32x8xf32>
    %170 = arith.truncf %169 : vector<32x8xf32> to vector<32x8xbf16>
    %171 = vector.extract_strided_slice %166 {offsets = [0, 8], sizes = [32, 8], strides = [1, 1]} : vector<32x64xf32> to vector<32x8xf32>
    %172 = arith.truncf %171 : vector<32x8xf32> to vector<32x8xbf16>
    %cst_45 = arith.constant dense<0.000000e+00> : vector<16x32xf32>
    %173 = tpu.matmul %168, %170, %cst_45 {dimension_numbers = #tpu.dot_dimension_numbers<[1], [1], [0], [0], [0, 0, 1, 0], [], []>} : vector<16x8xbf16>, vector<32x8xbf16>, vector<16x32xf32> -> vector<16x32xf32>
    %174 = arith.addf %173, %4 : vector<16x32xf32>
    %cst_46 = arith.constant dense<0xFF800000> : vector<16xf32>
    %175 = vector.multi_reduction <maximumf>, %174, %cst_46 [1] : vector<16x32xf32> to vector<16xf32>
    %176 = vector.shape_cast %175 : vector<16xf32> to vector<16x1xf32>
    %177 = vector.broadcast %176 : vector<16x1xf32> to vector<16x32xf32>
    %178 = arith.subf %174, %177 : vector<16x32xf32>
    %179 = math.exp %178 : vector<16x32xf32>
    %cst_47 = arith.constant dense<0.000000e+00> : vector<16xf32>
    %180 = vector.multi_reduction <add>, %179, %cst_47 [1] : vector<16x32xf32> to vector<16xf32>
    %181 = vector.shape_cast %180 : vector<16xf32> to vector<16x1xf32>
    %182 = tpu.reciprocal %181 {approx = true} : vector<16x1xf32> -> vector<16x1xf32>
    %183 = vector.broadcast %182 : vector<16x1xf32> to vector<16x32xf32>
    %184 = arith.mulf %179, %183 : vector<16x32xf32>
    %185 = arith.truncf %184 : vector<16x32xf32> to vector<16x32xbf16>
    %cst_48 = arith.constant dense<0.000000e+00> : vector<16x8xf32>
    %186 = tpu.matmul %185, %172, %cst_48 {dimension_numbers = #tpu.dot_dimension_numbers<[1], [0], [0], [1], [0, 0, 1, 1], [], []>} : vector<16x32xbf16>, vector<32x8xbf16>, vector<16x8xf32> -> vector<16x8xf32>
    %187 = vector.extract_strided_slice %163 {offsets = [0, 8], sizes = [16, 8], strides = [1, 1]} : vector<16x32xf32> to vector<16x8xf32>
    %188 = arith.truncf %187 : vector<16x8xf32> to vector<16x8xbf16>
    %189 = vector.extract_strided_slice %166 {offsets = [0, 16], sizes = [32, 8], strides = [1, 1]} : vector<32x64xf32> to vector<32x8xf32>
    %190 = arith.truncf %189 : vector<32x8xf32> to vector<32x8xbf16>
    %191 = vector.extract_strided_slice %166 {offsets = [0, 24], sizes = [32, 8], strides = [1, 1]} : vector<32x64xf32> to vector<32x8xf32>
    %192 = arith.truncf %191 : vector<32x8xf32> to vector<32x8xbf16>
    %cst_49 = arith.constant dense<0.000000e+00> : vector<16x32xf32>
    %193 = tpu.matmul %188, %190, %cst_49 {dimension_numbers = #tpu.dot_dimension_numbers<[1], [1], [0], [0], [0, 0, 1, 0], [], []>} : vector<16x8xbf16>, vector<32x8xbf16>, vector<16x32xf32> -> vector<16x32xf32>
    %194 = arith.addf %193, %4 : vector<16x32xf32>
    %cst_50 = arith.constant dense<0xFF800000> : vector<16xf32>
    %195 = vector.multi_reduction <maximumf>, %194, %cst_50 [1] : vector<16x32xf32> to vector<16xf32>
    %196 = vector.shape_cast %195 : vector<16xf32> to vector<16x1xf32>
    %197 = vector.broadcast %196 : vector<16x1xf32> to vector<16x32xf32>
    %198 = arith.subf %194, %197 : vector<16x32xf32>
    %199 = math.exp %198 : vector<16x32xf32>
    %cst_51 = arith.constant dense<0.000000e+00> : vector<16xf32>
    %200 = vector.multi_reduction <add>, %199, %cst_51 [1] : vector<16x32xf32> to vector<16xf32>
    %201 = vector.shape_cast %200 : vector<16xf32> to vector<16x1xf32>
    %202 = tpu.reciprocal %201 {approx = true} : vector<16x1xf32> -> vector<16x1xf32>
    %203 = vector.broadcast %202 : vector<16x1xf32> to vector<16x32xf32>
    %204 = arith.mulf %199, %203 : vector<16x32xf32>
    %205 = arith.truncf %204 : vector<16x32xf32> to vector<16x32xbf16>
    %cst_52 = arith.constant dense<0.000000e+00> : vector<16x8xf32>
    %206 = tpu.matmul %205, %192, %cst_52 {dimension_numbers = #tpu.dot_dimension_numbers<[1], [0], [0], [1], [0, 0, 1, 1], [], []>} : vector<16x32xbf16>, vector<32x8xbf16>, vector<16x8xf32> -> vector<16x8xf32>
    %207 = vector.extract_strided_slice %163 {offsets = [0, 16], sizes = [16, 8], strides = [1, 1]} : vector<16x32xf32> to vector<16x8xf32>
    %208 = arith.truncf %207 : vector<16x8xf32> to vector<16x8xbf16>
    %209 = vector.extract_strided_slice %166 {offsets = [0, 32], sizes = [32, 8], strides = [1, 1]} : vector<32x64xf32> to vector<32x8xf32>
    %210 = arith.truncf %209 : vector<32x8xf32> to vector<32x8xbf16>
    %211 = vector.extract_strided_slice %166 {offsets = [0, 40], sizes = [32, 8], strides = [1, 1]} : vector<32x64xf32> to vector<32x8xf32>
    %212 = arith.truncf %211 : vector<32x8xf32> to vector<32x8xbf16>
    %cst_53 = arith.constant dense<0.000000e+00> : vector<16x32xf32>
    %213 = tpu.matmul %208, %210, %cst_53 {dimension_numbers = #tpu.dot_dimension_numbers<[1], [1], [0], [0], [0, 0, 1, 0], [], []>} : vector<16x8xbf16>, vector<32x8xbf16>, vector<16x32xf32> -> vector<16x32xf32>
    %214 = arith.addf %213, %4 : vector<16x32xf32>
    %cst_54 = arith.constant dense<0xFF800000> : vector<16xf32>
    %215 = vector.multi_reduction <maximumf>, %214, %cst_54 [1] : vector<16x32xf32> to vector<16xf32>
    %216 = vector.shape_cast %215 : vector<16xf32> to vector<16x1xf32>
    %217 = vector.broadcast %216 : vector<16x1xf32> to vector<16x32xf32>
    %218 = arith.subf %214, %217 : vector<16x32xf32>
    %219 = math.exp %218 : vector<16x32xf32>
    %cst_55 = arith.constant dense<0.000000e+00> : vector<16xf32>
    %220 = vector.multi_reduction <add>, %219, %cst_55 [1] : vector<16x32xf32> to vector<16xf32>
    %221 = vector.shape_cast %220 : vector<16xf32> to vector<16x1xf32>
    %222 = tpu.reciprocal %221 {approx = true} : vector<16x1xf32> -> vector<16x1xf32>
    %223 = vector.broadcast %222 : vector<16x1xf32> to vector<16x32xf32>
    %224 = arith.mulf %219, %223 : vector<16x32xf32>
    %225 = arith.truncf %224 : vector<16x32xf32> to vector<16x32xbf16>
    %cst_56 = arith.constant dense<0.000000e+00> : vector<16x8xf32>
    %226 = tpu.matmul %225, %212, %cst_56 {dimension_numbers = #tpu.dot_dimension_numbers<[1], [0], [0], [1], [0, 0, 1, 1], [], []>} : vector<16x32xbf16>, vector<32x8xbf16>, vector<16x8xf32> -> vector<16x8xf32>
    %227 = vector.extract_strided_slice %163 {offsets = [0, 24], sizes = [16, 8], strides = [1, 1]} : vector<16x32xf32> to vector<16x8xf32>
    %228 = arith.truncf %227 : vector<16x8xf32> to vector<16x8xbf16>
    %229 = vector.extract_strided_slice %166 {offsets = [0, 48], sizes = [32, 8], strides = [1, 1]} : vector<32x64xf32> to vector<32x8xf32>
    %230 = arith.truncf %229 : vector<32x8xf32> to vector<32x8xbf16>
    %231 = vector.extract_strided_slice %166 {offsets = [0, 56], sizes = [32, 8], strides = [1, 1]} : vector<32x64xf32> to vector<32x8xf32>
    %232 = arith.truncf %231 : vector<32x8xf32> to vector<32x8xbf16>
    %cst_57 = arith.constant dense<0.000000e+00> : vector<16x32xf32>
    %233 = tpu.matmul %228, %230, %cst_57 {dimension_numbers = #tpu.dot_dimension_numbers<[1], [1], [0], [0], [0, 0, 1, 0], [], []>} : vector<16x8xbf16>, vector<32x8xbf16>, vector<16x32xf32> -> vector<16x32xf32>
    %234 = arith.addf %233, %4 : vector<16x32xf32>
    %cst_58 = arith.constant dense<0xFF800000> : vector<16xf32>
    %235 = vector.multi_reduction <maximumf>, %234, %cst_58 [1] : vector<16x32xf32> to vector<16xf32>
    %236 = vector.shape_cast %235 : vector<16xf32> to vector<16x1xf32>
    %237 = vector.broadcast %236 : vector<16x1xf32> to vector<16x32xf32>
    %238 = arith.subf %234, %237 : vector<16x32xf32>
    %239 = math.exp %238 : vector<16x32xf32>
    %cst_59 = arith.constant dense<0.000000e+00> : vector<16xf32>
    %240 = vector.multi_reduction <add>, %239, %cst_59 [1] : vector<16x32xf32> to vector<16xf32>
    %241 = vector.shape_cast %240 : vector<16xf32> to vector<16x1xf32>
    %242 = tpu.reciprocal %241 {approx = true} : vector<16x1xf32> -> vector<16x1xf32>
    %243 = vector.broadcast %242 : vector<16x1xf32> to vector<16x32xf32>
    %244 = arith.mulf %239, %243 : vector<16x32xf32>
    %245 = arith.truncf %244 : vector<16x32xf32> to vector<16x32xbf16>
    %cst_60 = arith.constant dense<0.000000e+00> : vector<16x8xf32>
    %246 = tpu.matmul %245, %232, %cst_60 {dimension_numbers = #tpu.dot_dimension_numbers<[1], [0], [0], [1], [0, 0, 1, 1], [], []>} : vector<16x32xbf16>, vector<32x8xbf16>, vector<16x8xf32> -> vector<16x8xf32>
    %247 = tpu.concatenate %186, %206, %226, %246 in 1 : vector<16x8xf32>, vector<16x8xf32>, vector<16x8xf32>, vector<16x8xf32> -> vector<16x32xf32>
    %248 = arith.truncf %247 : vector<16x32xf32> to vector<16x32xbf16>
    %cst_61 = arith.constant dense<0.000000e+00> : vector<16x32xf32>
    %249 = tpu.matmul %248, %28, %cst_61 {dimension_numbers = #tpu.dot_dimension_numbers<[1], [0], [0], [1], [0, 0, 1, 1], [], []>} : vector<16x32xbf16>, vector<32x32xbf16>, vector<16x32xf32> -> vector<16x32xf32>
    %250 = arith.addf %139, %249 : vector<16x32xf32>
    %251 = vector.broadcast %19 : vector<1x32xf32> to vector<16x32xf32>
    %252 = arith.addf %250, %251 : vector<16x32xf32>
    %cst_62 = arith.constant dense<0.000000e+00> : vector<16xf32>
    %253 = vector.multi_reduction <add>, %252, %cst_62 [1] : vector<16x32xf32> to vector<16xf32>
    %254 = vector.shape_cast %253 : vector<16xf32> to vector<16x1xf32>
    %cst_63 = arith.constant 3.200000e+01 : f32
    %255 = vector.broadcast %cst_63 : f32 to vector<16x1xf32>
    %256 = arith.divf %254, %255 : vector<16x1xf32>
    %257 = vector.broadcast %256 : vector<16x1xf32> to vector<16x32xf32>
    %258 = arith.subf %252, %257 : vector<16x32xf32>
    %259 = arith.mulf %258, %258 : vector<16x32xf32>
    %cst_64 = arith.constant dense<0.000000e+00> : vector<16xf32>
    %260 = vector.multi_reduction <add>, %259, %cst_64 [1] : vector<16x32xf32> to vector<16xf32>
    %261 = vector.shape_cast %260 : vector<16xf32> to vector<16x1xf32>
    %cst_65 = arith.constant 3.200000e+01 : f32
    %262 = vector.broadcast %cst_65 : f32 to vector<16x1xf32>
    %263 = arith.divf %261, %262 : vector<16x1xf32>
    %cst_66 = arith.constant 9.99999974E-6 : f32
    %264 = vector.broadcast %cst_66 : f32 to vector<16x1xf32>
    %265 = arith.addf %263, %264 : vector<16x1xf32>
    %266 = math.rsqrt %265 : vector<16x1xf32>
    %267 = vector.broadcast %266 : vector<16x1xf32> to vector<16x32xf32>
    %268 = arith.mulf %258, %267 : vector<16x32xf32>
    %269 = vector.broadcast %20 : vector<1x32xf32> to vector<16x32xf32>
    %270 = arith.mulf %268, %269 : vector<16x32xf32>
    %271 = vector.broadcast %21 : vector<1x32xf32> to vector<16x32xf32>
    %272 = arith.addf %270, %271 : vector<16x32xf32>
    %273 = arith.truncf %272 : vector<16x32xf32> to vector<16x32xbf16>
    %cst_67 = arith.constant dense<0.000000e+00> : vector<16x64xf32>
    %274 = tpu.matmul %273, %29, %cst_67 {dimension_numbers = #tpu.dot_dimension_numbers<[1], [0], [0], [1], [0, 0, 1, 1], [], []>} : vector<16x32xbf16>, vector<32x64xbf16>, vector<16x64xf32> -> vector<16x64xf32>
    %275 = vector.broadcast %22 : vector<1x64xf32> to vector<16x64xf32>
    %276 = arith.addf %274, %275 : vector<16x64xf32>
    %cst_68 = arith.constant 0.000000e+00 : f32
    %277 = vector.broadcast %cst_68 : f32 to vector<16x64xf32>
    %278 = arith.maximumf %276, %277 : vector<16x64xf32>
    %279 = arith.truncf %278 : vector<16x64xf32> to vector<16x64xbf16>
    %cst_69 = arith.constant dense<0.000000e+00> : vector<16x32xf32>
    %280 = tpu.matmul %279, %8, %cst_69 {dimension_numbers = #tpu.dot_dimension_numbers<[1], [0], [0], [1], [0, 0, 1, 1], [], []>} : vector<16x64xbf16>, vector<64x32xbf16>, vector<16x32xf32> -> vector<16x32xf32>
    %281 = arith.addf %252, %280 : vector<16x32xf32>
    %282 = vector.broadcast %23 : vector<1x32xf32> to vector<16x32xf32>
    %283 = arith.addf %281, %282 : vector<16x32xf32>
    %c1 = arith.constant 1 : index
    %c0_70 = arith.constant 0 : index
    %c0_71 = arith.constant 0 : index
    %284 = vector.load %arg4[%c1, %c0_70, %c0_71] : memref<2x32x320xbf16, #tpu.memory_space<vmem>>, vector<1x32x320xbf16>
    %285 = vector.shape_cast %284 : vector<1x32x320xbf16> to vector<32x320xbf16>
    %c1_72 = arith.constant 1 : index
    %c0_73 = arith.constant 0 : index
    %c0_74 = arith.constant 0 : index
    %286 = vector.load %arg5[%c1_72, %c0_73, %c0_74] : memref<2x64x32xbf16, #tpu.memory_space<vmem>>, vector<1x64x32xbf16>
    %287 = vector.shape_cast %286 : vector<1x64x32xbf16> to vector<64x32xbf16>
    %c1_75 = arith.constant 1 : index
    %c0_76 = arith.constant 0 : index
    %c0_77 = arith.constant 0 : index
    %288 = vector.load %arg6[%c1_75, %c0_76, %c0_77] : memref<2x13x96xf32, #tpu.memory_space<vmem>>, vector<1x13x96xf32>
    %289 = vector.shape_cast %288 : vector<1x13x96xf32> to vector<13x96xf32>
    %290 = vector.extract_strided_slice %289 {offsets = [0, 0], sizes = [1, 32], strides = [1, 1]} : vector<13x96xf32> to vector<1x32xf32>
    %291 = vector.extract_strided_slice %289 {offsets = [1, 0], sizes = [1, 32], strides = [1, 1]} : vector<13x96xf32> to vector<1x32xf32>
    %292 = vector.extract_strided_slice %289 {offsets = [2, 0], sizes = [1, 96], strides = [1, 1]} : vector<13x96xf32> to vector<1x96xf32>
    %293 = vector.extract_strided_slice %289 {offsets = [3, 0], sizes = [1, 32], strides = [1, 1]} : vector<13x96xf32> to vector<1x32xf32>
    %294 = vector.extract_strided_slice %289 {offsets = [4, 0], sizes = [1, 32], strides = [1, 1]} : vector<13x96xf32> to vector<1x32xf32>
    %295 = vector.extract_strided_slice %289 {offsets = [5, 0], sizes = [1, 32], strides = [1, 1]} : vector<13x96xf32> to vector<1x32xf32>
    %296 = vector.extract_strided_slice %289 {offsets = [6, 0], sizes = [1, 32], strides = [1, 1]} : vector<13x96xf32> to vector<1x32xf32>
    %297 = vector.extract_strided_slice %289 {offsets = [7, 0], sizes = [1, 64], strides = [1, 1]} : vector<13x96xf32> to vector<1x64xf32>
    %298 = vector.extract_strided_slice %289 {offsets = [8, 0], sizes = [1, 32], strides = [1, 1]} : vector<13x96xf32> to vector<1x32xf32>
    %299 = vector.extract_strided_slice %289 {offsets = [9, 0], sizes = [1, 32], strides = [1, 1]} : vector<13x96xf32> to vector<1x32xf32>
    %300 = vector.extract_strided_slice %289 {offsets = [10, 0], sizes = [1, 32], strides = [1, 1]} : vector<13x96xf32> to vector<1x32xf32>
    %301 = vector.extract_strided_slice %289 {offsets = [11, 0], sizes = [1, 64], strides = [1, 1]} : vector<13x96xf32> to vector<1x64xf32>
    %302 = vector.extract_strided_slice %289 {offsets = [12, 0], sizes = [1, 32], strides = [1, 1]} : vector<13x96xf32> to vector<1x32xf32>
    %303 = vector.extract_strided_slice %285 {offsets = [0, 0], sizes = [32, 96], strides = [1, 1]} : vector<32x320xbf16> to vector<32x96xbf16>
    %304 = vector.extract_strided_slice %285 {offsets = [0, 96], sizes = [32, 32], strides = [1, 1]} : vector<32x320xbf16> to vector<32x32xbf16>
    %305 = vector.extract_strided_slice %285 {offsets = [0, 128], sizes = [32, 32], strides = [1, 1]} : vector<32x320xbf16> to vector<32x32xbf16>
    %306 = vector.extract_strided_slice %285 {offsets = [0, 160], sizes = [32, 64], strides = [1, 1]} : vector<32x320xbf16> to vector<32x64xbf16>
    %307 = vector.extract_strided_slice %285 {offsets = [0, 224], sizes = [32, 32], strides = [1, 1]} : vector<32x320xbf16> to vector<32x32xbf16>
    %308 = vector.extract_strided_slice %285 {offsets = [0, 256], sizes = [32, 64], strides = [1, 1]} : vector<32x320xbf16> to vector<32x64xbf16>
    %cst_78 = arith.constant dense<0.000000e+00> : vector<16xf32>
    %309 = vector.multi_reduction <add>, %283, %cst_78 [1] : vector<16x32xf32> to vector<16xf32>
    %310 = vector.shape_cast %309 : vector<16xf32> to vector<16x1xf32>
    %cst_79 = arith.constant 3.200000e+01 : f32
    %311 = vector.broadcast %cst_79 : f32 to vector<16x1xf32>
    %312 = arith.divf %310, %311 : vector<16x1xf32>
    %313 = vector.broadcast %312 : vector<16x1xf32> to vector<16x32xf32>
    %314 = arith.subf %283, %313 : vector<16x32xf32>
    %315 = arith.mulf %314, %314 : vector<16x32xf32>
    %cst_80 = arith.constant dense<0.000000e+00> : vector<16xf32>
    %316 = vector.multi_reduction <add>, %315, %cst_80 [1] : vector<16x32xf32> to vector<16xf32>
    %317 = vector.shape_cast %316 : vector<16xf32> to vector<16x1xf32>
    %cst_81 = arith.constant 3.200000e+01 : f32
    %318 = vector.broadcast %cst_81 : f32 to vector<16x1xf32>
    %319 = arith.divf %317, %318 : vector<16x1xf32>
    %cst_82 = arith.constant 9.99999974E-6 : f32
    %320 = vector.broadcast %cst_82 : f32 to vector<16x1xf32>
    %321 = arith.addf %319, %320 : vector<16x1xf32>
    %322 = math.rsqrt %321 : vector<16x1xf32>
    %323 = vector.broadcast %322 : vector<16x1xf32> to vector<16x32xf32>
    %324 = arith.mulf %314, %323 : vector<16x32xf32>
    %325 = vector.broadcast %290 : vector<1x32xf32> to vector<16x32xf32>
    %326 = arith.mulf %324, %325 : vector<16x32xf32>
    %327 = vector.broadcast %291 : vector<1x32xf32> to vector<16x32xf32>
    %328 = arith.addf %326, %327 : vector<16x32xf32>
    %329 = arith.truncf %328 : vector<16x32xf32> to vector<16x32xbf16>
    %cst_83 = arith.constant dense<0.000000e+00> : vector<16x96xf32>
    %330 = tpu.matmul %329, %303, %cst_83 {dimension_numbers = #tpu.dot_dimension_numbers<[1], [0], [0], [1], [0, 0, 1, 1], [], []>} : vector<16x32xbf16>, vector<32x96xbf16>, vector<16x96xf32> -> vector<16x96xf32>
    %331 = vector.broadcast %292 : vector<1x96xf32> to vector<16x96xf32>
    %332 = arith.addf %330, %331 : vector<16x96xf32>
    %333 = vector.extract_strided_slice %332 {offsets = [0, 0], sizes = [16, 8], strides = [1, 1]} : vector<16x96xf32> to vector<16x8xf32>
    %334 = arith.truncf %333 : vector<16x8xf32> to vector<16x8xbf16>
    %335 = vector.extract_strided_slice %332 {offsets = [0, 8], sizes = [16, 8], strides = [1, 1]} : vector<16x96xf32> to vector<16x8xf32>
    %336 = arith.truncf %335 : vector<16x8xf32> to vector<16x8xbf16>
    %337 = vector.extract_strided_slice %332 {offsets = [0, 16], sizes = [16, 8], strides = [1, 1]} : vector<16x96xf32> to vector<16x8xf32>
    %338 = arith.truncf %337 : vector<16x8xf32> to vector<16x8xbf16>
    %cst_84 = arith.constant dense<0.000000e+00> : vector<16x16xf32>
    %339 = tpu.matmul %334, %336, %cst_84 {dimension_numbers = #tpu.dot_dimension_numbers<[1], [1], [0], [0], [0, 0, 1, 0], [], []>} : vector<16x8xbf16>, vector<16x8xbf16>, vector<16x16xf32> -> vector<16x16xf32>
    %340 = arith.addf %339, %3 : vector<16x16xf32>
    %cst_85 = arith.constant dense<0xFF800000> : vector<16xf32>
    %341 = vector.multi_reduction <maximumf>, %340, %cst_85 [1] : vector<16x16xf32> to vector<16xf32>
    %342 = vector.shape_cast %341 : vector<16xf32> to vector<16x1xf32>
    %343 = vector.broadcast %342 : vector<16x1xf32> to vector<16x16xf32>
    %344 = arith.subf %340, %343 : vector<16x16xf32>
    %345 = math.exp %344 : vector<16x16xf32>
    %cst_86 = arith.constant dense<0.000000e+00> : vector<16xf32>
    %346 = vector.multi_reduction <add>, %345, %cst_86 [1] : vector<16x16xf32> to vector<16xf32>
    %347 = vector.shape_cast %346 : vector<16xf32> to vector<16x1xf32>
    %348 = tpu.reciprocal %347 {approx = true} : vector<16x1xf32> -> vector<16x1xf32>
    %349 = vector.broadcast %348 : vector<16x1xf32> to vector<16x16xf32>
    %350 = arith.mulf %345, %349 : vector<16x16xf32>
    %351 = arith.truncf %350 : vector<16x16xf32> to vector<16x16xbf16>
    %cst_87 = arith.constant dense<0.000000e+00> : vector<16x8xf32>
    %352 = tpu.matmul %351, %338, %cst_87 {dimension_numbers = #tpu.dot_dimension_numbers<[1], [0], [0], [1], [0, 0, 1, 1], [], []>} : vector<16x16xbf16>, vector<16x8xbf16>, vector<16x8xf32> -> vector<16x8xf32>
    %353 = vector.extract_strided_slice %332 {offsets = [0, 24], sizes = [16, 8], strides = [1, 1]} : vector<16x96xf32> to vector<16x8xf32>
    %354 = arith.truncf %353 : vector<16x8xf32> to vector<16x8xbf16>
    %355 = vector.extract_strided_slice %332 {offsets = [0, 32], sizes = [16, 8], strides = [1, 1]} : vector<16x96xf32> to vector<16x8xf32>
    %356 = arith.truncf %355 : vector<16x8xf32> to vector<16x8xbf16>
    %357 = vector.extract_strided_slice %332 {offsets = [0, 40], sizes = [16, 8], strides = [1, 1]} : vector<16x96xf32> to vector<16x8xf32>
    %358 = arith.truncf %357 : vector<16x8xf32> to vector<16x8xbf16>
    %cst_88 = arith.constant dense<0.000000e+00> : vector<16x16xf32>
    %359 = tpu.matmul %354, %356, %cst_88 {dimension_numbers = #tpu.dot_dimension_numbers<[1], [1], [0], [0], [0, 0, 1, 0], [], []>} : vector<16x8xbf16>, vector<16x8xbf16>, vector<16x16xf32> -> vector<16x16xf32>
    %360 = arith.addf %359, %3 : vector<16x16xf32>
    %cst_89 = arith.constant dense<0xFF800000> : vector<16xf32>
    %361 = vector.multi_reduction <maximumf>, %360, %cst_89 [1] : vector<16x16xf32> to vector<16xf32>
    %362 = vector.shape_cast %361 : vector<16xf32> to vector<16x1xf32>
    %363 = vector.broadcast %362 : vector<16x1xf32> to vector<16x16xf32>
    %364 = arith.subf %360, %363 : vector<16x16xf32>
    %365 = math.exp %364 : vector<16x16xf32>
    %cst_90 = arith.constant dense<0.000000e+00> : vector<16xf32>
    %366 = vector.multi_reduction <add>, %365, %cst_90 [1] : vector<16x16xf32> to vector<16xf32>
    %367 = vector.shape_cast %366 : vector<16xf32> to vector<16x1xf32>
    %368 = tpu.reciprocal %367 {approx = true} : vector<16x1xf32> -> vector<16x1xf32>
    %369 = vector.broadcast %368 : vector<16x1xf32> to vector<16x16xf32>
    %370 = arith.mulf %365, %369 : vector<16x16xf32>
    %371 = arith.truncf %370 : vector<16x16xf32> to vector<16x16xbf16>
    %cst_91 = arith.constant dense<0.000000e+00> : vector<16x8xf32>
    %372 = tpu.matmul %371, %358, %cst_91 {dimension_numbers = #tpu.dot_dimension_numbers<[1], [0], [0], [1], [0, 0, 1, 1], [], []>} : vector<16x16xbf16>, vector<16x8xbf16>, vector<16x8xf32> -> vector<16x8xf32>
    %373 = vector.extract_strided_slice %332 {offsets = [0, 48], sizes = [16, 8], strides = [1, 1]} : vector<16x96xf32> to vector<16x8xf32>
    %374 = arith.truncf %373 : vector<16x8xf32> to vector<16x8xbf16>
    %375 = vector.extract_strided_slice %332 {offsets = [0, 56], sizes = [16, 8], strides = [1, 1]} : vector<16x96xf32> to vector<16x8xf32>
    %376 = arith.truncf %375 : vector<16x8xf32> to vector<16x8xbf16>
    %377 = vector.extract_strided_slice %332 {offsets = [0, 64], sizes = [16, 8], strides = [1, 1]} : vector<16x96xf32> to vector<16x8xf32>
    %378 = arith.truncf %377 : vector<16x8xf32> to vector<16x8xbf16>
    %cst_92 = arith.constant dense<0.000000e+00> : vector<16x16xf32>
    %379 = tpu.matmul %374, %376, %cst_92 {dimension_numbers = #tpu.dot_dimension_numbers<[1], [1], [0], [0], [0, 0, 1, 0], [], []>} : vector<16x8xbf16>, vector<16x8xbf16>, vector<16x16xf32> -> vector<16x16xf32>
    %380 = arith.addf %379, %3 : vector<16x16xf32>
    %cst_93 = arith.constant dense<0xFF800000> : vector<16xf32>
    %381 = vector.multi_reduction <maximumf>, %380, %cst_93 [1] : vector<16x16xf32> to vector<16xf32>
    %382 = vector.shape_cast %381 : vector<16xf32> to vector<16x1xf32>
    %383 = vector.broadcast %382 : vector<16x1xf32> to vector<16x16xf32>
    %384 = arith.subf %380, %383 : vector<16x16xf32>
    %385 = math.exp %384 : vector<16x16xf32>
    %cst_94 = arith.constant dense<0.000000e+00> : vector<16xf32>
    %386 = vector.multi_reduction <add>, %385, %cst_94 [1] : vector<16x16xf32> to vector<16xf32>
    %387 = vector.shape_cast %386 : vector<16xf32> to vector<16x1xf32>
    %388 = tpu.reciprocal %387 {approx = true} : vector<16x1xf32> -> vector<16x1xf32>
    %389 = vector.broadcast %388 : vector<16x1xf32> to vector<16x16xf32>
    %390 = arith.mulf %385, %389 : vector<16x16xf32>
    %391 = arith.truncf %390 : vector<16x16xf32> to vector<16x16xbf16>
    %cst_95 = arith.constant dense<0.000000e+00> : vector<16x8xf32>
    %392 = tpu.matmul %391, %378, %cst_95 {dimension_numbers = #tpu.dot_dimension_numbers<[1], [0], [0], [1], [0, 0, 1, 1], [], []>} : vector<16x16xbf16>, vector<16x8xbf16>, vector<16x8xf32> -> vector<16x8xf32>
    %393 = vector.extract_strided_slice %332 {offsets = [0, 72], sizes = [16, 8], strides = [1, 1]} : vector<16x96xf32> to vector<16x8xf32>
    %394 = arith.truncf %393 : vector<16x8xf32> to vector<16x8xbf16>
    %395 = vector.extract_strided_slice %332 {offsets = [0, 80], sizes = [16, 8], strides = [1, 1]} : vector<16x96xf32> to vector<16x8xf32>
    %396 = arith.truncf %395 : vector<16x8xf32> to vector<16x8xbf16>
    %397 = vector.extract_strided_slice %332 {offsets = [0, 88], sizes = [16, 8], strides = [1, 1]} : vector<16x96xf32> to vector<16x8xf32>
    %398 = arith.truncf %397 : vector<16x8xf32> to vector<16x8xbf16>
    %cst_96 = arith.constant dense<0.000000e+00> : vector<16x16xf32>
    %399 = tpu.matmul %394, %396, %cst_96 {dimension_numbers = #tpu.dot_dimension_numbers<[1], [1], [0], [0], [0, 0, 1, 0], [], []>} : vector<16x8xbf16>, vector<16x8xbf16>, vector<16x16xf32> -> vector<16x16xf32>
    %400 = arith.addf %399, %3 : vector<16x16xf32>
    %cst_97 = arith.constant dense<0xFF800000> : vector<16xf32>
    %401 = vector.multi_reduction <maximumf>, %400, %cst_97 [1] : vector<16x16xf32> to vector<16xf32>
    %402 = vector.shape_cast %401 : vector<16xf32> to vector<16x1xf32>
    %403 = vector.broadcast %402 : vector<16x1xf32> to vector<16x16xf32>
    %404 = arith.subf %400, %403 : vector<16x16xf32>
    %405 = math.exp %404 : vector<16x16xf32>
    %cst_98 = arith.constant dense<0.000000e+00> : vector<16xf32>
    %406 = vector.multi_reduction <add>, %405, %cst_98 [1] : vector<16x16xf32> to vector<16xf32>
    %407 = vector.shape_cast %406 : vector<16xf32> to vector<16x1xf32>
    %408 = tpu.reciprocal %407 {approx = true} : vector<16x1xf32> -> vector<16x1xf32>
    %409 = vector.broadcast %408 : vector<16x1xf32> to vector<16x16xf32>
    %410 = arith.mulf %405, %409 : vector<16x16xf32>
    %411 = arith.truncf %410 : vector<16x16xf32> to vector<16x16xbf16>
    %cst_99 = arith.constant dense<0.000000e+00> : vector<16x8xf32>
    %412 = tpu.matmul %411, %398, %cst_99 {dimension_numbers = #tpu.dot_dimension_numbers<[1], [0], [0], [1], [0, 0, 1, 1], [], []>} : vector<16x16xbf16>, vector<16x8xbf16>, vector<16x8xf32> -> vector<16x8xf32>
    %413 = tpu.concatenate %352, %372, %392, %412 in 1 : vector<16x8xf32>, vector<16x8xf32>, vector<16x8xf32>, vector<16x8xf32> -> vector<16x32xf32>
    %414 = arith.truncf %413 : vector<16x32xf32> to vector<16x32xbf16>
    %cst_100 = arith.constant dense<0.000000e+00> : vector<16x32xf32>
    %415 = tpu.matmul %414, %304, %cst_100 {dimension_numbers = #tpu.dot_dimension_numbers<[1], [0], [0], [1], [0, 0, 1, 1], [], []>} : vector<16x32xbf16>, vector<32x32xbf16>, vector<16x32xf32> -> vector<16x32xf32>
    %416 = arith.addf %283, %415 : vector<16x32xf32>
    %417 = vector.broadcast %293 : vector<1x32xf32> to vector<16x32xf32>
    %418 = arith.addf %416, %417 : vector<16x32xf32>
    %cst_101 = arith.constant dense<0.000000e+00> : vector<16xf32>
    %419 = vector.multi_reduction <add>, %418, %cst_101 [1] : vector<16x32xf32> to vector<16xf32>
    %420 = vector.shape_cast %419 : vector<16xf32> to vector<16x1xf32>
    %cst_102 = arith.constant 3.200000e+01 : f32
    %421 = vector.broadcast %cst_102 : f32 to vector<16x1xf32>
    %422 = arith.divf %420, %421 : vector<16x1xf32>
    %423 = vector.broadcast %422 : vector<16x1xf32> to vector<16x32xf32>
    %424 = arith.subf %418, %423 : vector<16x32xf32>
    %425 = arith.mulf %424, %424 : vector<16x32xf32>
    %cst_103 = arith.constant dense<0.000000e+00> : vector<16xf32>
    %426 = vector.multi_reduction <add>, %425, %cst_103 [1] : vector<16x32xf32> to vector<16xf32>
    %427 = vector.shape_cast %426 : vector<16xf32> to vector<16x1xf32>
    %cst_104 = arith.constant 3.200000e+01 : f32
    %428 = vector.broadcast %cst_104 : f32 to vector<16x1xf32>
    %429 = arith.divf %427, %428 : vector<16x1xf32>
    %cst_105 = arith.constant 9.99999974E-6 : f32
    %430 = vector.broadcast %cst_105 : f32 to vector<16x1xf32>
    %431 = arith.addf %429, %430 : vector<16x1xf32>
    %432 = math.rsqrt %431 : vector<16x1xf32>
    %433 = vector.broadcast %432 : vector<16x1xf32> to vector<16x32xf32>
    %434 = arith.mulf %424, %433 : vector<16x32xf32>
    %435 = vector.broadcast %294 : vector<1x32xf32> to vector<16x32xf32>
    %436 = arith.mulf %434, %435 : vector<16x32xf32>
    %437 = vector.broadcast %295 : vector<1x32xf32> to vector<16x32xf32>
    %438 = arith.addf %436, %437 : vector<16x32xf32>
    %439 = arith.truncf %438 : vector<16x32xf32> to vector<16x32xbf16>
    %cst_106 = arith.constant dense<0.000000e+00> : vector<16x32xf32>
    %440 = tpu.matmul %439, %305, %cst_106 {dimension_numbers = #tpu.dot_dimension_numbers<[1], [0], [0], [1], [0, 0, 1, 1], [], []>} : vector<16x32xbf16>, vector<32x32xbf16>, vector<16x32xf32> -> vector<16x32xf32>
    %441 = vector.broadcast %296 : vector<1x32xf32> to vector<16x32xf32>
    %442 = arith.addf %440, %441 : vector<16x32xf32>
    %cst_107 = arith.constant dense<0.000000e+00> : vector<32x64xf32>
    %443 = tpu.matmul %2, %306, %cst_107 {dimension_numbers = #tpu.dot_dimension_numbers<[1], [0], [0], [1], [0, 0, 1, 1], [], []>} : vector<32x32xbf16>, vector<32x64xbf16>, vector<32x64xf32> -> vector<32x64xf32>
    %444 = vector.broadcast %297 : vector<1x64xf32> to vector<32x64xf32>
    %445 = arith.addf %443, %444 : vector<32x64xf32>
    %446 = vector.extract_strided_slice %442 {offsets = [0, 0], sizes = [16, 8], strides = [1, 1]} : vector<16x32xf32> to vector<16x8xf32>
    %447 = arith.truncf %446 : vector<16x8xf32> to vector<16x8xbf16>
    %448 = vector.extract_strided_slice %445 {offsets = [0, 0], sizes = [32, 8], strides = [1, 1]} : vector<32x64xf32> to vector<32x8xf32>
    %449 = arith.truncf %448 : vector<32x8xf32> to vector<32x8xbf16>
    %450 = vector.extract_strided_slice %445 {offsets = [0, 8], sizes = [32, 8], strides = [1, 1]} : vector<32x64xf32> to vector<32x8xf32>
    %451 = arith.truncf %450 : vector<32x8xf32> to vector<32x8xbf16>
    %cst_108 = arith.constant dense<0.000000e+00> : vector<16x32xf32>
    %452 = tpu.matmul %447, %449, %cst_108 {dimension_numbers = #tpu.dot_dimension_numbers<[1], [1], [0], [0], [0, 0, 1, 0], [], []>} : vector<16x8xbf16>, vector<32x8xbf16>, vector<16x32xf32> -> vector<16x32xf32>
    %453 = arith.addf %452, %4 : vector<16x32xf32>
    %cst_109 = arith.constant dense<0xFF800000> : vector<16xf32>
    %454 = vector.multi_reduction <maximumf>, %453, %cst_109 [1] : vector<16x32xf32> to vector<16xf32>
    %455 = vector.shape_cast %454 : vector<16xf32> to vector<16x1xf32>
    %456 = vector.broadcast %455 : vector<16x1xf32> to vector<16x32xf32>
    %457 = arith.subf %453, %456 : vector<16x32xf32>
    %458 = math.exp %457 : vector<16x32xf32>
    %cst_110 = arith.constant dense<0.000000e+00> : vector<16xf32>
    %459 = vector.multi_reduction <add>, %458, %cst_110 [1] : vector<16x32xf32> to vector<16xf32>
    %460 = vector.shape_cast %459 : vector<16xf32> to vector<16x1xf32>
    %461 = tpu.reciprocal %460 {approx = true} : vector<16x1xf32> -> vector<16x1xf32>
    %462 = vector.broadcast %461 : vector<16x1xf32> to vector<16x32xf32>
    %463 = arith.mulf %458, %462 : vector<16x32xf32>
    %464 = arith.truncf %463 : vector<16x32xf32> to vector<16x32xbf16>
    %cst_111 = arith.constant dense<0.000000e+00> : vector<16x8xf32>
    %465 = tpu.matmul %464, %451, %cst_111 {dimension_numbers = #tpu.dot_dimension_numbers<[1], [0], [0], [1], [0, 0, 1, 1], [], []>} : vector<16x32xbf16>, vector<32x8xbf16>, vector<16x8xf32> -> vector<16x8xf32>
    %466 = vector.extract_strided_slice %442 {offsets = [0, 8], sizes = [16, 8], strides = [1, 1]} : vector<16x32xf32> to vector<16x8xf32>
    %467 = arith.truncf %466 : vector<16x8xf32> to vector<16x8xbf16>
    %468 = vector.extract_strided_slice %445 {offsets = [0, 16], sizes = [32, 8], strides = [1, 1]} : vector<32x64xf32> to vector<32x8xf32>
    %469 = arith.truncf %468 : vector<32x8xf32> to vector<32x8xbf16>
    %470 = vector.extract_strided_slice %445 {offsets = [0, 24], sizes = [32, 8], strides = [1, 1]} : vector<32x64xf32> to vector<32x8xf32>
    %471 = arith.truncf %470 : vector<32x8xf32> to vector<32x8xbf16>
    %cst_112 = arith.constant dense<0.000000e+00> : vector<16x32xf32>
    %472 = tpu.matmul %467, %469, %cst_112 {dimension_numbers = #tpu.dot_dimension_numbers<[1], [1], [0], [0], [0, 0, 1, 0], [], []>} : vector<16x8xbf16>, vector<32x8xbf16>, vector<16x32xf32> -> vector<16x32xf32>
    %473 = arith.addf %472, %4 : vector<16x32xf32>
    %cst_113 = arith.constant dense<0xFF800000> : vector<16xf32>
    %474 = vector.multi_reduction <maximumf>, %473, %cst_113 [1] : vector<16x32xf32> to vector<16xf32>
    %475 = vector.shape_cast %474 : vector<16xf32> to vector<16x1xf32>
    %476 = vector.broadcast %475 : vector<16x1xf32> to vector<16x32xf32>
    %477 = arith.subf %473, %476 : vector<16x32xf32>
    %478 = math.exp %477 : vector<16x32xf32>
    %cst_114 = arith.constant dense<0.000000e+00> : vector<16xf32>
    %479 = vector.multi_reduction <add>, %478, %cst_114 [1] : vector<16x32xf32> to vector<16xf32>
    %480 = vector.shape_cast %479 : vector<16xf32> to vector<16x1xf32>
    %481 = tpu.reciprocal %480 {approx = true} : vector<16x1xf32> -> vector<16x1xf32>
    %482 = vector.broadcast %481 : vector<16x1xf32> to vector<16x32xf32>
    %483 = arith.mulf %478, %482 : vector<16x32xf32>
    %484 = arith.addf %463, %483 : vector<16x32xf32>
    %485 = arith.truncf %483 : vector<16x32xf32> to vector<16x32xbf16>
    %cst_115 = arith.constant dense<0.000000e+00> : vector<16x8xf32>
    %486 = tpu.matmul %485, %471, %cst_115 {dimension_numbers = #tpu.dot_dimension_numbers<[1], [0], [0], [1], [0, 0, 1, 1], [], []>} : vector<16x32xbf16>, vector<32x8xbf16>, vector<16x8xf32> -> vector<16x8xf32>
    %487 = vector.extract_strided_slice %442 {offsets = [0, 16], sizes = [16, 8], strides = [1, 1]} : vector<16x32xf32> to vector<16x8xf32>
    %488 = arith.truncf %487 : vector<16x8xf32> to vector<16x8xbf16>
    %489 = vector.extract_strided_slice %445 {offsets = [0, 32], sizes = [32, 8], strides = [1, 1]} : vector<32x64xf32> to vector<32x8xf32>
    %490 = arith.truncf %489 : vector<32x8xf32> to vector<32x8xbf16>
    %491 = vector.extract_strided_slice %445 {offsets = [0, 40], sizes = [32, 8], strides = [1, 1]} : vector<32x64xf32> to vector<32x8xf32>
    %492 = arith.truncf %491 : vector<32x8xf32> to vector<32x8xbf16>
    %cst_116 = arith.constant dense<0.000000e+00> : vector<16x32xf32>
    %493 = tpu.matmul %488, %490, %cst_116 {dimension_numbers = #tpu.dot_dimension_numbers<[1], [1], [0], [0], [0, 0, 1, 0], [], []>} : vector<16x8xbf16>, vector<32x8xbf16>, vector<16x32xf32> -> vector<16x32xf32>
    %494 = arith.addf %493, %4 : vector<16x32xf32>
    %cst_117 = arith.constant dense<0xFF800000> : vector<16xf32>
    %495 = vector.multi_reduction <maximumf>, %494, %cst_117 [1] : vector<16x32xf32> to vector<16xf32>
    %496 = vector.shape_cast %495 : vector<16xf32> to vector<16x1xf32>
    %497 = vector.broadcast %496 : vector<16x1xf32> to vector<16x32xf32>
    %498 = arith.subf %494, %497 : vector<16x32xf32>
    %499 = math.exp %498 : vector<16x32xf32>
    %cst_118 = arith.constant dense<0.000000e+00> : vector<16xf32>
    %500 = vector.multi_reduction <add>, %499, %cst_118 [1] : vector<16x32xf32> to vector<16xf32>
    %501 = vector.shape_cast %500 : vector<16xf32> to vector<16x1xf32>
    %502 = tpu.reciprocal %501 {approx = true} : vector<16x1xf32> -> vector<16x1xf32>
    %503 = vector.broadcast %502 : vector<16x1xf32> to vector<16x32xf32>
    %504 = arith.mulf %499, %503 : vector<16x32xf32>
    %505 = arith.addf %484, %504 : vector<16x32xf32>
    %506 = arith.truncf %504 : vector<16x32xf32> to vector<16x32xbf16>
    %cst_119 = arith.constant dense<0.000000e+00> : vector<16x8xf32>
    %507 = tpu.matmul %506, %492, %cst_119 {dimension_numbers = #tpu.dot_dimension_numbers<[1], [0], [0], [1], [0, 0, 1, 1], [], []>} : vector<16x32xbf16>, vector<32x8xbf16>, vector<16x8xf32> -> vector<16x8xf32>
    %508 = vector.extract_strided_slice %442 {offsets = [0, 24], sizes = [16, 8], strides = [1, 1]} : vector<16x32xf32> to vector<16x8xf32>
    %509 = arith.truncf %508 : vector<16x8xf32> to vector<16x8xbf16>
    %510 = vector.extract_strided_slice %445 {offsets = [0, 48], sizes = [32, 8], strides = [1, 1]} : vector<32x64xf32> to vector<32x8xf32>
    %511 = arith.truncf %510 : vector<32x8xf32> to vector<32x8xbf16>
    %512 = vector.extract_strided_slice %445 {offsets = [0, 56], sizes = [32, 8], strides = [1, 1]} : vector<32x64xf32> to vector<32x8xf32>
    %513 = arith.truncf %512 : vector<32x8xf32> to vector<32x8xbf16>
    %cst_120 = arith.constant dense<0.000000e+00> : vector<16x32xf32>
    %514 = tpu.matmul %509, %511, %cst_120 {dimension_numbers = #tpu.dot_dimension_numbers<[1], [1], [0], [0], [0, 0, 1, 0], [], []>} : vector<16x8xbf16>, vector<32x8xbf16>, vector<16x32xf32> -> vector<16x32xf32>
    %515 = arith.addf %514, %4 : vector<16x32xf32>
    %cst_121 = arith.constant dense<0xFF800000> : vector<16xf32>
    %516 = vector.multi_reduction <maximumf>, %515, %cst_121 [1] : vector<16x32xf32> to vector<16xf32>
    %517 = vector.shape_cast %516 : vector<16xf32> to vector<16x1xf32>
    %518 = vector.broadcast %517 : vector<16x1xf32> to vector<16x32xf32>
    %519 = arith.subf %515, %518 : vector<16x32xf32>
    %520 = math.exp %519 : vector<16x32xf32>
    %cst_122 = arith.constant dense<0.000000e+00> : vector<16xf32>
    %521 = vector.multi_reduction <add>, %520, %cst_122 [1] : vector<16x32xf32> to vector<16xf32>
    %522 = vector.shape_cast %521 : vector<16xf32> to vector<16x1xf32>
    %523 = tpu.reciprocal %522 {approx = true} : vector<16x1xf32> -> vector<16x1xf32>
    %524 = vector.broadcast %523 : vector<16x1xf32> to vector<16x32xf32>
    %525 = arith.mulf %520, %524 : vector<16x32xf32>
    %526 = arith.addf %505, %525 : vector<16x32xf32>
    %527 = arith.truncf %525 : vector<16x32xf32> to vector<16x32xbf16>
    %cst_123 = arith.constant dense<0.000000e+00> : vector<16x8xf32>
    %528 = tpu.matmul %527, %513, %cst_123 {dimension_numbers = #tpu.dot_dimension_numbers<[1], [0], [0], [1], [0, 0, 1, 1], [], []>} : vector<16x32xbf16>, vector<32x8xbf16>, vector<16x8xf32> -> vector<16x8xf32>
    %529 = tpu.concatenate %465, %486, %507, %528 in 1 : vector<16x8xf32>, vector<16x8xf32>, vector<16x8xf32>, vector<16x8xf32> -> vector<16x32xf32>
    %530 = arith.truncf %529 : vector<16x32xf32> to vector<16x32xbf16>
    %cst_124 = arith.constant dense<0.000000e+00> : vector<16x32xf32>
    %531 = tpu.matmul %530, %307, %cst_124 {dimension_numbers = #tpu.dot_dimension_numbers<[1], [0], [0], [1], [0, 0, 1, 1], [], []>} : vector<16x32xbf16>, vector<32x32xbf16>, vector<16x32xf32> -> vector<16x32xf32>
    %532 = arith.addf %418, %531 : vector<16x32xf32>
    %533 = vector.broadcast %298 : vector<1x32xf32> to vector<16x32xf32>
    %534 = arith.addf %532, %533 : vector<16x32xf32>
    %cst_125 = arith.constant 2.500000e-01 : f32
    %535 = vector.broadcast %cst_125 : f32 to vector<16x32xf32>
    %536 = arith.mulf %526, %535 : vector<16x32xf32>
    %cst_126 = arith.constant dense<0.000000e+00> : vector<16xf32>
    %537 = vector.multi_reduction <add>, %534, %cst_126 [1] : vector<16x32xf32> to vector<16xf32>
    %538 = vector.shape_cast %537 : vector<16xf32> to vector<16x1xf32>
    %cst_127 = arith.constant 3.200000e+01 : f32
    %539 = vector.broadcast %cst_127 : f32 to vector<16x1xf32>
    %540 = arith.divf %538, %539 : vector<16x1xf32>
    %541 = vector.broadcast %540 : vector<16x1xf32> to vector<16x32xf32>
    %542 = arith.subf %534, %541 : vector<16x32xf32>
    %543 = arith.mulf %542, %542 : vector<16x32xf32>
    %cst_128 = arith.constant dense<0.000000e+00> : vector<16xf32>
    %544 = vector.multi_reduction <add>, %543, %cst_128 [1] : vector<16x32xf32> to vector<16xf32>
    %545 = vector.shape_cast %544 : vector<16xf32> to vector<16x1xf32>
    %cst_129 = arith.constant 3.200000e+01 : f32
    %546 = vector.broadcast %cst_129 : f32 to vector<16x1xf32>
    %547 = arith.divf %545, %546 : vector<16x1xf32>
    %cst_130 = arith.constant 9.99999974E-6 : f32
    %548 = vector.broadcast %cst_130 : f32 to vector<16x1xf32>
    %549 = arith.addf %547, %548 : vector<16x1xf32>
    %550 = math.rsqrt %549 : vector<16x1xf32>
    %551 = vector.broadcast %550 : vector<16x1xf32> to vector<16x32xf32>
    %552 = arith.mulf %542, %551 : vector<16x32xf32>
    %553 = vector.broadcast %299 : vector<1x32xf32> to vector<16x32xf32>
    %554 = arith.mulf %552, %553 : vector<16x32xf32>
    %555 = vector.broadcast %300 : vector<1x32xf32> to vector<16x32xf32>
    %556 = arith.addf %554, %555 : vector<16x32xf32>
    %557 = arith.truncf %556 : vector<16x32xf32> to vector<16x32xbf16>
    %cst_131 = arith.constant dense<0.000000e+00> : vector<16x64xf32>
    %558 = tpu.matmul %557, %308, %cst_131 {dimension_numbers = #tpu.dot_dimension_numbers<[1], [0], [0], [1], [0, 0, 1, 1], [], []>} : vector<16x32xbf16>, vector<32x64xbf16>, vector<16x64xf32> -> vector<16x64xf32>
    %559 = vector.broadcast %301 : vector<1x64xf32> to vector<16x64xf32>
    %560 = arith.addf %558, %559 : vector<16x64xf32>
    %cst_132 = arith.constant 0.000000e+00 : f32
    %561 = vector.broadcast %cst_132 : f32 to vector<16x64xf32>
    %562 = arith.maximumf %560, %561 : vector<16x64xf32>
    %563 = arith.truncf %562 : vector<16x64xf32> to vector<16x64xbf16>
    %cst_133 = arith.constant dense<0.000000e+00> : vector<16x32xf32>
    %564 = tpu.matmul %563, %287, %cst_133 {dimension_numbers = #tpu.dot_dimension_numbers<[1], [0], [0], [1], [0, 0, 1, 1], [], []>} : vector<16x64xbf16>, vector<64x32xbf16>, vector<16x32xf32> -> vector<16x32xf32>
    %565 = arith.addf %534, %564 : vector<16x32xf32>
    %566 = vector.broadcast %302 : vector<1x32xf32> to vector<16x32xf32>
    %567 = arith.addf %565, %566 : vector<16x32xf32>
    %c0_134 = arith.constant 0 : index
    %c0_135 = arith.constant 0 : index
    %568 = vector.load %arg7[%c0_134, %c0_135] : memref<2x32xf32, #tpu.memory_space<vmem>>, vector<2x32xf32>
    %569 = vector.extract_strided_slice %568 {offsets = [0, 0], sizes = [1, 32], strides = [1, 1]} : vector<2x32xf32> to vector<1x32xf32>
    %570 = vector.extract_strided_slice %568 {offsets = [1, 0], sizes = [1, 32], strides = [1, 1]} : vector<2x32xf32> to vector<1x32xf32>
    %cst_136 = arith.constant dense<0.000000e+00> : vector<16xf32>
    %571 = vector.multi_reduction <add>, %567, %cst_136 [1] : vector<16x32xf32> to vector<16xf32>
    %572 = vector.shape_cast %571 : vector<16xf32> to vector<16x1xf32>
    %cst_137 = arith.constant 3.200000e+01 : f32
    %573 = vector.broadcast %cst_137 : f32 to vector<16x1xf32>
    %574 = arith.divf %572, %573 : vector<16x1xf32>
    %575 = vector.broadcast %574 : vector<16x1xf32> to vector<16x32xf32>
    %576 = arith.subf %567, %575 : vector<16x32xf32>
    %577 = arith.mulf %576, %576 : vector<16x32xf32>
    %cst_138 = arith.constant dense<0.000000e+00> : vector<16xf32>
    %578 = vector.multi_reduction <add>, %577, %cst_138 [1] : vector<16x32xf32> to vector<16xf32>
    %579 = vector.shape_cast %578 : vector<16xf32> to vector<16x1xf32>
    %cst_139 = arith.constant 3.200000e+01 : f32
    %580 = vector.broadcast %cst_139 : f32 to vector<16x1xf32>
    %581 = arith.divf %579, %580 : vector<16x1xf32>
    %cst_140 = arith.constant 9.99999974E-6 : f32
    %582 = vector.broadcast %cst_140 : f32 to vector<16x1xf32>
    %583 = arith.addf %581, %582 : vector<16x1xf32>
    %584 = math.rsqrt %583 : vector<16x1xf32>
    %585 = vector.broadcast %584 : vector<16x1xf32> to vector<16x32xf32>
    %586 = arith.mulf %576, %585 : vector<16x32xf32>
    %587 = vector.broadcast %569 : vector<1x32xf32> to vector<16x32xf32>
    %588 = arith.mulf %586, %587 : vector<16x32xf32>
    %589 = vector.broadcast %570 : vector<1x32xf32> to vector<16x32xf32>
    %590 = arith.addf %588, %589 : vector<16x32xf32>
    %c0_141 = arith.constant 0 : index
    %c0_142 = arith.constant 0 : index
    %591 = vector.load %arg8[%c0_141, %c0_142] : memref<16x32xf32, #tpu.memory_space<vmem>>, vector<16x32xf32>
    tpu.vector_store %arg8[%c0_141, %c0_142], %590 {strides = array<i32>} : memref<16x32xf32, #tpu.memory_space<vmem>>, vector<16x32xf32>,
    %c0_143 = arith.constant 0 : index
    %c0_144 = arith.constant 0 : index
    %592 = vector.load %arg9[%c0_143, %c0_144] : memref<16x32xf32, #tpu.memory_space<vmem>>, vector<16x32xf32>
    tpu.vector_store %arg9[%c0_143, %c0_144], %536 {strides = array<i32>} : memref<16x32xf32, #tpu.memory_space<vmem>>, vector<16x32xf32>,
    return
  }
}

</mosaic_0001>

<bundles_post_ra>
// kernel: transformer_decoder_forward.1
= control target key start
LH: loop header
LB: loop body
LE: loop exit
PB: predicated region body
PF: predicated region fallthrough
CT: control target
= control target key end

     0   :  { %vm62_vm0 = vcmask 261120   ;;  %v4191_v14 = vmov 0.0   ;;  %vm4192_vm1 = vmmov 0   ;;  %v90_v21 = vlaneseq  ;;  %s4193_s18 = smov 96   ;;  %s4194_s19 = smov 120   ;;  %s5167_s0 = inlined_call_operand.vmem [shape: f32[16,32], index: 0, kind: input, shape index: {}]   ;;  %s5168_s4 = inlined_call_operand.vmem [shape: bf16[2,32,320], index: 4, kind: input, shape index: {}]   ;;  %s5169_s6 = inlined_call_operand.vmem [shape: f32[2,13,96], index: 6, kind: input, shape index: {}]   ;;  %s5170_s2 = inlined_call_operand.vmem [shape: f32[16,16], index: 2, kind: input, shape index: {}]   ;;  %s5171_s1 = inlined_call_operand.vmem [shape: f32[32,32], index: 1, kind: input, shape index: {}]   ;;  %s5172_s3 = inlined_call_operand.vmem [shape: f32[16,32], index: 3, kind: input, shape index: {}]   ;;  %s5173_s5 = inlined_call_operand.vmem [shape: bf16[2,64,32], index: 5, kind: input, shape index: {}]   ;;  %s5174_s9 = inlined_call_operand.vmem [shape: f32[16,32], index: 9, kind: output, shape index: {1}]   ;;  %s5175_s7 = inlined_call_operand.vmem [shape: f32[2,32], index: 7, kind: input, shape index: {}]   ;;  %s5176_s8 = inlined_call_operand.vmem [shape: f32[16,32], index: 8, kind: output, shape index: {0}]  }
   0x1   :  { %v4261_v0 = vld [vmem:[%s5167_s0] sm:$0xff]  ;;  %v4266_v1 = vld [vmem:[%s5167_s0 + $0x8] sm:$0xff]  ;;  %3586 = vmatprep.subr.bf16.mxu1 %v4191_v14  ;;  %3590 = vmatprep.mubr.msk.bf16.mxu1 %vm4192_vm1, %v4191_v14  ;;  %s4195_s20 = smov 104   ;;  %s4196_s21 = smov 80   ;;  %vm167_vm2 = vcmask 64512   ;;  %vm215_vm3 = vcmask 130048  }
   0x2   :  { %v63_v2 = vsel %vm62_vm0, %v4261_v0, 0.0  ;;  %v66_v3 = vsel %vm62_vm0, %v4266_v1, 0.0  ;;  %v4280_v15 = vld [vmem:[%s5168_s4] ss:$12 sps:$4 sm:$0xff]   ;;  %3600 = vmatprep.subr.bf16.mxu0 %v4191_v14  ;;  %3602 = vmatprep.mubr.msk.bf16.mxu0 %vm4192_vm1, %v4191_v14  ;;  %v4291_v16 = vld [vmem:[%s5168_s4 + $0x18] ss:$12 sps:$4 sm:$0xff]  }
   0x3   :  { %64 = vadd.xlane.f32.xlu0 %v63_v2  ;;  %3587 = vmatpush3.bf16.msra.mxu1 %v4280_v15  ;;  %v4296_v24 = vshrl.u32 %v90_v21, 7  ;;  %v4304_v26 = vld [vmem:[%s5169_s6] sm:$0xff]  ;;  %s4197_s22 = smov 72   ;;  %s4198_s23 = smov 56   ;;  %v41_v61 = vld [vmem:[%s5170_s2 + $0x8] sm:$0xff]  ;;  %vm677_vm4 = vcmask 195584  }
   0x4   :  { %3588 = vmatprep.subr.bf16.mxu1 %v4191_v14  ;;  %s4199_s24 = smov 48   ;;  %v40_v59 = vld [vmem:[%s5170_s2] sm:$0xff]  ;;  %s4200_s29 = smov 112   ;;  %vm1630_vm5 = vcmask 523264  }
   0x5   :  { %v4299_v25 = vsub.s32 0, %v4296_v24  ;;  %v4309_v30 = vsub.s32 1, %v4296_v24  ;;  %v4317_v39 = vsub.s32 2, %v4296_v24  ;;  %s4201_s30 = smov 64   ;;  %s4202_s10 = smov 40  }
   0x6   :  { %s4203_s11 = smov 88   ;;  %s4204_s13 = smov 32  }
   0x7   :  { %67 = vadd.xlane.f32.xlu0 %v66_v3  ;;  %3589 = vmatpush3.bf16.msra.mxu1 %v4291_v16  ;;  %v93_v29 = vrot.slane %v4304_v26, %v4299_v25  ;;  %v99_v34 = vrot.slane %v4304_v26, %v4309_v30  ;;  %v106_v40 = vrot.slane %v4304_v26, %v4317_v39  ;;  %s4205_s14 = smov 8   ;;  %s4206_s15 = smov 16  }
   0x8   :  { %3594 = vmatprep.subr.bf16.mxu1 %v4191_v14  ;;  %s4207_s16 = smov 24  }
  0x90   :  { %v65_v4 = vpop.xlane.xlu0 %64 }
  0x91   :  { %v70_v5 = vmul.f32 0.03125, %v65_v4 }
  0x93   :  { %v72_v6 = vsub.f32 %v4261_v0, %v70_v5 }
  0x94   :  { %v68_v7 = vpop.xlane.xlu0 %67 }
  0x95   :  { %v71_v8 = vmul.f32 0.03125, %v68_v7  ;;  %v74_v9 = vmul.f32 %v72_v6, %v72_v6 }
  0x97   :  { %v73_v10 = vsub.f32 %v4266_v1, %v71_v8  ;;  %v76_v11 = vsel %vm62_vm0, %v74_v9, 0.0 }
  0x98   :  { %77 = vadd.xlane.f32.xlu1 %v76_v11 }
  0x99   :  { %v75_v12 = vmul.f32 %v73_v10, %v73_v10 }
  0x9b   :  { %v79_v13 = vsel %vm62_vm0, %v75_v12, 0.0 }
  0x9c   :  { %80 = vadd.xlane.f32.xlu1 %v79_v13 }
 0x125   :  { %v78_v17 = vpop.xlane.xlu1 %77 }
 0x126   :  { %v82_v18 = vmul.f32 0.03125, %v78_v17 }
 0x128   :  { %v84_v19 = vadd.f32 1e-05, %v82_v18 }
 0x129   :  { %v81_v20 = vpop.xlane.xlu1 %80 }
 0x12a   :  { %4031 = vrsqrt.f32 %v84_v19  ;;  %v83_v22 = vmul.f32 0.03125, %v81_v20 }
 0x12c   :  { %v85_v23 = vadd.f32 1e-05, %v83_v22 }
 0x12e   :  { %4033 = vrsqrt.f32 %v85_v23 }
 0x134   :  { %v4032_v27 = vpop.eup %4031 }
 0x135   :  { %v88_v28 = vmul.f32 %v4032_v27, %v72_v6 }
 0x137   :  { %v94_v33 = vmul.f32 %v93_v29, %v88_v28 }
 0x138   :  { %v4034_v31 = vpop.eup %4033 }
 0x139   :  { %v89_v32 = vmul.f32 %v4034_v31, %v73_v10  ;;  %v100_v36 = vadd.f32 %v99_v34, %v94_v33 }
 0x13b   :  { %v95_v35 = vmul.f32 %v93_v29, %v89_v32 }
 0x13d   :  { %v101_v37 = vadd.f32 %v99_v34, %v95_v35 }
 0x13f   :  { %v102_v38 = vpack.c.bf16 %v101_v37, %v100_v36 }
 0x141   :  { %3591 = vmatmul.mubr.msk.bf16.vlgmr.msra.gmra.mrb[0].mxu1 %vm62_vm0, %v102_v38 }
 0x142   :  { %3596 = vmatprep.mubr.msk.bf16.mxu1 %vm4192_vm1, %v4191_v14 }
 0x214   :  { %v156_v41 = vpop.f32.mrb[0].mxu1 }
 0x215   :  { %v3592_v42 = vpop.f32.mrb[1].mxu1  ;;  %v157_v44 = vadd.f32 %v156_v41, %v106_v40 }
 0x216   :  { %v159_v43 = vpop.f32.mrb[2].mxu1 }
 0x217   :  { %v160_v45 = vadd.f32 %v159_v43, %v106_v40  ;;  %v3593_v46 = vpop.f32.mrb[3].mxu1 }
 0x219   :  { %v4321_v47 = vpack.c.bf16 %v160_v45, %v157_v44 }
 0x21b   :  { %288 = vrot.lane.b32.xlu1 %v4321_v47, %s4193_s18  ;;  %165 = vrot.lane.b32.xlu0 %v4321_v47, %s4194_s19 }
 0x21f   :  { %286 = vrot.lane.b32.xlu1 %v4321_v47, %s4195_s20  ;;  %407 = vrot.lane.b32.xlu0 %v4321_v47, %s4196_s21 }
 0x223   :  { %409 = vrot.lane.b32.xlu1 %v4321_v47, %s4197_s22  ;;  %528 = vrot.lane.b32.xlu0 %v4321_v47, %s4198_s23 }
 0x227   :  { %530 = vrot.lane.b32.xlu1 %v4321_v47, %s4199_s24 }
 0x28d   :  { %v166_v48 = vpop.permute.xlu0 %165  ;;  %v289_v50 = vpop.permute.xlu1 %288 }
 0x28e   :  { %v172_v49 = vsel %vm167_vm2, %v166_v48, 0  ;;  %v294_v52 = vsel %vm167_vm2, %v289_v50, 0 }
 0x28f   :  { %3595 = vmatpush3.bf16.xpose.msra.mxu1 %v172_v49 }
 0x290   :  { %3606 = vmatprep.subr.bf16.mxu1 %v4191_v14 }
 0x291   :  { %v287_v51 = vpop.permute.xlu1 %286  ;;  %v408_v56 = vpop.permute.xlu0 %407 }
 0x295   :  { %v410_v53 = vpop.permute.xlu1 %409  ;;  %v529_v58 = vpop.permute.xlu0 %528 }
 0x296   :  { %3597 = vmatmul.mubr.msk.bf16.vlgmr.msra.gmra.mrb[4].mxu1 %vm167_vm2, %v4321_v47  ;;  %v415_v54 = vsel %vm167_vm2, %v410_v53, 0 }
 0x297   :  { %3607 = vmatpush3.bf16.xpose.msra.mxu1 %v294_v52  ;;  %3608 = vmatprep.mubr.msk.bf16.mxu1 %vm4192_vm1, %v4191_v14 }
 0x298   :  { %3618 = vmatprep.subr.bf16.mxu1 %v4191_v14 }
 0x299   :  { %v531_v55 = vpop.permute.xlu1 %530 }
 0x29a   :  { %v536_v57 = vsel %vm167_vm2, %v531_v55, 0 }
 0x29e   :  { %3609 = vmatmul.mubr.msk.bf16.vlgmr.msra.gmra.mrb[8].mxu1 %vm167_vm2, %v287_v51 }
 0x29f   :  { %3619 = vmatpush3.bf16.xpose.msra.mxu1 %v415_v54  ;;  %3620 = vmatprep.mubr.msk.bf16.mxu1 %vm4192_vm1, %v4191_v14 }
 0x2a0   :  { %3630 = vmatprep.subr.bf16.mxu1 %v4191_v14 }
 0x2a6   :  { %3621 = vmatmul.mubr.msk.bf16.vlgmr.msra.gmra.mrb[12].mxu1 %vm167_vm2, %v408_v56 }
 0x2a7   :  { %3631 = vmatpush3.bf16.xpose.msra.mxu1 %v536_v57  ;;  %3632 = vmatprep.mubr.msk.bf16.mxu1 %vm4192_vm1, %v4191_v14 }
 0x2a8   :  { %3642 = vmatprep.subr.bf16.mxu1 %v4191_v14 }
 0x2ae   :  { %3633 = vmatmul.mubr.msk.bf16.vlgmr.msra.gmra.mrb[16].mxu1 %vm167_vm2, %v529_v58 }
 0x2af   :  { %3646 = vmatprep.mubr.msk.bf16.mxu1 %vm4192_vm1, %v4191_v14 }
 0x369   :  { %v208_v60 = vpop.f32.mrb[4].mxu1 }
 0x36a   :  { %v209_v62 = vadd.f32 %v208_v60, %v40_v59  ;;  %v3598_v63 = vpop.f32.mrb[5].mxu1 }
 0x36b   :  { %v211_v2 = vpop.f32.mrb[6].mxu1 }
 0x36c   :  { %v212_v3 = vadd.f32 %v211_v2, %v41_v61  ;;  %v3599_v4 = vpop.f32.mrb[7].mxu1  ;;  %v216_v5 = vsel %vm215_vm3, %v209_v62, -inf }
 0x36d   :  { %217 = vmax.xlane.f32.xlu1 %v216_v5 }
 0x36e   :  { %v219_v6 = vsel %vm215_vm3, %v212_v3, -inf }
 0x36f   :  { %220 = vmax.xlane.f32.xlu0 %v219_v6 }
 0x371   :  { %v330_v7 = vpop.f32.mrb[8].mxu1 }
 0x372   :  { %v331_v8 = vadd.f32 %v330_v7, %v40_v59  ;;  %v3610_v9 = vpop.f32.mrb[9].mxu1 }
 0x373   :  { %v333_v10 = vpop.f32.mrb[10].mxu1 }
 0x374   :  { %v334_v11 = vadd.f32 %v333_v10, %v41_v61  ;;  %v3611_v12 = vpop.f32.mrb[11].mxu1  ;;  %v337_v13 = vsel %vm215_vm3, %v331_v8, -inf }
 0x375   :  { %338 = vmax.xlane.f32.xlu0 %v337_v13 }
 0x376   :  { %v340_v17 = vsel %vm215_vm3, %v334_v11, -inf }
 0x379   :  { %341 = vmax.xlane.f32.xlu0 %v340_v17  ;;  %v451_v18 = vpop.f32.mrb[12].mxu1 }
 0x37a   :  { %v452_v19 = vadd.f32 %v451_v18, %v40_v59  ;;  %v3622_v20 = vpop.f32.mrb[13].mxu1 }
 0x37b   :  { %v454_v21 = vpop.f32.mrb[14].mxu1 }
 0x37c   :  { %v455_v22 = vadd.f32 %v454_v21, %v41_v61  ;;  %v3623_v23 = vpop.f32.mrb[15].mxu1  ;;  %v458_v27 = vsel %vm215_vm3, %v452_v19, -inf }
 0x37d   :  { %459 = vmax.xlane.f32.xlu1 %v458_v27 }
 0x37e   :  { %v461_v28 = vsel %vm215_vm3, %v455_v22, -inf }
 0x37f   :  { %462 = vmax.xlane.f32.xlu0 %v461_v28 }
 0x381   :  { %v572_v29 = vpop.f32.mrb[16].mxu1 }
 0x382   :  { %v573_v31 = vadd.f32 %v572_v29, %v40_v59  ;;  %v3634_v32 = vpop.f32.mrb[17].mxu1 }
 0x383   :  { %v575_v33 = vpop.f32.mrb[18].mxu1 }
 0x384   :  { %v576_v34 = vadd.f32 %v575_v33, %v41_v61  ;;  %v3635_v35 = vpop.f32.mrb[19].mxu1  ;;  %v579_v36 = vsel %vm215_vm3, %v573_v31, -inf }
 0x385   :  { %580 = vmax.xlane.f32.xlu1 %v579_v36 }
 0x386   :  { %v582_v37 = vsel %vm215_vm3, %v576_v34, -inf }
 0x387   :  { %583 = vmax.xlane.f32.xlu0 %v582_v37 }
 0x396   :  { %239 = vrot.lane.b32.xlu1 %v4321_v47, %s4200_s29 }
 0x3fa   :  { %v218_v38 = vpop.xlane.xlu1 %217 }
 0x3fb   :  { %v222_v40 = vsub.f32 %v209_v62, %v218_v38 }
 0x3fc   :  { %v221_v41 = vpop.xlane.xlu0 %220 }
 0x3fd   :  { %v224_v42 = vmul.f32 1.442695, %v222_v40  ;;  %v223_v43 = vsub.f32 %v212_v3, %v221_v41 }
 0x3ff   :  { %4035 = vpow2.f32 %v224_v42  ;;  %v226_v44 = vmul.f32 1.442695, %v223_v43 }
 0x401   :  { %4037 = vpow2.f32 %v226_v44 }
 0x402   :  { %v339_v45 = vpop.xlane.xlu0 %338 }
 0x403   :  { %v343_v46 = vsub.f32 %v331_v8, %v339_v45 }
 0x405   :  { %v345_v48 = vmul.f32 1.442695, %v343_v46 }
 0x406   :  { %v342_v49 = vpop.xlane.xlu0 %341 }
 0x407   :  { %4039 = vpow2.f32 %v345_v48  ;;  %v344_v50 = vsub.f32 %v334_v11, %v342_v49 }
 0x409   :  { %v4036_v51 = vpop.eup %4035  ;;  %v347_v52 = vmul.f32 1.442695, %v344_v50 }
 0x40a   :  { %v460_v53 = vpop.xlane.xlu1 %459  ;;  %v228_v54 = vsel %vm215_vm3, %v4036_v51, 0.0 }
 0x40b   :  { %v4038_v55 = vpop.eup %4037  ;;  %4041 = vpow2.f32 %v347_v52  ;;  %v464_v56 = vsub.f32 %v452_v19, %v460_v53  ;;  %229 = vadd.xlane.f32.xlu1 %v228_v54 }
 0x40c   :  { %v463_v57 = vpop.xlane.xlu0 %462  ;;  %v231_v58 = vsel %vm215_vm3, %v4038_v55, 0.0 }
 0x40d   :  { %v466_v59 = vmul.f32 1.442695, %v464_v56  ;;  %v465_v60 = vsub.f32 %v455_v22, %v463_v57  ;;  %232 = vadd.xlane.f32.xlu0 %v231_v58  ;;  %v4404_v58 = vld [vmem:[%s5168_s4 + $0x4] ss:$12 sps:$4 sm:$0xff]  }
 0x40f   :  { %4043 = vpow2.f32 %v466_v59  ;;  %v468_v61 = vmul.f32 1.442695, %v465_v60 }
 0x411   :  { %v4040_v62 = vpop.eup %4039  ;;  %4045 = vpow2.f32 %v468_v61 }
 0x412   :  { %v581_v63 = vpop.xlane.xlu1 %580  ;;  %v349_v2 = vsel %vm215_vm3, %v4040_v62, 0.0 }
 0x413   :  { %v585_v3 = vsub.f32 %v573_v31, %v581_v63  ;;  %350 = vadd.xlane.f32.xlu1 %v349_v2 }
 0x414   :  { %v584_v4 = vpop.xlane.xlu0 %583 }
 0x415   :  { %v4042_v5 = vpop.eup %4041  ;;  %v587_v6 = vmul.f32 1.442695, %v585_v3  ;;  %v586_v7 = vsub.f32 %v576_v34, %v584_v4 }
 0x416   :  { %v240_v8 = vpop.permute.xlu1 %239  ;;  %v352_v9 = vsel %vm215_vm3, %v4042_v5, 0.0 }
 0x417   :  { %4047 = vpow2.f32 %v587_v6  ;;  %v589_v10 = vmul.f32 1.442695, %v586_v7  ;;  %3601 = vmatpush3.bf16.msra.mxu0 %v240_v8  ;;  %353 = vadd.xlane.f32.xlu0 %v352_v9 }
 0x418   :  { %3612 = vmatprep.subr.bf16.mxu0 %v4191_v14 }
 0x419   :  { %v4044_v11 = vpop.eup %4043  ;;  %4049 = vpow2.f32 %v589_v10 }
 0x41a   :  { %v470_v12 = vsel %vm215_vm3, %v4044_v11, 0.0 }
 0x41b   :  { %v4046_v13 = vpop.eup %4045  ;;  %471 = vadd.xlane.f32.xlu1 %v470_v12 }
 0x41c   :  { %v473_v17 = vsel %vm215_vm3, %v4046_v13, 0.0 }
 0x41d   :  { %474 = vadd.xlane.f32.xlu0 %v473_v17 }
 0x421   :  { %v4048_v18 = vpop.eup %4047 }
 0x422   :  { %v591_v19 = vsel %vm215_vm3, %v4048_v18, 0.0 }
 0x423   :  { %v4050_v20 = vpop.eup %4049  ;;  %592 = vadd.xlane.f32.xlu1 %v591_v19 }
 0x424   :  { %v594_v21 = vsel %vm215_vm3, %v4050_v20, 0.0 }
 0x425   :  { %595 = vadd.xlane.f32.xlu0 %v594_v21 }
 0x434   :  { %481 = vrot.lane.b32.xlu1 %v4321_v47, %s4201_s30 }
 0x438   :  { %602 = vrot.lane.b32.xlu1 %v4321_v47, %s4202_s10 }
 0x43b   :  { %360 = vrot.lane.b32.xlu0 %v4321_v47, %s4203_s11 }
 0x43c   :  { %681 = vrot.lane.b32.xlu1 %v4280_v15, %s4204_s13 }
 0x498   :  { %v230_v22 = vpop.xlane.xlu1 %229 }
 0x499   :  { %4051 = vrcp.f32 %v230_v22 }
 0x49a   :  { %v233_v23 = vpop.xlane.xlu0 %232 }
 0x49b   :  { %4053 = vrcp.f32 %v233_v23 }
 0x4a0   :  { %v351_v31 = vpop.xlane.xlu1 %350 }
 0x4a3   :  { %v4052_v27 = vpop.eup %4051 }
 0x4a4   :  { %v354_v28 = vpop.xlane.xlu0 %353  ;;  %v236_v32 = vmul.f32 %v4052_v27, %v4036_v51 }
 0x4a5   :  { %v4054_v29 = vpop.eup %4053  ;;  %4055 = vrcp.f32 %v354_v28 }
 0x4a6   :  { %v237_v33 = vmul.f32 %v4054_v29, %v4038_v55  ;;  %4057 = vrcp.f32 %v351_v31 }
 0x4a8   :  { %v238_v34 = vpack.c.bf16 %v237_v33, %v236_v32  ;;  %v472_v47 = vpop.xlane.xlu1 %471 }
 0x4aa   :  { %3603 = vmatmul.mubr.msk.bf16.vlgmr.msra.gmra.mrb[0].mxu0 %vm215_vm3, %v238_v34  ;;  %v475_v35 = vpop.xlane.xlu0 %474 }
 0x4ab   :  { %3614 = vmatprep.mubr.msk.bf16.mxu0 %vm4192_vm1, %v4191_v14  ;;  %4059 = vrcp.f32 %v475_v35 }
 0x4ac   :  { %4061 = vrcp.f32 %v472_v47 }
 0x4af   :  { %v4056_v36 = vpop.eup %4055 }
 0x4b0   :  { %v4058_v38 = vpop.eup %4057  ;;  %v358_v40 = vmul.f32 %v4056_v36, %v4042_v5  ;;  %v593_v41 = vpop.xlane.xlu1 %592 }
 0x4b1   :  { %v357_v42 = vmul.f32 %v4058_v38, %v4040_v62  ;;  %v4427_v38 = vsub.s32 3, %v4296_v24 }
 0x4b2   :  { %v596_v37 = vpop.xlane.xlu0 %595 }
 0x4b3   :  { %4063 = vrcp.f32 %v596_v37  ;;  %v359_v44 = vpack.c.bf16 %v358_v40, %v357_v42  ;;  %v736_v40 = vrot.slane %v4304_v26, %v4427_v38 }
 0x4b4   :  { %4065 = vrcp.f32 %v593_v41  ;;  %v482_v46 = vpop.permute.xlu1 %481 }
 0x4b5   :  { %v4060_v45 = vpop.eup %4059 }
 0x4b6   :  { %v361_v43 = vpop.permute.xlu0 %360  ;;  %v4062_v48 = vpop.eup %4061  ;;  %v479_v49 = vmul.f32 %v4060_v45, %v4046_v13 }
 0x4b7   :  { %3613 = vmatpush3.bf16.msra.mxu0 %v361_v43  ;;  %v478_v50 = vmul.f32 %v4062_v48, %v4044_v11 }
 0x4b8   :  { %3624 = vmatprep.subr.bf16.mxu0 %v4191_v14  ;;  %v603_v53 = vpop.permute.xlu1 %602 }
 0x4b9   :  { %v480_v51 = vpack.c.bf16 %v479_v49, %v478_v50 }
 0x4ba   :  { %3615 = vmatmul.mubr.msk.bf16.vlgmr.msra.gmra.mrb[4].mxu0 %vm215_vm3, %v359_v44 }
 0x4bb   :  { %3625 = vmatpush3.bf16.msra.mxu0 %v482_v46  ;;  %3626 = vmatprep.mubr.msk.bf16.mxu0 %vm4192_vm1, %v4191_v14 }
 0x4bc   :  { %3636 = vmatprep.subr.bf16.mxu0 %v4191_v14  ;;  %v682_v63 = vpop.permute.xlu1 %681 }
 0x4bd   :  { %v4064_v52 = vpop.eup %4063  ;;  %3643 = vmatpush3.bf16.msra.mxu1 %v682_v63  ;;  %v35_v63 = vld [vmem:[%s5171_s1 + $0x8] sm:$0xff] }
 0x4be   :  { %v4066_v54 = vpop.eup %4065  ;;  %v600_v55 = vmul.f32 %v4064_v52, %v4050_v20  ;;  %3644 = vmatprep.subr.bf16.mxu1 %v4191_v14 }
 0x4bf   :  { %v599_v56 = vmul.f32 %v4066_v54, %v4048_v18 }
 0x4c1   :  { %v601_v57 = vpack.c.bf16 %v600_v55, %v599_v56 }
 0x4c2   :  { %3627 = vmatmul.mubr.msk.bf16.vlgmr.msra.gmra.mrb[8].mxu0 %vm215_vm3, %v480_v51 }
 0x4c3   :  { %3637 = vmatpush3.bf16.msra.mxu0 %v603_v53  ;;  %3638 = vmatprep.mubr.msk.bf16.mxu0 %vm4192_vm1, %v4191_v14 }
 0x4c4   :  { %3650 = vmatprep.subr.bf16.mxu0 %v4191_v14 }
 0x4ca   :  { %3639 = vmatmul.mubr.msk.bf16.vlgmr.msra.gmra.mrb[12].mxu0 %vm215_vm3, %v601_v57 }
 0x4cb   :  { %3651 = vmatpush3.bf16.msra.mxu0 %v4404_v58  ;;  %3654 = vmatprep.mubr.msk.bf16.mxu0 %vm4192_vm1, %v4191_v14 }
 0x4cc   :  { %3652 = vmatprep.subr.bf16.mxu0 %v4191_v14 }
 0x57d   :  { %v279_v59 = vpop.f32.mrb[0].mxu0 }
 0x57e   :  { %v3604_v60 = vpop.f32.mrb[1].mxu0 }
 0x57f   :  { %v282_v61 = vpop.f32.mrb[2].mxu0 }
 0x580   :  { %v3605_v62 = vpop.f32.mrb[3].mxu0 }
 0x581   :  { %v34_v62 = vld [vmem:[%s5171_s1] sm:$0xff] }
 0x58d   :  { %v400_v2 = vpop.f32.mrb[4].mxu0 }
 0x58e   :  { %v3616_v3 = vpop.f32.mrb[5].mxu0 }
 0x58f   :  { %v403_v4 = vpop.f32.mrb[6].mxu0 }
 0x590   :  { %v3947_v5 = vpack.i.bf16 %v403_v4, %v400_v2  ;;  %v3617_v6 = vpop.f32.mrb[7].mxu0  ;;  %v4462_v2 = vpack.c.bf16 %v35_v63, %v34_v62 }
 0x592   :  { %3948 = vrot.lane.b32.xlu0 %v3947_v5, %s4205_s14 }
 0x595   :  { %v521_v7 = vpop.f32.mrb[8].mxu0 }
 0x596   :  { %v3628_v8 = vpop.f32.mrb[9].mxu0 }
 0x597   :  { %v524_v9 = vpop.f32.mrb[10].mxu0 }
 0x598   :  { %v3952_v15 = vpack.i.bf16 %v524_v9, %v521_v7  ;;  %v3629_v10 = vpop.f32.mrb[11].mxu0 }
 0x599   :  { %v36_v10 = vld [vmem:[%s5171_s1 + $0x10] sm:$0xff] }
 0x59a   :  { %3953 = vrot.lane.b32.xlu1 %v3952_v15, %s4206_s15 }
 0x59d   :  { %v642_v11 = vpop.f32.mrb[12].mxu0 }
 0x59e   :  { %v3640_v12 = vpop.f32.mrb[13].mxu0  ;;  %683 = vrot.lane.b32.xlu1 %v4291_v16, %s4204_s13 }
 0x59f   :  { %v645_v13 = vpop.f32.mrb[14].mxu0  ;;  %v4473_v12 = vsub.s32 4, %v4296_v24 }
 0x5a0   :  { %v3957_v17 = vpack.i.bf16 %v645_v13, %v642_v11  ;;  %v3641_v18 = vpop.f32.mrb[15].mxu0  ;;  %v37_v11 = vld [vmem:[%s5171_s1 + $0x18] sm:$0xff] }
 0x5a1   :  { %v4475_v13 = vpack.c.bf16 %v37_v11, %v36_v10  ;;  %v768_v18 = vrot.slane %v4304_v26, %v4473_v12 }
 0x5a2   :  { %3958 = vrot.lane.b32.xlu0 %v3957_v17, %s4207_s16 }
 0x604   :  { %v3949_v20 = vpop.permute.xlu0 %3948 }
 0x605   :  { %v3951_v22 = vunpack.i.h.bf16 %v3949_v20  ;;  %v3950_v23 = vunpack.i.l.bf16 %v3949_v20  ;;  %v773_v20 = vsub.s32 5, %v4296_v24 }
 0x607   :  { %v674_v31 = vsel %vm167_vm2, %v282_v61, %v3951_v22  ;;  %v673_v16 = vsel %vm167_vm2, %v279_v59, %v3950_v23 }
 0x60c   :  { %v3954_v19 = vpop.permute.xlu1 %3953 }
 0x60d   :  { %v3956_v27 = vunpack.i.h.bf16 %v3954_v19  ;;  %v3955_v28 = vunpack.i.l.bf16 %v3954_v19 }
 0x60f   :  { %v676_v34 = vsel %vm215_vm3, %v674_v31, %v3956_v27  ;;  %v675_v35 = vsel %vm215_vm3, %v673_v16, %v3955_v28  ;;  %v774_v27 = vrot.slane %v4304_v26, %v773_v20 }
 0x610   :  { %v684_v21 = vpop.permute.xlu1 %683 }
 0x611   :  { %3645 = vmatpush3.bf16.msra.mxu1 %v684_v21 }
 0x614   :  { %v3959_v29 = vpop.permute.xlu0 %3958 }
 0x615   :  { %v3961_v32 = vunpack.i.h.bf16 %v3959_v29  ;;  %v3960_v33 = vunpack.i.l.bf16 %v3959_v29 }
 0x617   :  { %v679_v47 = vsel %vm677_vm4, %v676_v34, %v3961_v32  ;;  %v678_v36 = vsel %vm677_vm4, %v675_v35, %v3960_v33  ;;  %v836_v32 = vsub.s32 7, %v4296_v24 }
 0x618   :  { %v680_v37 = vpack.c.bf16 %v679_v47, %v678_v36 }
 0x619   :  { %v837_v33 = vrot.slane %v4304_v26, %v836_v32 }
 0x61a   :  { %3647 = vmatmul.mubr.msk.bf16.vlgmr.msra.gmra.mrb[20].mxu1 %vm62_vm0, %v680_v37 }
 0x61b   :  { %3662 = vmatprep.mubr.msk.bf16.mxu1 %vm62_vm0, %v4462_v2 }
 0x6ed   :  { %v724_v41 = vpop.f32.mrb[20].mxu1 }
 0x6ee   :  { %v731_v42 = vadd.f32 %v724_v41, %v4261_v0  ;;  %v3648_v43 = vpop.f32.mrb[21].mxu1  ;;  %v4444_v0 = vld [vmem:[%s5168_s4 + $0x1c] ss:$12 sps:$4 sm:$0xff]  }
 0x6ef   :  { %v727_v44 = vpop.f32.mrb[22].mxu1  ;;  %3653 = vmatpush3.bf16.msra.mxu0 %v4444_v0 }
 0x6f0   :  { %v4432_v45 = vadd.f32 %v736_v40, %v731_v42  ;;  %v732_v46 = vadd.f32 %v727_v44, %v4266_v1  ;;  %v3649_v48 = vpop.f32.mrb[23].mxu1  ;;  %3666 = vmatprep.subr.bf16.mxu0 %v4191_v14 }
 0x6f2   :  { %v4435_v49 = vadd.f32 %v736_v40, %v732_v46  ;;  %v739_v50 = vsel %vm62_vm0, %v4432_v45, 0.0  ;;  %v780_v46 = vsub.s32 6, %v4296_v24 }
 0x6f3   :  { %740 = vadd.xlane.f32.xlu0 %v739_v50 }
 0x6f4   :  { %v742_v51 = vsel %vm62_vm0, %v4435_v49, 0.0  ;;  %v781_v50 = vrot.slane %v4304_v26, %v780_v46  ;;  %v4518_v26 = vld [vmem:[%s5172_s3] sm:$0xff] }
 0x6f5   :  { %743 = vadd.xlane.f32.xlu1 %v742_v51 }
 0x706   :  { %840 = vrot.lane.b32.xlu1 %v4444_v0, %s4193_s18 }
 0x780   :  { %v741_v1 = vpop.xlane.xlu0 %740 }
 0x781   :  { %v745_v52 = vmul.f32 0.03125, %v741_v1 }
 0x782   :  { %v744_v53 = vpop.xlane.xlu1 %743 }
 0x783   :  { %v747_v54 = vsub.f32 %v4432_v45, %v745_v52  ;;  %v746_v55 = vmul.f32 0.03125, %v744_v53 }
 0x785   :  { %v748_v56 = vsub.f32 %v4435_v49, %v746_v55  ;;  %v749_v57 = vmul.f32 %v747_v54, %v747_v54 }
 0x786   :  { %v841_v15 = vpop.permute.xlu1 %840 }
 0x787   :  { %v751_v59 = vsel %vm62_vm0, %v749_v57, 0.0  ;;  %v750_v60 = vmul.f32 %v748_v56, %v748_v56 }
 0x788   :  { %752 = vadd.xlane.f32.xlu0 %v751_v59 }
 0x789   :  { %v754_v61 = vsel %vm62_vm0, %v750_v60, 0.0  ;;  %v4523_v60 = vld [vmem:[%s5172_s3 + $0x8] sm:$0xff] }
 0x78c   :  { %755 = vadd.xlane.f32.xlu0 %v754_v61 }
 0x7a2   :  { %838 = vrot.lane.b32.xlu0 %v4404_v58, %s4193_s18 }
 0x815   :  { %v753_v3 = vpop.xlane.xlu0 %752 }
 0x816   :  { %v757_v4 = vmul.f32 0.03125, %v753_v3 }
 0x818   :  { %v759_v5 = vadd.f32 1e-05, %v757_v4 }
 0x819   :  { %v756_v6 = vpop.xlane.xlu0 %755 }
 0x81a   :  { %4067 = vrsqrt.f32 %v759_v5  ;;  %v758_v7 = vmul.f32 0.03125, %v756_v6 }
 0x81c   :  { %v760_v8 = vadd.f32 1e-05, %v758_v7 }
 0x81d   :  { %v839_v9 = vpop.permute.xlu0 %838 }
 0x81e   :  { %4069 = vrsqrt.f32 %v760_v8  ;;  %3658 = vmatprep.subr.bf16.mxu1 %v839_v9 }
 0x81f   :  { %3659 = vmatpush3.bf16.msra.mxu1 %v839_v9 }
 0x820   :  { %3660 = vmatprep.subr.bf16.mxu1 %v841_v15 }
 0x823   :  { %3661 = vmatpush3.bf16.msra.mxu1 %v841_v15 }
 0x824   :  { %v4068_v17 = vpop.eup %4067  ;;  %3674 = vmatprep.subr.bf16.mxu1 %v4191_v14 }
 0x825   :  { %v763_v19 = vmul.f32 %v4068_v17, %v747_v54 }
 0x826   :  { %3663 = vmatmul.mubr.msk.bf16.vlgmr.msra.gmra.mrb[24].mxu1 %vm62_vm0, %v4475_v13 }
 0x827   :  { %3678 = vmatprep.mubr.msk.bf16.mxu1 %vm4192_vm1, %v4191_v14  ;;  %v769_v22 = vmul.f32 %v768_v18, %v763_v19 }
 0x828   :  { %v4070_v21 = vpop.eup %4069 }
 0x829   :  { %v764_v23 = vmul.f32 %v4070_v21, %v748_v56  ;;  %v775_v29 = vadd.f32 %v774_v27, %v769_v22 }
 0x82b   :  { %v770_v28 = vmul.f32 %v768_v18, %v764_v23 }
 0x82d   :  { %v776_v31 = vadd.f32 %v774_v27, %v770_v28 }
 0x82f   :  { %v777_v16 = vpack.c.bf16 %v776_v31, %v775_v29 }
 0x831   :  { %3655 = vmatmul.mubr.msk.bf16.vlgmr.msra.gmra.mrb[16].mxu0 %vm62_vm0, %v777_v16 }
 0x832   :  { %3670 = vmatprep.mubr.msk.bf16.mxu0 %vm4192_vm1, %v4191_v14 }
 0x8f9   :  { %v3664_v34 = vpop.f32.mrb[24].mxu1 }
 0x8fa   :  { %v884_v35 = vpop.f32.mrb[25].mxu1  ;;  %v893_v36 = vadd.f32 %v3664_v34, %v837_v33 }
 0x8fb   :  { %v3665_v47 = vpop.f32.mrb[26].mxu1  ;;  %v885_v41 = vadd.f32 %v884_v35, %v837_v33 }
 0x8fc   :  { %v896_v37 = vadd.f32 %v3665_v47, %v837_v33  ;;  %v887_v40 = vpop.f32.mrb[27].mxu1 }
 0x8fd   :  { %v888_v42 = vadd.f32 %v887_v40, %v837_v33 }
 0x8fe   :  { %v4495_v43 = vpack.c.bf16 %v896_v37, %v893_v36 }
 0x8ff   :  { %v4497_v44 = vpack.c.bf16 %v888_v42, %v885_v41 }
 0x900   :  { %v909_v57 = vsel %vm167_vm2, %v4495_v43, 0 }
 0x901   :  { %v906_v48 = vsel %vm167_vm2, %v4497_v44, 0 }
 0x902   :  { %3667 = vmatpush3.bf16.xpose.msra.mxu0 %v906_v48 }
 0x903   :  { %3668 = vmatprep.subr.bf16.mxu0 %v4191_v14 }
 0x904   :  { %v827_v51 = vpop.f32.mrb[16].mxu0 }
 0x905   :  { %v3656_v1 = vpop.f32.mrb[17].mxu0  ;;  %v828_v53 = vadd.f32 %v827_v51, %v781_v50 }
 0x906   :  { %v830_v52 = vpop.f32.mrb[18].mxu0 }
 0x907   :  { %v831_v54 = vadd.f32 %v830_v52, %v781_v50  ;;  %v3657_v55 = vpop.f32.mrb[19].mxu0 }
 0x909   :  { %v4506_v56 = vpack.c.bf16 %v831_v54, %v828_v53 }
 0x90a   :  { %3669 = vmatpush3.bf16.xpose.msra.mxu0 %v909_v57 }
 0x90b   :  { %3690 = vmatprep.subr.bf16.mxu0 %v4191_v14 }
 0x911   :  { %3671 = vmatmul.mubr.msk.bf16.vlgmr.msra.gmra.mrb[20].mxu0 %vm167_vm2, %v4506_v56 }
 0x912   :  { %3694 = vmatprep.mubr.msk.bf16.mxu0 %vm4192_vm1, %v4191_v14 }
 0x9e4   :  { %v945_v59 = vpop.f32.mrb[20].mxu0 }
 0x9e5   :  { %v946_v61 = vadd.f32 %v945_v59, %v4518_v26  ;;  %v3672_v62 = vpop.f32.mrb[21].mxu0 }
 0x9e6   :  { %v948_v63 = vpop.f32.mrb[22].mxu0 }
 0x9e7   :  { %v949_v3 = vadd.f32 %v948_v63, %v4523_v60  ;;  %v3673_v4 = vpop.f32.mrb[23].mxu0  ;;  %v952_v5 = vsel %vm62_vm0, %v946_v61, -inf }
 0x9e8   :  { %953 = vmax.xlane.f32.xlu1 %v952_v5 }
 0x9e9   :  { %v955_v6 = vsel %vm62_vm0, %v949_v3, -inf }
 0x9ea   :  { %956 = vmax.xlane.f32.xlu0 %v955_v6 }
 0x9f9   :  { %979 = vrot.lane.b32.xlu1 %v4495_v43, %s4194_s19 }
 0x9fd   :  { %1030 = vrot.lane.b32.xlu1 %v4497_v44, %s4200_s29 }
 0xa75   :  { %v954_v7 = vpop.xlane.xlu1 %953 }
 0xa76   :  { %v958_v8 = vsub.f32 %v946_v61, %v954_v7 }
 0xa77   :  { %v957_v9 = vpop.xlane.xlu0 %956 }
 0xa78   :  { %v960_v15 = vmul.f32 1.442695, %v958_v8  ;;  %v959_v10 = vsub.f32 %v949_v3, %v957_v9 }
 0xa79   :  { %v980_v22 = vpop.permute.xlu1 %979 }
 0xa7a   :  { %4071 = vpow2.f32 %v960_v15  ;;  %v962_v11 = vmul.f32 1.442695, %v959_v10 }
 0xa7c   :  { %4073 = vpow2.f32 %v962_v11 }
 0xa7d   :  { %v1031_v23 = vpop.permute.xlu1 %1030 }
 0xa7e   :  { %v1038_v47 = vsel %vm167_vm2, %v1031_v23, 0 }
 0xa84   :  { %v4072_v17 = vpop.eup %4071 }
 0xa85   :  { %v964_v18 = vsel %vm62_vm0, %v4072_v17, 0.0 }
 0xa86   :  { %v4074_v19 = vpop.eup %4073  ;;  %965 = vadd.xlane.f32.xlu0 %v964_v18 }
 0xa87   :  { %v967_v21 = vsel %vm62_vm0, %v4074_v19, 0.0 }
 0xa88   :  { %968 = vadd.xlane.f32.xlu1 %v967_v21 }
 0xa99   :  { %1032 = vrot.lane.b32.xlu1 %v4495_v43, %s4200_s29 }
 0xa9c   :  { %977 = vrot.lane.b32.xlu0 %v4497_v44, %s4194_s19 }
 0xaa0   :  { %1028 = vrot.lane.b32.xlu0 %v4506_v56, %s4194_s19 }
 0xb13   :  { %v966_v27 = vpop.xlane.xlu0 %965 }
 0xb14   :  { %4075 = vrcp.f32 %v966_v27 }
 0xb15   :  { %v969_v28 = vpop.xlane.xlu1 %968 }
 0xb16   :  { %4077 = vrcp.f32 %v969_v28 }
 0xb17   :  { %v978_v29 = vpop.permute.xlu0 %977 }
 0xb18   :  { %3675 = vmatpush3.bf16.msra.mxu1 %v978_v29 }
 0xb19   :  { %3676 = vmatprep.subr.bf16.mxu1 %v4191_v14  ;;  %v1033_v36 = vpop.permute.xlu1 %1032 }
 0xb1a   :  { %v1041_v37 = vsel %vm167_vm2, %v1033_v36, 0 }
 0xb1b   :  { %v1029_v40 = vpop.permute.xlu0 %1028 }
 0xb1c   :  { %3677 = vmatpush3.bf16.msra.mxu1 %v980_v22 }
 0xb1d   :  { %3682 = vmatprep.subr.bf16.mxu1 %v4191_v14 }
 0xb1e   :  { %v4076_v31 = vpop.eup %4075 }
 0xb1f   :  { %v972_v33 = vmul.f32 %v4076_v31, %v4072_v17 }
 0xb20   :  { %v4078_v16 = vpop.eup %4077 }
 0xb21   :  { %v973_v34 = vmul.f32 %v4078_v16, %v4074_v19 }
 0xb23   :  { %v974_v35 = vpack.c.bf16 %v973_v34, %v972_v33 }
 0xb25   :  { %3679 = vmatmul.mubr.msk.bf16.vlgmr.msra.gmra.mrb[28].mxu1 %vm62_vm0, %v974_v35 }
 0xb26   :  { %3683 = vmatpush3.bf16.xpose.msra.mxu1 %v1038_v47  ;;  %3686 = vmatprep.mubr.msk.bf16.mxu1 %vm4192_vm1, %v4191_v14 }
 0xb27   :  { %3684 = vmatprep.subr.bf16.mxu1 %v4191_v14 }
 0xb2e   :  { %3685 = vmatpush3.bf16.xpose.msra.mxu1 %v1041_v37 }
 0xb2f   :  { %3706 = vmatprep.subr.bf16.mxu1 %v4191_v14 }
 0xb35   :  { %3687 = vmatmul.mubr.msk.bf16.vlgmr.msra.gmra.mrb[32].mxu1 %vm167_vm2, %v1029_v40 }
 0xb36   :  { %3710 = vmatprep.mubr.msk.bf16.mxu1 %vm4192_vm1, %v4191_v14 }
 0xbf8   :  { %v4553_v41 = vpop.f32.mrb[28].mxu1 }
 0xbf9   :  { %v3680_v42 = vpop.f32.mrb[29].mxu1 }
 0xbfa   :  { %v4555_v48 = vpop.f32.mrb[30].mxu1 }
 0xbfb   :  { %v3681_v50 = vpop.f32.mrb[31].mxu1 }
 0xc08   :  { %v1077_v51 = vpop.f32.mrb[32].mxu1 }
 0xc09   :  { %v1078_v1 = vadd.f32 %v1077_v51, %v4518_v26  ;;  %v3688_v52 = vpop.f32.mrb[33].mxu1 }
 0xc0a   :  { %v1080_v53 = vpop.f32.mrb[34].mxu1 }
 0xc0b   :  { %v1081_v54 = vadd.f32 %v1080_v53, %v4523_v60  ;;  %v3689_v55 = vpop.f32.mrb[35].mxu1  ;;  %v1084_v57 = vsel %vm62_vm0, %v1078_v1, -inf }
 0xc0c   :  { %1085 = vmax.xlane.f32.xlu1 %v1084_v57 }
 0xc0d   :  { %v1087_v59 = vsel %vm62_vm0, %v1081_v54, -inf }
 0xc0e   :  { %1088 = vmax.xlane.f32.xlu0 %v1087_v59 }
 0xc1d   :  { %1107 = vrot.lane.b32.xlu1 %v4497_v44, %s4195_s20 }
 0xc21   :  { %1159 = vrot.lane.b32.xlu1 %v4497_v44, %s4193_s18 }
 0xc25   :  { %1161 = vrot.lane.b32.xlu1 %v4495_v43, %s4193_s18 }
 0xc29   :  { %1157 = vrot.lane.b32.xlu1 %v4506_v56, %s4200_s29 }
 0xc99   :  { %v1086_v61 = vpop.xlane.xlu1 %1085 }
 0xc9a   :  { %v1090_v62 = vsub.f32 %v1078_v1, %v1086_v61 }
 0xc9b   :  { %v1089_v63 = vpop.xlane.xlu0 %1088 }
 0xc9c   :  { %v1092_v3 = vmul.f32 1.442695, %v1090_v62  ;;  %v1091_v4 = vsub.f32 %v1081_v54, %v1089_v63 }
 0xc9d   :  { %v1108_v5 = vpop.permute.xlu1 %1107 }
 0xc9e   :  { %4079 = vpow2.f32 %v1092_v3  ;;  %v1094_v6 = vmul.f32 1.442695, %v1091_v4  ;;  %3691 = vmatpush3.bf16.msra.mxu0 %v1108_v5 }
 0xc9f   :  { %3692 = vmatprep.subr.bf16.mxu0 %v4191_v14 }
 0xca0   :  { %4081 = vpow2.f32 %v1094_v6 }
 0xca1   :  { %v1160_v23 = vpop.permute.xlu1 %1159 }
 0xca2   :  { %v1167_v28 = vsel %vm167_vm2, %v1160_v23, 0 }
 0xca5   :  { %v1162_v29 = vpop.permute.xlu1 %1161 }
 0xca6   :  { %v1170_v31 = vsel %vm167_vm2, %v1162_v29, 0 }
 0xca8   :  { %v4080_v7 = vpop.eup %4079 }
 0xca9   :  { %v1096_v8 = vsel %vm62_vm0, %v4080_v7, 0.0  ;;  %v1158_v16 = vpop.permute.xlu1 %1157 }
 0xcaa   :  { %v4082_v9 = vpop.eup %4081  ;;  %1097 = vadd.xlane.f32.xlu0 %v1096_v8 }
 0xcab   :  { %v1099_v15 = vsel %vm62_vm0, %v4082_v9, 0.0 }
 0xcae   :  { %1100 = vadd.xlane.f32.xlu0 %v1099_v15 }
 0xcc4   :  { %1109 = vrot.lane.b32.xlu0 %v4495_v43, %s4195_s20 }
 0xd37   :  { %v1098_v10 = vpop.xlane.xlu0 %1097 }
 0xd38   :  { %4083 = vrcp.f32 %v1098_v10 }
 0xd3b   :  { %v1101_v11 = vpop.xlane.xlu0 %1100 }
 0xd3c   :  { %4085 = vrcp.f32 %v1101_v11 }
 0xd3f   :  { %v1110_v17 = vpop.permute.xlu0 %1109 }
 0xd40   :  { %3693 = vmatpush3.bf16.msra.mxu0 %v1110_v17 }
 0xd41   :  { %3698 = vmatprep.subr.bf16.mxu0 %v4191_v14 }
 0xd42   :  { %v4084_v18 = vpop.eup %4083 }
 0xd43   :  { %v1104_v21 = vmul.f32 %v4084_v18, %v4080_v7 }
 0xd46   :  { %v4086_v19 = vpop.eup %4085 }
 0xd47   :  { %v1105_v22 = vmul.f32 %v4086_v19, %v4082_v9 }
 0xd49   :  { %v1106_v27 = vpack.c.bf16 %v1105_v22, %v1104_v21 }
 0xd4b   :  { %3695 = vmatmul.mubr.msk.bf16.vlgmr.msra.gmra.mrb[24].mxu0 %vm62_vm0, %v1106_v27 }
 0xd4c   :  { %3699 = vmatpush3.bf16.xpose.msra.mxu0 %v1167_v28  ;;  %3702 = vmatprep.mubr.msk.bf16.mxu0 %vm4192_vm1, %v4191_v14 }
 0xd4d   :  { %3700 = vmatprep.subr.bf16.mxu0 %v4191_v14 }
 0xd54   :  { %3701 = vmatpush3.bf16.xpose.msra.mxu0 %v1170_v31 }
 0xd55   :  { %3722 = vmatprep.subr.bf16.mxu0 %v4191_v14 }
 0xd5b   :  { %3703 = vmatmul.mubr.msk.bf16.vlgmr.msra.gmra.mrb[28].mxu0 %vm167_vm2, %v1158_v16 }
 0xd5c   :  { %3726 = vmatprep.mubr.msk.bf16.mxu0 %vm4192_vm1, %v4191_v14 }
 0xe1e   :  { %v4585_v33 = vpop.f32.mrb[24].mxu0 }
 0xe1f   :  { %v3696_v34 = vpop.f32.mrb[25].mxu0 }
 0xe20   :  { %v4587_v35 = vpop.f32.mrb[26].mxu0 }
 0xe21   :  { %v3962_v47 = vpack.i.bf16 %v4587_v35, %v4585_v33  ;;  %v3697_v36 = vpop.f32.mrb[27].mxu0 }
 0xe2e   :  { %v1206_v37 = vpop.f32.mrb[28].mxu0 }
 0xe2f   :  { %v1207_v40 = vadd.f32 %v1206_v37, %v4518_v26  ;;  %v3704_v42 = vpop.f32.mrb[29].mxu0 }
 0xe30   :  { %v1209_v50 = vpop.f32.mrb[30].mxu0 }
 0xe31   :  { %v1210_v51 = vadd.f32 %v1209_v50, %v4523_v60  ;;  %v3705_v1 = vpop.f32.mrb[31].mxu0  ;;  %v1213_v52 = vsel %vm62_vm0, %v1207_v40, -inf }
 0xe32   :  { %1214 = vmax.xlane.f32.xlu0 %v1213_v52 }
 0xe33   :  { %v1216_v53 = vsel %vm62_vm0, %v1210_v51, -inf }
 0xe34   :  { %1217 = vmax.xlane.f32.xlu1 %v1216_v53 }
 0xe45   :  { %1238 = vrot.lane.b32.xlu1 %v4495_v43, %s4203_s11 }
 0xe49   :  { %1288 = vrot.lane.b32.xlu1 %v4497_v44, %s4196_s21 }
 0xe4d   :  { %1290 = vrot.lane.b32.xlu1 %v4495_v43, %s4196_s21 }
 0xebf   :  { %v1215_v54 = vpop.xlane.xlu0 %1214 }
 0xec0   :  { %v1219_v55 = vsub.f32 %v1207_v40, %v1215_v54 }
 0xec1   :  { %v1218_v57 = vpop.xlane.xlu1 %1217 }
 0xec2   :  { %v1221_v59 = vmul.f32 1.442695, %v1219_v55  ;;  %v1220_v61 = vsub.f32 %v1210_v51, %v1218_v57 }
 0xec4   :  { %4087 = vpow2.f32 %v1221_v59  ;;  %v1223_v62 = vmul.f32 1.442695, %v1220_v61 }
 0xec5   :  { %v1239_v9 = vpop.permute.xlu1 %1238 }
 0xec6   :  { %4089 = vpow2.f32 %v1223_v62 }
 0xec9   :  { %v1289_v18 = vpop.permute.xlu1 %1288 }
 0xecd   :  { %v1291_v21 = vpop.permute.xlu1 %1290 }
 0xece   :  { %v4088_v63 = vpop.eup %4087  ;;  %v1299_v22 = vsel %vm167_vm2, %v1291_v21, 0 }
 0xecf   :  { %v1225_v3 = vsel %vm62_vm0, %v4088_v63, 0.0 }
 0xed0   :  { %v4090_v4 = vpop.eup %4089  ;;  %1226 = vadd.xlane.f32.xlu0 %v1225_v3 }
 0xed1   :  { %v1228_v5 = vsel %vm62_vm0, %v4090_v4, 0.0 }
 0xed4   :  { %1229 = vadd.xlane.f32.xlu0 %v1228_v5 }
 0xeea   :  { %1236 = vrot.lane.b32.xlu0 %v4497_v44, %s4203_s11 }
 0xeee   :  { %1286 = vrot.lane.b32.xlu0 %v4506_v56, %s4195_s20  ;;  %v1296_v56 = vsel %vm167_vm2, %v1289_v18, 0 }
 0xf5d   :  { %v1227_v6 = vpop.xlane.xlu0 %1226 }
 0xf5e   :  { %4091 = vrcp.f32 %v1227_v6 }
 0xf61   :  { %v1230_v7 = vpop.xlane.xlu0 %1229 }
 0xf62   :  { %4093 = vrcp.f32 %v1230_v7 }
 0xf65   :  { %v1237_v8 = vpop.permute.xlu0 %1236 }
 0xf66   :  { %3707 = vmatpush3.bf16.msra.mxu1 %v1237_v8 }
 0xf67   :  { %3708 = vmatprep.subr.bf16.mxu1 %v4191_v14 }
 0xf68   :  { %v4092_v15 = vpop.eup %4091 }
 0xf69   :  { %v1233_v11 = vmul.f32 %v4092_v15, %v4088_v63  ;;  %v1287_v23 = vpop.permute.xlu0 %1286 }
 0xf6a   :  { %3709 = vmatpush3.bf16.msra.mxu1 %v1239_v9 }
 0xf6b   :  { %3714 = vmatprep.subr.bf16.mxu1 %v4191_v14 }
 0xf6c   :  { %v4094_v10 = vpop.eup %4093 }
 0xf6d   :  { %v1234_v17 = vmul.f32 %v4094_v10, %v4090_v4 }
 0xf6f   :  { %v1235_v19 = vpack.c.bf16 %v1234_v17, %v1233_v11 }
 0xf71   :  { %3711 = vmatmul.mubr.msk.bf16.vlgmr.msra.gmra.mrb[36].mxu1 %vm62_vm0, %v1235_v19 }
 0xf72   :  { %3718 = vmatprep.mubr.msk.bf16.mxu1 %vm4192_vm1, %v4191_v14 }
 0xf73   :  { %3715 = vmatpush3.bf16.xpose.msra.mxu1 %v1296_v56 }
 0xf74   :  { %3716 = vmatprep.subr.bf16.mxu1 %v4191_v14 }
 0xf7b   :  { %3717 = vmatpush3.bf16.xpose.msra.mxu1 %v1299_v22 }
 0xf7c   :  { %3738 = vmatprep.subr.bf16.mxu1 %v4191_v14 }
 0xf82   :  { %3719 = vmatmul.mubr.msk.bf16.vlgmr.msra.gmra.mrb[40].mxu1 %vm167_vm2, %v1287_v23 }
 0xf83   :  { %3742 = vmatprep.mubr.msk.bf16.mxu1 %vm4192_vm1, %v4191_v14 }
0x1044   :  { %v1279_v27 = vpop.f32.mrb[36].mxu1 }
0x1045   :  { %v3712_v28 = vpop.f32.mrb[37].mxu1 }
0x1046   :  { %v1282_v29 = vpop.f32.mrb[38].mxu1 }
0x1047   :  { %v3967_v31 = vpack.i.bf16 %v1282_v29, %v1279_v27  ;;  %v3713_v16 = vpop.f32.mrb[39].mxu1 }
0x1055   :  { %v1335_v34 = vpop.f32.mrb[40].mxu1 }
0x1056   :  { %v1336_v36 = vadd.f32 %v1335_v34, %v4518_v26  ;;  %v3720_v37 = vpop.f32.mrb[41].mxu1  ;;  %v4660_v34 = vld [vmem:[%s5169_s6 + $0x8] sm:$0x1f] }
0x1057   :  { %v1338_v40 = vpop.f32.mrb[42].mxu1 }
0x1058   :  { %v1339_v42 = vadd.f32 %v1338_v40, %v4523_v60  ;;  %v3721_v50 = vpop.f32.mrb[43].mxu1  ;;  %v1342_v51 = vsel %vm62_vm0, %v1336_v36, -inf }
0x1059   :  { %1343 = vmax.xlane.f32.xlu1 %v1342_v51 }
0x105a   :  { %v1345_v1 = vsel %vm62_vm0, %v1339_v42, -inf }
0x105b   :  { %1346 = vmax.xlane.f32.xlu0 %v1345_v1 }
0x106a   :  { %1365 = vrot.lane.b32.xlu1 %v4497_v44, %s4197_s22 }
0x106e   :  { %1446 = vrot.lane.b32.xlu1 %v4404_v58, %s4204_s13 }
0x1072   :  { %3963 = vrot.lane.b32.xlu1 %v3962_v47, %s4205_s14 }
0x1076   :  { %3968 = vrot.lane.b32.xlu1 %v3967_v31, %s4206_s15 }
0x107a   :  { %1448 = vrot.lane.b32.xlu1 %v4444_v0, %s4204_s13 }
0x10e6   :  { %v1344_v26 = vpop.xlane.xlu1 %1343 }
0x10e7   :  { %v1348_v60 = vsub.f32 %v1336_v36, %v1344_v26  ;;  %v1501_v36 = vrot.slane %v4660_v34, %v4299_v25 }
0x10e8   :  { %v1347_v52 = vpop.xlane.xlu0 %1346 }
0x10e9   :  { %v1350_v53 = vmul.f32 1.442695, %v1348_v60  ;;  %v1349_v54 = vsub.f32 %v1339_v42, %v1347_v52 }
0x10ea   :  { %v1366_v55 = vpop.permute.xlu1 %1365 }
0x10eb   :  { %4095 = vpow2.f32 %v1350_v53  ;;  %v1352_v44 = vmul.f32 1.442695, %v1349_v54  ;;  %3723 = vmatpush3.bf16.msra.mxu0 %v1366_v55 }
0x10ec   :  { %3724 = vmatprep.subr.bf16.mxu0 %v4191_v14 }
0x10ed   :  { %4097 = vpow2.f32 %v1352_v44 }
0x10ee   :  { %v1447_v58 = vpop.permute.xlu1 %1446 }
0x10f2   :  { %v3964_v33 = vpop.permute.xlu1 %3963 }
0x10f3   :  { %v3966_v35 = vunpack.i.h.bf16 %v3964_v33  ;;  %v3965_v47 = vunpack.i.l.bf16 %v3964_v33 }
0x10f5   :  { %v4096_v57 = vpop.eup %4095  ;;  %v1440_v0 = vsel %vm167_vm2, %v4555_v48, %v3966_v35  ;;  %v1439_v59 = vsel %vm167_vm2, %v4553_v41, %v3965_v47 }
0x10f6   :  { %v1354_v61 = vsel %vm62_vm0, %v4096_v57, 0.0 }
0x10f7   :  { %v4098_v62 = vpop.eup %4097  ;;  %1355 = vadd.xlane.f32.xlu0 %v1354_v61  ;;  %v4015_v61 = vld [vmem:[%s5173_s5] sm:$0xff]  }
0x10f8   :  { %v1357_v63 = vsel %vm62_vm0, %v4098_v62, 0.0 }
0x10fb   :  { %1358 = vadd.xlane.f32.xlu0 %v1357_v63 }
0x1111   :  { %1367 = vrot.lane.b32.xlu0 %v4495_v43, %s4197_s22  ;;  %v3969_v43 = vpop.permute.xlu1 %3968 }
0x1112   :  { %v3971_v19 = vunpack.i.h.bf16 %v3969_v43  ;;  %v3970_v56 = vunpack.i.l.bf16 %v3969_v43 }
0x1114   :  { %v1441_v27 = vsel %vm215_vm3, %v1439_v59, %v3970_v56  ;;  %v1442_v28 = vsel %vm215_vm3, %v1440_v0, %v3971_v19  ;;  %v4013_v0 = vld [vmem:[%s5168_s4 + $0x8] ss:$12 sps:$4 sm:$0xff]   ;;  %v4014_v59 = vld [vmem:[%s5168_s4 + $0x20] ss:$12 sps:$4 sm:$0xff]  }
0x1115   :  { %v1449_v9 = vpop.permute.xlu1 %1448  ;;  %3739 = vmatpush3.bf16.msra.mxu1 %v4013_v0  ;;  %v4017_v56 = vld [vmem:[%s5173_s5 + $0x10] sm:$0xff]  }
0x1116   :  { %3740 = vmatprep.subr.bf16.mxu1 %v4191_v14 }
0x1119   :  { %3741 = vmatpush3.bf16.msra.mxu1 %v4014_v59 }
0x111a   :  { %3758 = vmatprep.subr.bf16.mxu1 %v4191_v14 }
0x1184   :  { %v1356_v3 = vpop.xlane.xlu0 %1355 }
0x1185   :  { %4099 = vrcp.f32 %v1356_v3 }
0x1188   :  { %v1359_v4 = vpop.xlane.xlu0 %1358 }
0x1189   :  { %4101 = vrcp.f32 %v1359_v4 }
0x118c   :  { %v1368_v5 = vpop.permute.xlu0 %1367 }
0x118d   :  { %3725 = vmatpush3.bf16.msra.mxu0 %v1368_v5 }
0x118e   :  { %3730 = vmatprep.subr.bf16.mxu0 %v4191_v14 }
0x118f   :  { %v4100_v48 = vpop.eup %4099 }
0x1190   :  { %v1362_v6 = vmul.f32 %v4100_v48, %v4096_v57 }
0x1193   :  { %v4102_v41 = vpop.eup %4101 }
0x1194   :  { %v1363_v7 = vmul.f32 %v4102_v41, %v4098_v62  ;;  %v4016_v62 = vld [vmem:[%s5173_s5 + $0x8] sm:$0xff]  }
0x1196   :  { %v1364_v8 = vpack.c.bf16 %v1363_v7, %v1362_v6  ;;  %v1533_v7 = vrot.slane %v4660_v34, %v4309_v30 }
0x1198   :  { %3727 = vmatmul.mubr.msk.bf16.vlgmr.msra.gmra.mrb[32].mxu0 %vm62_vm0, %v1364_v8 }
0x1199   :  { %3731 = vmatpush3.bf16.msra.mxu0 %v1447_v58  ;;  %3734 = vmatprep.mubr.msk.bf16.mxu0 %vm4192_vm1, %v4191_v14 }
0x119a   :  { %3732 = vmatprep.subr.bf16.mxu0 %v4191_v14 }
0x119d   :  { %3733 = vmatpush3.bf16.msra.mxu0 %v1449_v9 }
0x119e   :  { %3746 = vmatprep.subr.bf16.mxu0 %v4191_v14 }
0x126b   :  { %v1408_v15 = vpop.f32.mrb[32].mxu0 }
0x126c   :  { %v3728_v10 = vpop.f32.mrb[33].mxu0 }
0x126d   :  { %v1411_v11 = vpop.f32.mrb[34].mxu0  ;;  %v1539_v10 = vrot.slane %v4660_v34, %v4317_v39 }
0x126e   :  { %v3972_v17 = vpack.i.bf16 %v1411_v11, %v1408_v15  ;;  %v3729_v18 = vpop.f32.mrb[35].mxu0 }
0x1270   :  { %3973 = vrot.lane.b32.xlu0 %v3972_v17, %s4207_s16 }
0x12e2   :  { %v3974_v21 = vpop.permute.xlu0 %3973 }
0x12e3   :  { %v3976_v22 = vunpack.i.h.bf16 %v3974_v21  ;;  %v3975_v23 = vunpack.i.l.bf16 %v3974_v21  ;;  %v4018_v21 = vld [vmem:[%s5173_s5 + $0x18] sm:$0xff]  }
0x12e5   :  { %v1444_v29 = vsel %vm677_vm4, %v1442_v28, %v3976_v22  ;;  %v1443_v31 = vsel %vm677_vm4, %v1441_v27, %v3975_v23  ;;  %v1546_v22 = vrot.slane %v4660_v34, %v4427_v38 }
0x12e6   :  { %v1445_v16 = vpack.c.bf16 %v1444_v29, %v1443_v31 }
0x12e8   :  { %3735 = vmatmul.mubr.msk.bf16.vlgmr.msra.gmra.mrb[36].mxu0 %vm62_vm0, %v1445_v16 }
0x12e9   :  { %3754 = vmatprep.mubr.msk.bf16.mxu0 %vm4192_vm1, %v4191_v14  ;;  %3747 = vmatpush3.bf16.msra.mxu0 %v4015_v61  ;;  %v4733_v61 = vld [vmem:[%s5168_s4 + $0x30] ss:$12 sps:$4 sm:$0xff]  }
0x12ea   :  { %3748 = vmatprep.subr.bf16.mxu0 %v4191_v14 }
0x12ed   :  { %3749 = vmatpush3.bf16.msra.mxu0 %v4016_v62  ;;  %v4740_v62 = vld [vmem:[%s5168_s4 + $0x48] ss:$12 sps:$4 sm:$0xff]  }
0x12ee   :  { %3750 = vmatprep.subr.bf16.mxu0 %v4191_v14 }
0x12f1   :  { %3751 = vmatpush3.bf16.msra.mxu0 %v4017_v56 }
0x12f2   :  { %3752 = vmatprep.subr.bf16.mxu0 %v4191_v14 }
0x12f5   :  { %3753 = vmatpush3.bf16.msra.mxu0 %v4018_v21 }
0x12f6   :  { %3772 = vmatprep.subr.bf16.mxu0 %v4191_v14 }
0x13bb   :  { %v1489_v37 = vpop.f32.mrb[36].mxu0 }
0x13bc   :  { %v1496_v40 = vadd.f32 %v1489_v37, %v4432_v45  ;;  %v3736_v42 = vpop.f32.mrb[37].mxu0 }
0x13bd   :  { %v1492_v50 = vpop.f32.mrb[38].mxu0  ;;  %v1680_v42 = vrot.slane %v4660_v34, %v4473_v12 }
0x13be   :  { %v4665_v51 = vadd.f32 %v1501_v36, %v1496_v40  ;;  %v1497_v1 = vadd.f32 %v1492_v50, %v4435_v49  ;;  %v3737_v26 = vpop.f32.mrb[39].mxu0 }
0x13c0   :  { %v4668_v60 = vadd.f32 %v1501_v36, %v1497_v1  ;;  %v1504_v52 = vsel %vm62_vm0, %v4665_v51, 0.0 }
0x13c1   :  { %1505 = vadd.xlane.f32.xlu0 %v1504_v52 }
0x13c2   :  { %v1507_v53 = vsel %vm62_vm0, %v4668_v60, 0.0 }
0x13c3   :  { %1508 = vadd.xlane.f32.xlu1 %v1507_v53 }
0x144e   :  { %v1506_v54 = vpop.xlane.xlu0 %1505 }
0x144f   :  { %v1510_v55 = vmul.f32 0.03125, %v1506_v54 }
0x1450   :  { %v1509_v45 = vpop.xlane.xlu1 %1508 }
0x1451   :  { %v1512_v44 = vsub.f32 %v4665_v51, %v1510_v55  ;;  %v1511_v58 = vmul.f32 0.03125, %v1509_v45 }
0x1453   :  { %v1513_v33 = vsub.f32 %v4668_v60, %v1511_v58  ;;  %v1514_v49 = vmul.f32 %v1512_v44, %v1512_v44 }
0x1455   :  { %v1516_v35 = vsel %vm62_vm0, %v1514_v49, 0.0  ;;  %v1515_v47 = vmul.f32 %v1513_v33, %v1513_v33 }
0x1456   :  { %1517 = vadd.xlane.f32.xlu0 %v1516_v35 }
0x1457   :  { %v1519_v57 = vsel %vm62_vm0, %v1515_v47, 0.0 }
0x145a   :  { %1520 = vadd.xlane.f32.xlu0 %v1519_v57 }
0x14e3   :  { %v1518_v63 = vpop.xlane.xlu0 %1517 }
0x14e4   :  { %v1522_v3 = vmul.f32 0.03125, %v1518_v63 }
0x14e6   :  { %v1524_v4 = vadd.f32 1e-05, %v1522_v3 }
0x14e7   :  { %v1521_v5 = vpop.xlane.xlu0 %1520 }
0x14e8   :  { %4103 = vrsqrt.f32 %v1524_v4  ;;  %v1523_v48 = vmul.f32 0.03125, %v1521_v5 }
0x14ea   :  { %v1525_v41 = vadd.f32 1e-05, %v1523_v48 }
0x14ec   :  { %4105 = vrsqrt.f32 %v1525_v41 }
0x14f2   :  { %v4104_v6 = vpop.eup %4103 }
0x14f3   :  { %v1528_v8 = vmul.f32 %v4104_v6, %v1512_v44  ;;  %v4747_v6 = vld [vmem:[%s5169_s6 + $0x10] sm:$0xff] }
0x14f4   :  { %v1746_v21 = vrot.slane %v4747_v6, %v4317_v39 }
0x14f5   :  { %v1534_v9 = vmul.f32 %v1533_v7, %v1528_v8 }
0x14f6   :  { %v4106_v43 = vpop.eup %4105 }
0x14f7   :  { %v1529_v15 = vmul.f32 %v4106_v43, %v1513_v33  ;;  %v1540_v17 = vadd.f32 %v1539_v10, %v1534_v9 }
0x14f9   :  { %v1535_v11 = vmul.f32 %v1533_v7, %v1529_v15  ;;  %v1733_v7 = vrot.slane %v4747_v6, %v4299_v25 }
0x14fb   :  { %v1541_v18 = vadd.f32 %v1539_v10, %v1535_v11  ;;  %v1739_v11 = vrot.slane %v4747_v6, %v4309_v30 }
0x14fd   :  { %v1542_v19 = vpack.c.bf16 %v1541_v18, %v1540_v17 }
0x14ff   :  { %3743 = vmatmul.mubr.msk.bf16.vlgmr.msra.gmra.mrb[44].mxu1 %vm62_vm0, %v1542_v19 }
0x1500   :  { %3762 = vmatprep.mubr.msk.bf16.mxu1 %vm4192_vm1, %v4191_v14  ;;  %3759 = vmatpush3.bf16.msra.mxu1 %v4733_v61 }
0x1501   :  { %3760 = vmatprep.subr.bf16.mxu1 %v4191_v14 }
0x1504   :  { %3761 = vmatpush3.bf16.msra.mxu1 %v4740_v62 }
0x1505   :  { %3766 = vmatprep.subr.bf16.mxu1 %v4191_v14 }
0x15d2   :  { %v1596_v23 = vpop.f32.mrb[44].mxu1 }
0x15d3   :  { %v1597_v27 = vadd.f32 %v1596_v23, %v1546_v22  ;;  %v3744_v28 = vpop.f32.mrb[45].mxu1 }
0x15d4   :  { %v1599_v29 = vpop.f32.mrb[46].mxu1 }
0x15d5   :  { %v1600_v31 = vadd.f32 %v1599_v29, %v1546_v22  ;;  %v3745_v16 = vpop.f32.mrb[47].mxu1  ;;  %v1603_v36 = vmax.f32 %v1597_v27, 0.0 }
0x15d7   :  { %v1604_v37 = vmax.f32 %v1600_v31, 0.0 }
0x15d9   :  { %v1605_v40 = vpack.c.bf16 %v1604_v37, %v1603_v36 }
0x15db   :  { %3755 = vmatmul.mubr.msk.bf16.vlgmr.msra.gmra.mrb[40].mxu0 %vm1630_vm5, %v1605_v40 }
0x15dc   :  { %3774 = vmatprep.mubr.msk.bf16.mxu0 %vm4192_vm1, %v4191_v14 }
0x16ae   :  { %v1668_v50 = vpop.f32.mrb[40].mxu0 }
0x16af   :  { %v1675_v1 = vadd.f32 %v1668_v50, %v4665_v51  ;;  %v3756_v26 = vpop.f32.mrb[41].mxu0 }
0x16b0   :  { %v1671_v52 = vpop.f32.mrb[42].mxu0 }
0x16b1   :  { %v4717_v53 = vadd.f32 %v1680_v42, %v1675_v1  ;;  %v1676_v54 = vadd.f32 %v1671_v52, %v4668_v60  ;;  %v3757_v55 = vpop.f32.mrb[43].mxu0 }
0x16b3   :  { %v4720_v45 = vadd.f32 %v1680_v42, %v1676_v54  ;;  %v1704_v44 = vsel %vm62_vm0, %v4717_v53, 0.0 }
0x16b4   :  { %1705 = vadd.xlane.f32.xlu0 %v1704_v44 }
0x16b5   :  { %v1707_v58 = vsel %vm62_vm0, %v4720_v45, 0.0 }
0x16b6   :  { %1708 = vadd.xlane.f32.xlu1 %v1707_v58 }
0x1741   :  { %v1706_v34 = vpop.xlane.xlu0 %1705 }
0x1742   :  { %v1710_v33 = vmul.f32 0.03125, %v1706_v34  ;;  %v4187_v34 = vld [vmem:[%s5170_s2] sm:$0xff] }
0x1743   :  { %v1709_v51 = vpop.xlane.xlu1 %1708 }
0x1744   :  { %v1712_v49 = vsub.f32 %v4717_v53, %v1710_v33  ;;  %v1711_v35 = vmul.f32 0.03125, %v1709_v51 }
0x1746   :  { %v1713_v47 = vsub.f32 %v4720_v45, %v1711_v35  ;;  %v1714_v60 = vmul.f32 %v1712_v49, %v1712_v49  ;;  %v4188_v35 = vld [vmem:[%s5170_s2 + $0x8] sm:$0xff] }
0x1748   :  { %v1716_v57 = vsel %vm62_vm0, %v1714_v60, 0.0  ;;  %v1715_v0 = vmul.f32 %v1713_v47, %v1713_v47 }
0x1749   :  { %1717 = vadd.xlane.f32.xlu0 %v1716_v57 }
0x174a   :  { %v1719_v59 = vsel %vm62_vm0, %v1715_v0, 0.0 }
0x174b   :  { %1720 = vadd.xlane.f32.xlu1 %v1719_v59 }
0x17d6   :  { %v1718_v63 = vpop.xlane.xlu0 %1717 }
0x17d7   :  { %v1722_v3 = vmul.f32 0.03125, %v1718_v63 }
0x17d8   :  { %v1721_v4 = vpop.xlane.xlu1 %1720 }
0x17d9   :  { %v1724_v5 = vadd.f32 1e-05, %v1722_v3  ;;  %v1723_v48 = vmul.f32 0.03125, %v1721_v4 }
0x17db   :  { %4107 = vrsqrt.f32 %v1724_v5  ;;  %v1725_v41 = vadd.f32 1e-05, %v1723_v48 }
0x17dd   :  { %4109 = vrsqrt.f32 %v1725_v41 }
0x17e5   :  { %v4108_v8 = vpop.eup %4107 }
0x17e6   :  { %v1728_v43 = vmul.f32 %v4108_v8, %v1712_v49 }
0x17e7   :  { %v4110_v9 = vpop.eup %4109 }
0x17e8   :  { %v1734_v15 = vmul.f32 %v1733_v7, %v1728_v43  ;;  %v1729_v10 = vmul.f32 %v4110_v9, %v1713_v47 }
0x17ea   :  { %v1735_v17 = vmul.f32 %v1733_v7, %v1729_v10  ;;  %v1740_v18 = vadd.f32 %v1739_v11, %v1734_v15 }
0x17ec   :  { %v1741_v19 = vadd.f32 %v1739_v11, %v1735_v17 }
0x17ee   :  { %v1742_v56 = vpack.c.bf16 %v1741_v19, %v1740_v18 }
0x17f0   :  { %3763 = vmatmul.mubr.msk.bf16.vlgmr.msra.gmra.mrb[48].mxu1 %vm62_vm0, %v1742_v56 }
0x17f1   :  { %3768 = vmatprep.mubr.msk.bf16.mxu1 %vm4192_vm1, %v4191_v14 }
0x18c3   :  { %v1796_v22 = vpop.f32.mrb[48].mxu1 }
0x18c4   :  { %v3764_v23 = vpop.f32.mrb[49].mxu1  ;;  %v1797_v28 = vadd.f32 %v1796_v22, %v1746_v21 }
0x18c5   :  { %v1799_v27 = vpop.f32.mrb[50].mxu1 }
0x18c6   :  { %v1800_v29 = vadd.f32 %v1799_v27, %v1746_v21  ;;  %v3765_v31 = vpop.f32.mrb[51].mxu1 }
0x18c8   :  { %v4758_v16 = vpack.c.bf16 %v1800_v29, %v1797_v28 }
0x18ca   :  { %1926 = vrot.lane.b32.xlu1 %v4758_v16, %s4193_s18  ;;  %1805 = vrot.lane.b32.xlu0 %v4758_v16, %s4194_s19 }
0x18ce   :  { %1924 = vrot.lane.b32.xlu1 %v4758_v16, %s4195_s20  ;;  %2045 = vrot.lane.b32.xlu0 %v4758_v16, %s4196_s21 }
0x18d2   :  { %2047 = vrot.lane.b32.xlu1 %v4758_v16, %s4197_s22  ;;  %2166 = vrot.lane.b32.xlu0 %v4758_v16, %s4198_s23 }
0x18d6   :  { %2168 = vrot.lane.b32.xlu1 %v4758_v16, %s4199_s24 }
0x193c   :  { %v1806_v36 = vpop.permute.xlu0 %1805  ;;  %v1927_v40 = vpop.permute.xlu1 %1926 }
0x193d   :  { %v1811_v37 = vsel %vm167_vm2, %v1806_v36, 0  ;;  %v1932_v50 = vsel %vm167_vm2, %v1927_v40, 0 }
0x193e   :  { %3767 = vmatpush3.bf16.xpose.msra.mxu1 %v1811_v37 }
0x193f   :  { %3778 = vmatprep.subr.bf16.mxu1 %v4191_v14 }
0x1940   :  { %v1925_v42 = vpop.permute.xlu1 %1924  ;;  %v2046_v54 = vpop.permute.xlu0 %2045 }
0x1944   :  { %v2048_v1 = vpop.permute.xlu1 %2047  ;;  %v2167_v44 = vpop.permute.xlu0 %2166 }
0x1945   :  { %3769 = vmatmul.mubr.msk.bf16.vlgmr.msra.gmra.mrb[52].mxu1 %vm167_vm2, %v4758_v16  ;;  %v2053_v26 = vsel %vm167_vm2, %v2048_v1, 0 }
0x1946   :  { %3779 = vmatpush3.bf16.xpose.msra.mxu1 %v1932_v50  ;;  %3780 = vmatprep.mubr.msk.bf16.mxu1 %vm4192_vm1, %v4191_v14 }
0x1947   :  { %3790 = vmatprep.subr.bf16.mxu1 %v4191_v14 }
0x1948   :  { %v2169_v52 = vpop.permute.xlu1 %2168 }
0x1949   :  { %v2174_v55 = vsel %vm167_vm2, %v2169_v52, 0 }
0x194d   :  { %3781 = vmatmul.mubr.msk.bf16.vlgmr.msra.gmra.mrb[56].mxu1 %vm167_vm2, %v1925_v42 }
0x194e   :  { %3791 = vmatpush3.bf16.xpose.msra.mxu1 %v2053_v26  ;;  %3792 = vmatprep.mubr.msk.bf16.mxu1 %vm4192_vm1, %v4191_v14 }
0x194f   :  { %3802 = vmatprep.subr.bf16.mxu1 %v4191_v14 }
0x1955   :  { %3793 = vmatmul.mubr.msk.bf16.vlgmr.msra.gmra.mrb[60].mxu1 %vm167_vm2, %v2046_v54 }
0x1956   :  { %3803 = vmatpush3.bf16.xpose.msra.mxu1 %v2174_v55  ;;  %3804 = vmatprep.mubr.msk.bf16.mxu1 %vm4192_vm1, %v4191_v14 }
0x1957   :  { %3814 = vmatprep.subr.bf16.mxu1 %v4191_v14 }
0x195d   :  { %3805 = vmatmul.mubr.msk.bf16.vlgmr.msra.gmra.mrb[64].mxu1 %vm167_vm2, %v2167_v44 }
0x195e   :  { %3818 = vmatprep.mubr.msk.bf16.mxu1 %vm4192_vm1, %v4191_v14 }
0x1a18   :  { %v1847_v58 = vpop.f32.mrb[52].mxu1 }
0x1a19   :  { %v1848_v33 = vadd.f32 %v4187_v34, %v1847_v58  ;;  %v3770_v51 = vpop.f32.mrb[53].mxu1 }
0x1a1a   :  { %v1850_v49 = vpop.f32.mrb[54].mxu1 }
0x1a1b   :  { %v1851_v47 = vadd.f32 %v4188_v35, %v1850_v49  ;;  %v3771_v60 = vpop.f32.mrb[55].mxu1  ;;  %v1854_v57 = vsel %vm215_vm3, %v1848_v33, -inf }
0x1a1c   :  { %1855 = vmax.xlane.f32.xlu1 %v1854_v57 }
0x1a1d   :  { %v1857_v0 = vsel %vm215_vm3, %v1851_v47, -inf }
0x1a1e   :  { %1858 = vmax.xlane.f32.xlu0 %v1857_v0 }
0x1a20   :  { %v1968_v59 = vpop.f32.mrb[56].mxu1 }
0x1a21   :  { %v1969_v63 = vadd.f32 %v4187_v34, %v1968_v59  ;;  %v3782_v3 = vpop.f32.mrb[57].mxu1 }
0x1a22   :  { %v1971_v4 = vpop.f32.mrb[58].mxu1 }
0x1a23   :  { %v1972_v5 = vadd.f32 %v4188_v35, %v1971_v4  ;;  %v3783_v48 = vpop.f32.mrb[59].mxu1  ;;  %v1975_v41 = vsel %vm215_vm3, %v1969_v63, -inf }
0x1a24   :  { %1976 = vmax.xlane.f32.xlu0 %v1975_v41 }
0x1a25   :  { %v1978_v7 = vsel %vm215_vm3, %v1972_v5, -inf }
0x1a28   :  { %1979 = vmax.xlane.f32.xlu0 %v1978_v7  ;;  %v2089_v8 = vpop.f32.mrb[60].mxu1 }
0x1a29   :  { %v2090_v43 = vadd.f32 %v4187_v34, %v2089_v8  ;;  %v3794_v9 = vpop.f32.mrb[61].mxu1 }
0x1a2a   :  { %v2092_v15 = vpop.f32.mrb[62].mxu1 }
0x1a2b   :  { %v2093_v10 = vadd.f32 %v4188_v35, %v2092_v15  ;;  %v3795_v11 = vpop.f32.mrb[63].mxu1  ;;  %v2096_v17 = vsel %vm215_vm3, %v2090_v43, -inf }
0x1a2c   :  { %2097 = vmax.xlane.f32.xlu1 %v2096_v17 }
0x1a2d   :  { %v2099_v18 = vsel %vm215_vm3, %v2093_v10, -inf }
0x1a2e   :  { %2100 = vmax.xlane.f32.xlu0 %v2099_v18 }
0x1a30   :  { %v2210_v19 = vpop.f32.mrb[64].mxu1 }
0x1a31   :  { %v2211_v56 = vadd.f32 %v4187_v34, %v2210_v19  ;;  %v3806_v21 = vpop.f32.mrb[65].mxu1 }
0x1a32   :  { %v2213_v22 = vpop.f32.mrb[66].mxu1 }
0x1a33   :  { %v2214_v23 = vadd.f32 %v4188_v35, %v2213_v22  ;;  %v3807_v27 = vpop.f32.mrb[67].mxu1  ;;  %v2217_v28 = vsel %vm215_vm3, %v2211_v56, -inf }
0x1a34   :  { %2218 = vmax.xlane.f32.xlu1 %v2217_v28 }
0x1a35   :  { %v2220_v29 = vsel %vm215_vm3, %v2214_v23, -inf }
0x1a36   :  { %2221 = vmax.xlane.f32.xlu0 %v2220_v29 }
0x1a45   :  { %1877 = vrot.lane.b32.xlu1 %v4758_v16, %s4200_s29 }
0x1aa9   :  { %v1856_v31 = vpop.xlane.xlu1 %1855 }
0x1aaa   :  { %v1860_v36 = vsub.f32 %v1848_v33, %v1856_v31 }
0x1aab   :  { %v1859_v37 = vpop.xlane.xlu0 %1858 }
0x1aac   :  { %v1862_v40 = vmul.f32 1.442695, %v1860_v36  ;;  %v1861_v42 = vsub.f32 %v1851_v47, %v1859_v37 }
0x1aae   :  { %4111 = vpow2.f32 %v1862_v40  ;;  %v1864_v50 = vmul.f32 1.442695, %v1861_v42 }
0x1ab0   :  { %4113 = vpow2.f32 %v1864_v50 }
0x1ab1   :  { %v1977_v1 = vpop.xlane.xlu0 %1976 }
0x1ab2   :  { %v1981_v26 = vsub.f32 %v1969_v63, %v1977_v1 }
0x1ab4   :  { %v1983_v52 = vmul.f32 1.442695, %v1981_v26 }
0x1ab5   :  { %v1980_v54 = vpop.xlane.xlu0 %1979 }
0x1ab6   :  { %4115 = vpow2.f32 %v1983_v52  ;;  %v1982_v55 = vsub.f32 %v1972_v5, %v1980_v54 }
0x1ab8   :  { %v4112_v44 = vpop.eup %4111  ;;  %v1985_v58 = vmul.f32 1.442695, %v1982_v55 }
0x1ab9   :  { %v2098_v34 = vpop.xlane.xlu1 %2097  ;;  %v1866_v51 = vsel %vm215_vm3, %v4112_v44, 0.0 }
0x1aba   :  { %v4114_v49 = vpop.eup %4113  ;;  %4117 = vpow2.f32 %v1985_v58  ;;  %v2102_v33 = vsub.f32 %v2090_v43, %v2098_v34  ;;  %1867 = vadd.xlane.f32.xlu1 %v1866_v51 }
0x1abb   :  { %v2101_v35 = vpop.xlane.xlu0 %2100  ;;  %v1869_v47 = vsel %vm215_vm3, %v4114_v49, 0.0 }
0x1abc   :  { %v2104_v60 = vmul.f32 1.442695, %v2102_v33  ;;  %v2103_v57 = vsub.f32 %v2093_v10, %v2101_v35  ;;  %1870 = vadd.xlane.f32.xlu0 %v1869_v47 }
0x1abe   :  { %4119 = vpow2.f32 %v2104_v60  ;;  %v2106_v0 = vmul.f32 1.442695, %v2103_v57 }
0x1ac0   :  { %v4116_v59 = vpop.eup %4115  ;;  %4121 = vpow2.f32 %v2106_v0 }
0x1ac1   :  { %v2219_v63 = vpop.xlane.xlu1 %2218  ;;  %v1987_v3 = vsel %vm215_vm3, %v4116_v59, 0.0 }
0x1ac2   :  { %v2223_v4 = vsub.f32 %v2211_v56, %v2219_v63  ;;  %1988 = vadd.xlane.f32.xlu1 %v1987_v3 }
0x1ac3   :  { %v2222_v5 = vpop.xlane.xlu0 %2221 }
0x1ac4   :  { %v4118_v48 = vpop.eup %4117  ;;  %v2225_v41 = vmul.f32 1.442695, %v2223_v4  ;;  %v2224_v7 = vsub.f32 %v2214_v23, %v2222_v5 }
0x1ac5   :  { %v1878_v8 = vpop.permute.xlu1 %1877  ;;  %v1990_v43 = vsel %vm215_vm3, %v4118_v48, 0.0 }
0x1ac6   :  { %4123 = vpow2.f32 %v2225_v41  ;;  %v2227_v9 = vmul.f32 1.442695, %v2224_v7  ;;  %3773 = vmatpush3.bf16.msra.mxu0 %v1878_v8  ;;  %1991 = vadd.xlane.f32.xlu0 %v1990_v43 }
0x1ac7   :  { %3784 = vmatprep.subr.bf16.mxu0 %v4191_v14 }
0x1ac8   :  { %v4120_v15 = vpop.eup %4119  ;;  %4125 = vpow2.f32 %v2227_v9 }
0x1ac9   :  { %v2108_v10 = vsel %vm215_vm3, %v4120_v15, 0.0 }
0x1aca   :  { %v4122_v11 = vpop.eup %4121  ;;  %2109 = vadd.xlane.f32.xlu1 %v2108_v10 }
0x1acb   :  { %v2111_v17 = vsel %vm215_vm3, %v4122_v11, 0.0 }
0x1acc   :  { %2112 = vadd.xlane.f32.xlu0 %v2111_v17 }
0x1ad0   :  { %v4124_v18 = vpop.eup %4123 }
0x1ad1   :  { %v2229_v19 = vsel %vm215_vm3, %v4124_v18, 0.0 }
0x1ad2   :  { %v4126_v56 = vpop.eup %4125  ;;  %2230 = vadd.xlane.f32.xlu1 %v2229_v19 }
0x1ad3   :  { %v2232_v21 = vsel %vm215_vm3, %v4126_v56, 0.0 }
0x1ad4   :  { %2233 = vadd.xlane.f32.xlu0 %v2232_v21 }
0x1ae3   :  { %2119 = vrot.lane.b32.xlu1 %v4758_v16, %s4201_s30 }
0x1ae7   :  { %2240 = vrot.lane.b32.xlu1 %v4758_v16, %s4202_s10 }
0x1aea   :  { %1998 = vrot.lane.b32.xlu0 %v4758_v16, %s4203_s11 }
0x1aeb   :  { %2318 = vrot.lane.b32.xlu1 %v4733_v61, %s4204_s13 }
0x1b47   :  { %v1868_v22 = vpop.xlane.xlu1 %1867 }
0x1b48   :  { %4127 = vrcp.f32 %v1868_v22 }
0x1b49   :  { %v1871_v23 = vpop.xlane.xlu0 %1870 }
0x1b4a   :  { %4129 = vrcp.f32 %v1871_v23 }
0x1b4f   :  { %v1989_v37 = vpop.xlane.xlu1 %1988 }
0x1b52   :  { %v4128_v27 = vpop.eup %4127 }
0x1b53   :  { %v1992_v28 = vpop.xlane.xlu0 %1991  ;;  %v1874_v31 = vmul.f32 %v4128_v27, %v4112_v44 }
0x1b54   :  { %v4130_v29 = vpop.eup %4129  ;;  %4131 = vrcp.f32 %v1992_v28 }
0x1b55   :  { %v1875_v36 = vmul.f32 %v4130_v29, %v4114_v49  ;;  %4133 = vrcp.f32 %v1989_v37 }
0x1b57   :  { %v1876_v40 = vpack.c.bf16 %v1875_v36, %v1874_v31  ;;  %v2110_v61 = vpop.xlane.xlu1 %2109 }
0x1b59   :  { %3775 = vmatmul.mubr.msk.bf16.vlgmr.msra.gmra.mrb[44].mxu0 %vm215_vm3, %v1876_v40  ;;  %v2113_v16 = vpop.xlane.xlu0 %2112 }
0x1b5a   :  { %3786 = vmatprep.mubr.msk.bf16.mxu0 %vm4192_vm1, %v4191_v14  ;;  %4135 = vrcp.f32 %v2113_v16 }
0x1b5b   :  { %4137 = vrcp.f32 %v2110_v61 }
0x1b5e   :  { %v4132_v42 = vpop.eup %4131 }
0x1b5f   :  { %v4134_v1 = vpop.eup %4133  ;;  %v1996_v26 = vmul.f32 %v4132_v42, %v4118_v48  ;;  %v2231_v52 = vpop.xlane.xlu1 %2230 }
0x1b60   :  { %v1995_v54 = vmul.f32 %v4134_v1, %v4116_v59 }
0x1b61   :  { %v2234_v50 = vpop.xlane.xlu0 %2233 }
0x1b62   :  { %4139 = vrcp.f32 %v2234_v50  ;;  %v1997_v44 = vpack.c.bf16 %v1996_v26, %v1995_v54 }
0x1b63   :  { %4141 = vrcp.f32 %v2231_v52  ;;  %v2120_v34 = vpop.permute.xlu1 %2119 }
0x1b64   :  { %v4136_v58 = vpop.eup %4135 }
0x1b65   :  { %v1999_v55 = vpop.permute.xlu0 %1998  ;;  %v4138_v51 = vpop.eup %4137  ;;  %v2117_v49 = vmul.f32 %v4136_v58, %v4122_v11  ;;  %v2373_v58 = vrot.slane %v4747_v6, %v4427_v38 }
0x1b66   :  { %3785 = vmatpush3.bf16.msra.mxu0 %v1999_v55  ;;  %v2116_v33 = vmul.f32 %v4138_v51, %v4120_v15 }
0x1b67   :  { %3796 = vmatprep.subr.bf16.mxu0 %v4191_v14  ;;  %v2241_v60 = vpop.permute.xlu1 %2240 }
0x1b68   :  { %v2118_v35 = vpack.c.bf16 %v2117_v49, %v2116_v33 }
0x1b69   :  { %3787 = vmatmul.mubr.msk.bf16.vlgmr.msra.gmra.mrb[48].mxu0 %vm215_vm3, %v1997_v44 }
0x1b6a   :  { %3797 = vmatpush3.bf16.msra.mxu0 %v2120_v34  ;;  %3798 = vmatprep.mubr.msk.bf16.mxu0 %vm4192_vm1, %v4191_v14 }
0x1b6b   :  { %3808 = vmatprep.subr.bf16.mxu0 %v4191_v14  ;;  %v2319_v41 = vpop.permute.xlu1 %2318 }
0x1b6c   :  { %v4140_v47 = vpop.eup %4139  ;;  %3815 = vmatpush3.bf16.msra.mxu1 %v2319_v41 }
0x1b6d   :  { %v4142_v57 = vpop.eup %4141  ;;  %v2238_v0 = vmul.f32 %v4140_v47, %v4126_v56  ;;  %3816 = vmatprep.subr.bf16.mxu1 %v4191_v14 }
0x1b6e   :  { %v2237_v59 = vmul.f32 %v4142_v57, %v4124_v18 }
0x1b70   :  { %v2239_v63 = vpack.c.bf16 %v2238_v0, %v2237_v59 }
0x1b71   :  { %3799 = vmatmul.mubr.msk.bf16.vlgmr.msra.gmra.mrb[52].mxu0 %vm215_vm3, %v2118_v35 }
0x1b72   :  { %3809 = vmatpush3.bf16.msra.mxu0 %v2241_v60  ;;  %3810 = vmatprep.mubr.msk.bf16.mxu0 %vm4192_vm1, %v4191_v14 }
0x1b73   :  { %3822 = vmatprep.subr.bf16.mxu0 %v4191_v14 }
0x1b79   :  { %3811 = vmatmul.mubr.msk.bf16.vlgmr.msra.gmra.mrb[56].mxu0 %vm215_vm3, %v2239_v63 }
0x1b7a   :  { %3826 = vmatprep.mubr.msk.bf16.mxu0 %vm4192_vm1, %v4191_v14 }
0x1c2c   :  { %v1917_v3 = vpop.f32.mrb[44].mxu0 }
0x1c2d   :  { %v3776_v4 = vpop.f32.mrb[45].mxu0 }
0x1c2e   :  { %v1920_v5 = vpop.f32.mrb[46].mxu0 }
0x1c2f   :  { %v3777_v48 = vpop.f32.mrb[47].mxu0 }
0x1c3c   :  { %v2038_v7 = vpop.f32.mrb[48].mxu0 }
0x1c3d   :  { %v3788_v8 = vpop.f32.mrb[49].mxu0 }
0x1c3e   :  { %v2041_v43 = vpop.f32.mrb[50].mxu0 }
0x1c3f   :  { %v3977_v9 = vpack.i.bf16 %v2041_v43, %v2038_v7  ;;  %v3789_v15 = vpop.f32.mrb[51].mxu0 }
0x1c41   :  { %3978 = vrot.lane.b32.xlu0 %v3977_v9, %s4205_s14 }
0x1c44   :  { %v2159_v10 = vpop.f32.mrb[52].mxu0 }
0x1c45   :  { %v3800_v11 = vpop.f32.mrb[53].mxu0 }
0x1c46   :  { %v2162_v17 = vpop.f32.mrb[54].mxu0 }
0x1c47   :  { %v3982_v18 = vpack.i.bf16 %v2162_v17, %v2159_v10  ;;  %v3801_v19 = vpop.f32.mrb[55].mxu0 }
0x1c49   :  { %3983 = vrot.lane.b32.xlu1 %v3982_v18, %s4206_s15 }
0x1c4c   :  { %v2280_v56 = vpop.f32.mrb[56].mxu0 }
0x1c4d   :  { %v3812_v21 = vpop.f32.mrb[57].mxu0  ;;  %2320 = vrot.lane.b32.xlu1 %v4740_v62, %s4204_s13 }
0x1c4e   :  { %v2283_v22 = vpop.f32.mrb[58].mxu0 }
0x1c4f   :  { %v3987_v23 = vpack.i.bf16 %v2283_v22, %v2280_v56  ;;  %v3813_v27 = vpop.f32.mrb[59].mxu0  ;;  %v2405_v22 = vrot.slane %v4747_v6, %v4473_v12 }
0x1c51   :  { %3988 = vrot.lane.b32.xlu0 %v3987_v23, %s4207_s16 }
0x1cb3   :  { %v3979_v29 = vpop.permute.xlu0 %3978 }
0x1cb4   :  { %v3981_v36 = vunpack.i.h.bf16 %v3979_v29  ;;  %v3980_v37 = vunpack.i.l.bf16 %v3979_v29 }
0x1cb6   :  { %v2312_v42 = vsel %vm167_vm2, %v1920_v5, %v3981_v36  ;;  %v2311_v50 = vsel %vm167_vm2, %v1917_v3, %v3980_v37 }
0x1cbb   :  { %v3984_v28 = vpop.permute.xlu1 %3983 }
0x1cbc   :  { %v3986_v40 = vunpack.i.h.bf16 %v3984_v28  ;;  %v3985_v16 = vunpack.i.l.bf16 %v3984_v28 }
0x1cbe   :  { %v2314_v26 = vsel %vm215_vm3, %v2312_v42, %v3986_v40  ;;  %v2313_v52 = vsel %vm215_vm3, %v2311_v50, %v3985_v16 }
0x1cbf   :  { %v2321_v31 = vpop.permute.xlu1 %2320 }
0x1cc0   :  { %3817 = vmatpush3.bf16.msra.mxu1 %v2321_v31  ;;  %v2411_v31 = vrot.slane %v4747_v6, %v773_v20 }
0x1cc3   :  { %v3989_v61 = vpop.permute.xlu0 %3988 }
0x1cc4   :  { %v3991_v1 = vunpack.i.h.bf16 %v3989_v61  ;;  %v3990_v62 = vunpack.i.l.bf16 %v3989_v61 }
0x1cc6   :  { %v2316_v54 = vsel %vm677_vm4, %v2314_v26, %v3991_v1  ;;  %v2315_v55 = vsel %vm677_vm4, %v2313_v52, %v3990_v62 }
0x1cc7   :  { %v2317_v44 = vpack.c.bf16 %v2316_v54, %v2315_v55 }
0x1cc9   :  { %3819 = vmatmul.mubr.msk.bf16.vlgmr.msra.gmra.mrb[68].mxu1 %vm62_vm0, %v2317_v44 }
0x1cca   :  { %3834 = vmatprep.mubr.msk.bf16.mxu1 %vm62_vm0, %v4462_v2 }
0x1d9c   :  { %v2361_v34 = vpop.f32.mrb[68].mxu1 }
0x1d9d   :  { %v2368_v51 = vadd.f32 %v2361_v34, %v4717_v53  ;;  %v3820_v49 = vpop.f32.mrb[69].mxu1  ;;  %v4873_v53 = vld [vmem:[%s5168_s4 + $0x34] ss:$12 sps:$4 sm:$0xff]  }
0x1d9e   :  { %v2364_v33 = vpop.f32.mrb[70].mxu1  ;;  %3823 = vmatpush3.bf16.msra.mxu0 %v4873_v53 }
0x1d9f   :  { %v4861_v35 = vadd.f32 %v2373_v58, %v2368_v51  ;;  %v2369_v47 = vadd.f32 %v2364_v33, %v4720_v45  ;;  %v3821_v60 = vpop.f32.mrb[71].mxu1  ;;  %3824 = vmatprep.subr.bf16.mxu0 %v4191_v14  ;;  %v4880_v45 = vld [vmem:[%s5168_s4 + $0x4c] ss:$12 sps:$4 sm:$0xff]  }
0x1da1   :  { %v4864_v57 = vadd.f32 %v2373_v58, %v2369_v47  ;;  %v2376_v0 = vsel %vm62_vm0, %v4861_v35, 0.0 }
0x1da2   :  { %2377 = vadd.xlane.f32.xlu0 %v2376_v0  ;;  %3825 = vmatpush3.bf16.msra.mxu0 %v4880_v45 }
0x1da3   :  { %v2379_v2 = vsel %vm62_vm0, %v4864_v57, 0.0  ;;  %3838 = vmatprep.subr.bf16.mxu0 %v4191_v14 }
0x1da4   :  { %2380 = vadd.xlane.f32.xlu1 %v2379_v2 }
0x1db5   :  { %2477 = vrot.lane.b32.xlu1 %v4880_v45, %s4193_s18 }
0x1e2f   :  { %v2378_v59 = vpop.xlane.xlu0 %2377 }
0x1e30   :  { %v2382_v63 = vmul.f32 0.03125, %v2378_v59 }
0x1e31   :  { %v2381_v3 = vpop.xlane.xlu1 %2380 }
0x1e32   :  { %v2384_v4 = vsub.f32 %v4861_v35, %v2382_v63  ;;  %v2383_v5 = vmul.f32 0.03125, %v2381_v3  ;;  %v4936_v63 = vld [vmem:[%s5172_s3 + $0x8] sm:$0xff] }
0x1e34   :  { %v2385_v48 = vsub.f32 %v4864_v57, %v2383_v5  ;;  %v2386_v41 = vmul.f32 %v2384_v4, %v2384_v4 }
0x1e35   :  { %v2478_v56 = vpop.permute.xlu1 %2477 }
0x1e36   :  { %v2388_v7 = vsel %vm62_vm0, %v2386_v41, 0.0  ;;  %v2387_v8 = vmul.f32 %v2385_v48, %v2385_v48 }
0x1e37   :  { %2389 = vadd.xlane.f32.xlu0 %v2388_v7 }
0x1e38   :  { %v2391_v43 = vsel %vm62_vm0, %v2387_v8, 0.0 }
0x1e3b   :  { %2392 = vadd.xlane.f32.xlu0 %v2391_v43 }
0x1e51   :  { %2475 = vrot.lane.b32.xlu0 %v4873_v53, %s4193_s18 }
0x1ec4   :  { %v2390_v9 = vpop.xlane.xlu0 %2389 }
0x1ec5   :  { %v2394_v15 = vmul.f32 0.03125, %v2390_v9 }
0x1ec7   :  { %v2396_v10 = vadd.f32 1e-05, %v2394_v15 }
0x1ec8   :  { %v2393_v11 = vpop.xlane.xlu0 %2392 }
0x1ec9   :  { %4143 = vrsqrt.f32 %v2396_v10  ;;  %v2395_v17 = vmul.f32 0.03125, %v2393_v11 }
0x1ecb   :  { %v2397_v18 = vadd.f32 1e-05, %v2395_v17 }
0x1ecc   :  { %v2476_v19 = vpop.permute.xlu0 %2475 }
0x1ecd   :  { %4145 = vrsqrt.f32 %v2397_v18  ;;  %3830 = vmatprep.subr.bf16.mxu1 %v2476_v19 }
0x1ece   :  { %3831 = vmatpush3.bf16.msra.mxu1 %v2476_v19 }
0x1ecf   :  { %3832 = vmatprep.subr.bf16.mxu1 %v2478_v56 }
0x1ed2   :  { %3833 = vmatpush3.bf16.msra.mxu1 %v2478_v56 }
0x1ed3   :  { %v4144_v21 = vpop.eup %4143  ;;  %3846 = vmatprep.subr.bf16.mxu1 %v4191_v14 }
0x1ed4   :  { %v2400_v23 = vmul.f32 %v4144_v21, %v2384_v4 }
0x1ed5   :  { %3835 = vmatmul.mubr.msk.bf16.vlgmr.msra.gmra.mrb[72].mxu1 %vm62_vm0, %v4475_v13  ;;  %v2474_v13 = vrot.slane %v4747_v6, %v836_v32  ;;  %v2418_v32 = vrot.slane %v4747_v6, %v780_v46  ;;  %v4930_v46 = vld [vmem:[%s5172_s3] sm:$0xff] }
0x1ed6   :  { %3850 = vmatprep.mubr.msk.bf16.mxu1 %vm4192_vm1, %v4191_v14  ;;  %v2406_v28 = vmul.f32 %v2405_v22, %v2400_v23 }
0x1ed7   :  { %v4146_v27 = vpop.eup %4145 }
0x1ed8   :  { %v2401_v29 = vmul.f32 %v4146_v27, %v2385_v48  ;;  %v2412_v37 = vadd.f32 %v2411_v31, %v2406_v28 }
0x1eda   :  { %v2407_v36 = vmul.f32 %v2405_v22, %v2401_v29 }
0x1edc   :  { %v2413_v40 = vadd.f32 %v2411_v31, %v2407_v36 }
0x1ede   :  { %v2414_v16 = vpack.c.bf16 %v2413_v40, %v2412_v37 }
0x1ee0   :  { %3827 = vmatmul.mubr.msk.bf16.vlgmr.msra.gmra.mrb[60].mxu0 %vm62_vm0, %v2414_v16 }
0x1ee1   :  { %3842 = vmatprep.mubr.msk.bf16.mxu0 %vm4192_vm1, %v4191_v14 }
0x1fa8   :  { %v3836_v61 = vpop.f32.mrb[72].mxu1 }
0x1fa9   :  { %v2515_v42 = vpop.f32.mrb[73].mxu1  ;;  %v2524_v1 = vadd.f32 %v3836_v61, %v2474_v13 }
0x1faa   :  { %v3837_v50 = vpop.f32.mrb[74].mxu1  ;;  %v2516_v20 = vadd.f32 %v2515_v42, %v2474_v13 }
0x1fab   :  { %v2527_v62 = vadd.f32 %v3837_v50, %v2474_v13  ;;  %v2518_v26 = vpop.f32.mrb[75].mxu1 }
0x1fac   :  { %v2519_v52 = vadd.f32 %v2518_v26, %v2474_v13 }
0x1fad   :  { %v4908_v54 = vpack.c.bf16 %v2527_v62, %v2524_v1 }
0x1fae   :  { %v4910_v55 = vpack.c.bf16 %v2519_v52, %v2516_v20 }
0x1faf   :  { %v2540_v0 = vsel %vm167_vm2, %v4908_v54, 0 }
0x1fb0   :  { %v2537_v44 = vsel %vm167_vm2, %v4910_v55, 0 }
0x1fb1   :  { %3839 = vmatpush3.bf16.xpose.msra.mxu0 %v2537_v44 }
0x1fb2   :  { %3840 = vmatprep.subr.bf16.mxu0 %v4191_v14 }
0x1fb3   :  { %v2464_v58 = vpop.f32.mrb[60].mxu0 }
0x1fb4   :  { %v3828_v34 = vpop.f32.mrb[61].mxu0  ;;  %v2465_v49 = vadd.f32 %v2464_v58, %v2418_v32 }
0x1fb5   :  { %v2467_v51 = vpop.f32.mrb[62].mxu0 }
0x1fb6   :  { %v2468_v33 = vadd.f32 %v2467_v51, %v2418_v32  ;;  %v3829_v47 = vpop.f32.mrb[63].mxu0 }
0x1fb8   :  { %v4918_v60 = vpack.c.bf16 %v2468_v33, %v2465_v49 }
0x1fb9   :  { %3841 = vmatpush3.bf16.xpose.msra.mxu0 %v2540_v0 }
0x1fba   :  { %3862 = vmatprep.subr.bf16.mxu0 %v4191_v14 }
0x1fc0   :  { %3843 = vmatmul.mubr.msk.bf16.vlgmr.msra.gmra.mrb[64].mxu0 %vm167_vm2, %v4918_v60 }
0x1fc1   :  { %3866 = vmatprep.mubr.msk.bf16.mxu0 %vm4192_vm1, %v4191_v14 }
0x2093   :  { %v2576_v24 = vpop.f32.mrb[64].mxu0 }
0x2094   :  { %v2577_v6 = vadd.f32 %v4930_v46, %v2576_v24  ;;  %v3844_v2 = vpop.f32.mrb[65].mxu0 }
0x2095   :  { %v2579_v59 = vpop.f32.mrb[66].mxu0 }
0x2096   :  { %v2580_v3 = vadd.f32 %v4936_v63, %v2579_v59  ;;  %v3845_v4 = vpop.f32.mrb[67].mxu0  ;;  %v2583_v5 = vsel %vm62_vm0, %v2577_v6, -inf }
0x2097   :  { %2584 = vmax.xlane.f32.xlu1 %v2583_v5 }
0x2098   :  { %v2586_v48 = vsel %vm62_vm0, %v2580_v3, -inf }
0x2099   :  { %2587 = vmax.xlane.f32.xlu0 %v2586_v48 }
0x20a8   :  { %2610 = vrot.lane.b32.xlu1 %v4908_v54, %s4194_s19 }
0x20ac   :  { %2661 = vrot.lane.b32.xlu1 %v4910_v55, %s4200_s29 }
0x2124   :  { %v2585_v41 = vpop.xlane.xlu1 %2584 }
0x2125   :  { %v2589_v7 = vsub.f32 %v2577_v6, %v2585_v41 }
0x2126   :  { %v2588_v8 = vpop.xlane.xlu0 %2587 }
0x2127   :  { %v2591_v43 = vmul.f32 1.442695, %v2589_v7  ;;  %v2590_v9 = vsub.f32 %v2580_v3, %v2588_v8 }
0x2128   :  { %v2611_v19 = vpop.permute.xlu1 %2610 }
0x2129   :  { %4147 = vpow2.f32 %v2591_v43  ;;  %v2593_v15 = vmul.f32 1.442695, %v2590_v9 }
0x212b   :  { %4149 = vpow2.f32 %v2593_v15 }
0x212c   :  { %v2662_v56 = vpop.permute.xlu1 %2661 }
0x212d   :  { %v2669_v37 = vsel %vm167_vm2, %v2662_v56, 0 }
0x2133   :  { %v4148_v10 = vpop.eup %4147 }
0x2134   :  { %v2595_v11 = vsel %vm62_vm0, %v4148_v10, 0.0 }
0x2135   :  { %v4150_v17 = vpop.eup %4149  ;;  %2596 = vadd.xlane.f32.xlu0 %v2595_v11 }
0x2136   :  { %v2598_v18 = vsel %vm62_vm0, %v4150_v17, 0.0 }
0x2137   :  { %2599 = vadd.xlane.f32.xlu1 %v2598_v18 }
0x2148   :  { %2663 = vrot.lane.b32.xlu1 %v4908_v54, %s4200_s29 }
0x214b   :  { %2608 = vrot.lane.b32.xlu0 %v4910_v55, %s4194_s19 }
0x214f   :  { %2659 = vrot.lane.b32.xlu0 %v4918_v60, %s4194_s19 }
0x21c2   :  { %v2597_v21 = vpop.xlane.xlu0 %2596 }
0x21c3   :  { %4151 = vrcp.f32 %v2597_v21 }
0x21c4   :  { %v2600_v22 = vpop.xlane.xlu1 %2599 }
0x21c5   :  { %4153 = vrcp.f32 %v2600_v22 }
0x21c6   :  { %v2609_v23 = vpop.permute.xlu0 %2608 }
0x21c7   :  { %3847 = vmatpush3.bf16.msra.mxu1 %v2609_v23 }
0x21c8   :  { %3848 = vmatprep.subr.bf16.mxu1 %v4191_v14  ;;  %v2664_v40 = vpop.permute.xlu1 %2663 }
0x21c9   :  { %v2672_v16 = vsel %vm167_vm2, %v2664_v40, 0 }
0x21ca   :  { %v2660_v13 = vpop.permute.xlu0 %2659 }
0x21cb   :  { %3849 = vmatpush3.bf16.msra.mxu1 %v2611_v19 }
0x21cc   :  { %3854 = vmatprep.subr.bf16.mxu1 %v4191_v14 }
0x21cd   :  { %v4152_v27 = vpop.eup %4151 }
0x21ce   :  { %v4955_v29 = vmul.f32 %v4152_v27, %v4148_v10 }
0x21cf   :  { %v4154_v28 = vpop.eup %4153 }
0x21d0   :  { %v4957_v31 = vmul.f32 %v4154_v28, %v4150_v17 }
0x21d2   :  { %v2605_v36 = vpack.c.bf16 %v4957_v31, %v4955_v29 }
0x21d4   :  { %3851 = vmatmul.mubr.msk.bf16.vlgmr.msra.gmra.mrb[76].mxu1 %vm62_vm0, %v2605_v36 }
0x21d5   :  { %3855 = vmatpush3.bf16.xpose.msra.mxu1 %v2669_v37  ;;  %3858 = vmatprep.mubr.msk.bf16.mxu1 %vm4192_vm1, %v4191_v14 }
0x21d6   :  { %3856 = vmatprep.subr.bf16.mxu1 %v4191_v14 }
0x21dd   :  { %3857 = vmatpush3.bf16.xpose.msra.mxu1 %v2672_v16 }
0x21de   :  { %3878 = vmatprep.subr.bf16.mxu1 %v4191_v14 }
0x21e4   :  { %3859 = vmatmul.mubr.msk.bf16.vlgmr.msra.gmra.mrb[80].mxu1 %vm167_vm2, %v2660_v13 }
0x21e5   :  { %3882 = vmatprep.mubr.msk.bf16.mxu1 %vm4192_vm1, %v4191_v14 }
0x22a7   :  { %v4971_v61 = vpop.f32.mrb[76].mxu1 }
0x22a8   :  { %v3852_v42 = vpop.f32.mrb[77].mxu1 }
0x22a9   :  { %v4973_v50 = vpop.f32.mrb[78].mxu1 }
0x22aa   :  { %v3853_v1 = vpop.f32.mrb[79].mxu1 }
0x22b7   :  { %v2708_v62 = vpop.f32.mrb[80].mxu1 }
0x22b8   :  { %v2709_v26 = vadd.f32 %v4930_v46, %v2708_v62  ;;  %v3860_v20 = vpop.f32.mrb[81].mxu1 }
0x22b9   :  { %v2711_v52 = vpop.f32.mrb[82].mxu1 }
0x22ba   :  { %v2712_v44 = vadd.f32 %v4936_v63, %v2711_v52  ;;  %v3861_v32 = vpop.f32.mrb[83].mxu1  ;;  %v2715_v58 = vsel %vm62_vm0, %v2709_v26, -inf }
0x22bb   :  { %2716 = vmax.xlane.f32.xlu1 %v2715_v58 }
0x22bc   :  { %v2718_v34 = vsel %vm62_vm0, %v2712_v44, -inf }
0x22bd   :  { %2719 = vmax.xlane.f32.xlu0 %v2718_v34 }
0x22cc   :  { %2740 = vrot.lane.b32.xlu1 %v4910_v55, %s4195_s20 }
0x22d0   :  { %2792 = vrot.lane.b32.xlu1 %v4910_v55, %s4193_s18 }
0x22d4   :  { %2794 = vrot.lane.b32.xlu1 %v4908_v54, %s4193_s18 }
0x22d8   :  { %2790 = vrot.lane.b32.xlu1 %v4918_v60, %s4200_s29 }
0x2348   :  { %v2717_v51 = vpop.xlane.xlu1 %2716 }
0x2349   :  { %v2721_v49 = vsub.f32 %v2709_v26, %v2717_v51 }
0x234a   :  { %v2720_v33 = vpop.xlane.xlu0 %2719 }
0x234b   :  { %v2723_v47 = vmul.f32 1.442695, %v2721_v49  ;;  %v2722_v0 = vsub.f32 %v2712_v44, %v2720_v33 }
0x234c   :  { %v2741_v24 = vpop.permute.xlu1 %2740 }
0x234d   :  { %4155 = vpow2.f32 %v2723_v47  ;;  %v2725_v6 = vmul.f32 1.442695, %v2722_v0  ;;  %3863 = vmatpush3.bf16.msra.mxu0 %v2741_v24 }
0x234e   :  { %3864 = vmatprep.subr.bf16.mxu0 %v4191_v14 }
0x234f   :  { %4157 = vpow2.f32 %v2725_v6 }
0x2350   :  { %v2793_v15 = vpop.permute.xlu1 %2792 }
0x2351   :  { %v2800_v11 = vsel %vm167_vm2, %v2793_v15, 0 }
0x2354   :  { %v2795_v17 = vpop.permute.xlu1 %2794 }
0x2355   :  { %v2803_v18 = vsel %vm167_vm2, %v2795_v17, 0 }
0x2357   :  { %v4156_v2 = vpop.eup %4155 }
0x2358   :  { %v2727_v59 = vsel %vm62_vm0, %v4156_v2, 0.0  ;;  %v2791_v19 = vpop.permute.xlu1 %2790 }
0x2359   :  { %v4158_v3 = vpop.eup %4157  ;;  %2728 = vadd.xlane.f32.xlu0 %v2727_v59 }
0x235a   :  { %v2730_v4 = vsel %vm62_vm0, %v4158_v3, 0.0 }
0x235d   :  { %2731 = vadd.xlane.f32.xlu0 %v2730_v4 }
0x2373   :  { %2742 = vrot.lane.b32.xlu0 %v4908_v54, %s4195_s20 }
0x23e6   :  { %v2729_v5 = vpop.xlane.xlu0 %2728 }
0x23e7   :  { %4159 = vrcp.f32 %v2729_v5 }
0x23ea   :  { %v2732_v48 = vpop.xlane.xlu0 %2731 }
0x23eb   :  { %4161 = vrcp.f32 %v2732_v48 }
0x23ee   :  { %v2743_v41 = vpop.permute.xlu0 %2742 }
0x23ef   :  { %3865 = vmatpush3.bf16.msra.mxu0 %v2743_v41 }
0x23f0   :  { %3870 = vmatprep.subr.bf16.mxu0 %v4191_v14 }
0x23f1   :  { %v4160_v7 = vpop.eup %4159 }
0x23f2   :  { %v2735_v43 = vmul.f32 %v4160_v7, %v4156_v2 }
0x23f4   :  { %v2737_v6 = vadd.f32 %v2735_v43, %v4955_v29 }
0x23f5   :  { %v4162_v8 = vpop.eup %4161 }
0x23f6   :  { %v4993_v9 = vmul.f32 %v4162_v8, %v4158_v3 }
0x23f8   :  { %v2739_v10 = vpack.c.bf16 %v4993_v9, %v2735_v43 }
0x23fa   :  { %3867 = vmatmul.mubr.msk.bf16.vlgmr.msra.gmra.mrb[68].mxu0 %vm62_vm0, %v2739_v10 }
0x23fb   :  { %3871 = vmatpush3.bf16.xpose.msra.mxu0 %v2800_v11  ;;  %3874 = vmatprep.mubr.msk.bf16.mxu0 %vm4192_vm1, %v4191_v14 }
0x23fc   :  { %3872 = vmatprep.subr.bf16.mxu0 %v4191_v14 }
0x2403   :  { %3873 = vmatpush3.bf16.xpose.msra.mxu0 %v2803_v18 }
0x2404   :  { %3894 = vmatprep.subr.bf16.mxu0 %v4191_v14 }
0x240a   :  { %3875 = vmatmul.mubr.msk.bf16.vlgmr.msra.gmra.mrb[72].mxu0 %vm167_vm2, %v2791_v19 }
0x240b   :  { %3898 = vmatprep.mubr.msk.bf16.mxu0 %vm4192_vm1, %v4191_v14 }
0x24cd   :  { %v5006_v56 = vpop.f32.mrb[68].mxu0 }
0x24ce   :  { %v3868_v21 = vpop.f32.mrb[69].mxu0 }
0x24cf   :  { %v5008_v22 = vpop.f32.mrb[70].mxu0 }
0x24d0   :  { %v3992_v23 = vpack.i.bf16 %v5008_v22, %v5006_v56  ;;  %v3869_v27 = vpop.f32.mrb[71].mxu0 }
0x24dd   :  { %v2839_v28 = vpop.f32.mrb[72].mxu0 }
0x24de   :  { %v2840_v36 = vadd.f32 %v4930_v46, %v2839_v28  ;;  %v3876_v37 = vpop.f32.mrb[73].mxu0 }
0x24df   :  { %v2842_v40 = vpop.f32.mrb[74].mxu0 }
0x24e0   :  { %v2843_v16 = vadd.f32 %v4936_v63, %v2842_v40  ;;  %v3877_v13 = vpop.f32.mrb[75].mxu0  ;;  %v2846_v42 = vsel %vm62_vm0, %v2840_v36, -inf }
0x24e1   :  { %2847 = vmax.xlane.f32.xlu0 %v2846_v42 }
0x24e2   :  { %v2849_v1 = vsel %vm62_vm0, %v2843_v16, -inf }
0x24e3   :  { %2850 = vmax.xlane.f32.xlu1 %v2849_v1 }
0x24f4   :  { %2873 = vrot.lane.b32.xlu1 %v4908_v54, %s4203_s11 }
0x24f8   :  { %2923 = vrot.lane.b32.xlu1 %v4910_v55, %s4196_s21 }
0x24fc   :  { %2925 = vrot.lane.b32.xlu1 %v4908_v54, %s4196_s21 }
0x256e   :  { %v2848_v62 = vpop.xlane.xlu0 %2847 }
0x256f   :  { %v2852_v26 = vsub.f32 %v2840_v36, %v2848_v62 }
0x2570   :  { %v2851_v20 = vpop.xlane.xlu1 %2850 }
0x2571   :  { %v2854_v52 = vmul.f32 1.442695, %v2852_v26  ;;  %v2853_v44 = vsub.f32 %v2843_v16, %v2851_v20 }
0x2573   :  { %4163 = vpow2.f32 %v2854_v52  ;;  %v2856_v32 = vmul.f32 1.442695, %v2853_v44 }
0x2574   :  { %v2874_v2 = vpop.permute.xlu1 %2873 }
0x2575   :  { %4165 = vpow2.f32 %v2856_v32 }
0x2578   :  { %v2924_v48 = vpop.permute.xlu1 %2923 }
0x2579   :  { %v2931_v29 = vsel %vm167_vm2, %v2924_v48, 0 }
0x257c   :  { %v2926_v8 = vpop.permute.xlu1 %2925 }
0x257d   :  { %v4164_v58 = vpop.eup %4163  ;;  %v2934_v43 = vsel %vm167_vm2, %v2926_v8, 0 }
0x257e   :  { %v2858_v34 = vsel %vm62_vm0, %v4164_v58, 0.0 }
0x257f   :  { %v4166_v51 = vpop.eup %4165  ;;  %2859 = vadd.xlane.f32.xlu0 %v2858_v34 }
0x2580   :  { %v2861_v49 = vsel %vm62_vm0, %v4166_v51, 0.0 }
0x2583   :  { %2862 = vadd.xlane.f32.xlu0 %v2861_v49 }
0x2599   :  { %2871 = vrot.lane.b32.xlu0 %v4910_v55, %s4203_s11 }
0x259d   :  { %2921 = vrot.lane.b32.xlu0 %v4918_v60, %s4195_s20  ;;  %v2738_v60 = vadd.f32 %v4993_v9, %v4957_v31 }
0x260c   :  { %v2860_v33 = vpop.xlane.xlu0 %2859 }
0x260d   :  { %4167 = vrcp.f32 %v2860_v33 }
0x2610   :  { %v2863_v47 = vpop.xlane.xlu0 %2862 }
0x2611   :  { %4169 = vrcp.f32 %v2863_v47 }
0x2614   :  { %v2872_v0 = vpop.permute.xlu0 %2871 }
0x2615   :  { %3879 = vmatpush3.bf16.msra.mxu1 %v2872_v0 }
0x2616   :  { %3880 = vmatprep.subr.bf16.mxu1 %v4191_v14 }
0x2617   :  { %v4168_v24 = vpop.eup %4167 }
0x2618   :  { %v2866_v59 = vmul.f32 %v4168_v24, %v4164_v58  ;;  %v2922_v31 = vpop.permute.xlu0 %2921 }
0x2619   :  { %3881 = vmatpush3.bf16.msra.mxu1 %v2874_v2 }
0x261a   :  { %v5030_v3 = vadd.f32 %v2866_v59, %v2737_v6  ;;  %3886 = vmatprep.subr.bf16.mxu1 %v4191_v14 }
0x261b   :  { %v4170_v4 = vpop.eup %4169 }
0x261c   :  { %v2867_v5 = vmul.f32 %v4170_v4, %v4166_v51 }
0x261e   :  { %v5035_v41 = vadd.f32 %v2867_v5, %v2738_v60  ;;  %v2870_v7 = vpack.c.bf16 %v2867_v5, %v2866_v59 }
0x2620   :  { %3883 = vmatmul.mubr.msk.bf16.vlgmr.msra.gmra.mrb[84].mxu1 %vm62_vm0, %v2870_v7 }
0x2621   :  { %3890 = vmatprep.mubr.msk.bf16.mxu1 %vm4192_vm1, %v4191_v14 }
0x2622   :  { %3887 = vmatpush3.bf16.xpose.msra.mxu1 %v2931_v29 }
0x2623   :  { %3888 = vmatprep.subr.bf16.mxu1 %v4191_v14 }
0x262a   :  { %3889 = vmatpush3.bf16.xpose.msra.mxu1 %v2934_v43 }
0x262b   :  { %3910 = vmatprep.subr.bf16.mxu1 %v4191_v14 }
0x2631   :  { %3891 = vmatmul.mubr.msk.bf16.vlgmr.msra.gmra.mrb[88].mxu1 %vm167_vm2, %v2922_v31 }
0x2632   :  { %3914 = vmatprep.mubr.msk.bf16.mxu1 %vm4192_vm1, %v4191_v14 }
0x26f3   :  { %v2914_v9 = vpop.f32.mrb[84].mxu1 }
0x26f4   :  { %v3884_v15 = vpop.f32.mrb[85].mxu1 }
0x26f5   :  { %v2917_v10 = vpop.f32.mrb[86].mxu1 }
0x26f6   :  { %v3997_v11 = vpack.i.bf16 %v2917_v10, %v2914_v9  ;;  %v3885_v17 = vpop.f32.mrb[87].mxu1 }
0x2704   :  { %v2970_v18 = vpop.f32.mrb[88].mxu1 }
0x2705   :  { %v2971_v19 = vadd.f32 %v4930_v46, %v2970_v18  ;;  %v3892_v21 = vpop.f32.mrb[89].mxu1 }
0x2706   :  { %v2973_v27 = vpop.f32.mrb[90].mxu1 }
0x2707   :  { %v2974_v28 = vadd.f32 %v4936_v63, %v2973_v27  ;;  %v3893_v36 = vpop.f32.mrb[91].mxu1  ;;  %v2977_v37 = vsel %vm62_vm0, %v2971_v19, -inf }
0x2708   :  { %2978 = vmax.xlane.f32.xlu1 %v2977_v37 }
0x2709   :  { %v2980_v40 = vsel %vm62_vm0, %v2974_v28, -inf }
0x270a   :  { %2981 = vmax.xlane.f32.xlu0 %v2980_v40 }
0x2719   :  { %3002 = vrot.lane.b32.xlu1 %v4910_v55, %s4197_s22 }
0x271d   :  { %3083 = vrot.lane.b32.xlu1 %v4873_v53, %s4204_s13 }
0x2721   :  { %3993 = vrot.lane.b32.xlu1 %v3992_v23, %s4205_s14 }
0x2725   :  { %3998 = vrot.lane.b32.xlu1 %v3997_v11, %s4206_s15  ;;  %v5098_v11 = vld [vmem:[%s5169_s6 + $0x18] sm:$0x1f] }
0x2726   :  { %v3138_v17 = vrot.slane %v5098_v11, %v4299_v25 }
0x2729   :  { %3085 = vrot.lane.b32.xlu1 %v4880_v45, %s4204_s13 }
0x2795   :  { %v2979_v46 = vpop.xlane.xlu1 %2978 }
0x2796   :  { %v2983_v63 = vsub.f32 %v2971_v19, %v2979_v46 }
0x2797   :  { %v2982_v16 = vpop.xlane.xlu0 %2981 }
0x2798   :  { %v2985_v13 = vmul.f32 1.442695, %v2983_v63  ;;  %v2984_v42 = vsub.f32 %v2974_v28, %v2982_v16 }
0x2799   :  { %v3003_v1 = vpop.permute.xlu1 %3002 }
0x279a   :  { %4171 = vpow2.f32 %v2985_v13  ;;  %v2987_v55 = vmul.f32 1.442695, %v2984_v42  ;;  %3895 = vmatpush3.bf16.msra.mxu0 %v3003_v1 }
0x279b   :  { %3896 = vmatprep.subr.bf16.mxu0 %v4191_v14 }
0x279c   :  { %4173 = vpow2.f32 %v2987_v55 }
0x279d   :  { %v3084_v53 = vpop.permute.xlu1 %3083 }
0x27a1   :  { %v3994_v56 = vpop.permute.xlu1 %3993 }
0x27a2   :  { %v3996_v22 = vunpack.i.h.bf16 %v3994_v56  ;;  %v3995_v23 = vunpack.i.l.bf16 %v3994_v56 }
0x27a4   :  { %v4172_v62 = vpop.eup %4171  ;;  %v3077_v45 = vsel %vm167_vm2, %v4973_v50, %v3996_v22  ;;  %v3076_v26 = vsel %vm167_vm2, %v4971_v61, %v3995_v23  ;;  %v4025_v23 = vld [vmem:[%s5168_s4 + $0x38] ss:$12 sps:$4 sm:$0xff]  }
0x27a5   :  { %v2989_v20 = vsel %vm62_vm0, %v4172_v62, 0.0  ;;  %v3999_v6 = vpop.permute.xlu1 %3998  ;;  %3911 = vmatpush3.bf16.msra.mxu1 %v4025_v23 }
0x27a6   :  { %v4174_v52 = vpop.eup %4173  ;;  %2990 = vadd.xlane.f32.xlu0 %v2989_v20  ;;  %v4001_v48 = vunpack.i.h.bf16 %v3999_v6  ;;  %3912 = vmatprep.subr.bf16.mxu1 %v4191_v14 }
0x27a7   :  { %v2992_v44 = vsel %vm62_vm0, %v4174_v52, 0.0 }
0x27a8   :  { %v3079_v31 = vsel %vm215_vm3, %v3077_v45, %v4001_v48  ;;  %v4027_v45 = vld [vmem:[%s5173_s5 + $0x20] sm:$0xff]  }
0x27a9   :  { %v3086_v2 = vpop.permute.xlu1 %3085 }
0x27aa   :  { %2993 = vadd.xlane.f32.xlu0 %v2992_v44 }
0x27c0   :  { %3004 = vrot.lane.b32.xlu0 %v4908_v54, %s4197_s22 }
0x2833   :  { %v2991_v32 = vpop.xlane.xlu0 %2990 }
0x2834   :  { %4175 = vrcp.f32 %v2991_v32 }
0x2837   :  { %v2994_v58 = vpop.xlane.xlu0 %2993 }
0x2838   :  { %4177 = vrcp.f32 %v2994_v58 }
0x283b   :  { %v3005_v34 = vpop.permute.xlu0 %3004 }
0x283c   :  { %3897 = vmatpush3.bf16.msra.mxu0 %v3005_v34 }
0x283d   :  { %3902 = vmatprep.subr.bf16.mxu0 %v4191_v14 }
0x283e   :  { %v4176_v50 = vpop.eup %4175 }
0x283f   :  { %v2997_v61 = vmul.f32 %v4176_v50, %v4172_v62  ;;  %v4026_v62 = vld [vmem:[%s5168_s4 + $0x50] ss:$12 sps:$4 sm:$0xff]  }
0x2840   :  { %3913 = vmatpush3.bf16.msra.mxu1 %v4026_v62 }
0x2841   :  { %v2999_v51 = vadd.f32 %v2997_v61, %v5030_v3 }
0x2842   :  { %v4178_v49 = vpop.eup %4177 }
0x2843   :  { %v3141_v33 = vmul.f32 0.25, %v2999_v51  ;;  %v2998_v47 = vmul.f32 %v4178_v49, %v4174_v52 }
0x2845   :  { %3362 = vst.msk [vmem:[%s5174_s9] sm:$0xff] %vm62_vm0, %v3141_v33  ;;  %v3000_v54 = vadd.f32 %v2998_v47, %v5035_v41  ;;  %v3001_v0 = vpack.c.bf16 %v2998_v47, %v2997_v61  ;;  %v4000_v41 = vunpack.i.l.bf16 %v3999_v6  ;;  %v3172_v61 = vrot.slane %v5098_v11, %v4309_v30 }
0x2847   :  { %v3142_v24 = vmul.f32 0.25, %v3000_v54  ;;  %3899 = vmatmul.mubr.msk.bf16.vlgmr.msra.gmra.mrb[76].mxu0 %vm62_vm0, %v3001_v0  ;;  %v3078_v43 = vsel %vm215_vm3, %v3076_v26, %v4000_v41  ;;  %v4028_v26 = vld [vmem:[%s5173_s5 + $0x28] sm:$0xff]   ;;  %v3178_v54 = vrot.slane %v5098_v11, %v4317_v39  ;;  %v3185_v39 = vrot.slane %v5098_v11, %v4427_v38 }
0x2848   :  { %3903 = vmatpush3.bf16.msra.mxu0 %v3084_v53  ;;  %3906 = vmatprep.mubr.msk.bf16.mxu0 %vm4192_vm1, %v4191_v14 }
0x2849   :  { %3363 = vst.msk [vmem:[%s5174_s9 + $0x8] sm:$0xff] %vm62_vm0, %v3142_v24  ;;  %3904 = vmatprep.subr.bf16.mxu0 %v4191_v14 }
0x284c   :  { %3905 = vmatpush3.bf16.msra.mxu0 %v3086_v2 }
0x284d   :  { %3918 = vmatprep.subr.bf16.mxu0 %v4191_v14 }
0x291a   :  { %v3045_v59 = vpop.f32.mrb[76].mxu0 }
0x291b   :  { %v3900_v3 = vpop.f32.mrb[77].mxu0 }
0x291c   :  { %v3048_v4 = vpop.f32.mrb[78].mxu0  ;;  %v4030_v3 = vld [vmem:[%s5173_s5 + $0x38] sm:$0xff]  }
0x291d   :  { %v4002_v60 = vpack.i.bf16 %v3048_v4, %v3045_v59  ;;  %v3901_v5 = vpop.f32.mrb[79].mxu0  ;;  %v4029_v59 = vld [vmem:[%s5173_s5 + $0x30] sm:$0xff]  }
0x291f   :  { %4003 = vrot.lane.b32.xlu0 %v4002_v60, %s4207_s16 }
0x2991   :  { %v4004_v7 = vpop.permute.xlu0 %4003 }
0x2992   :  { %v4006_v29 = vunpack.i.h.bf16 %v4004_v7  ;;  %v4005_v8 = vunpack.i.l.bf16 %v4004_v7 }
0x2994   :  { %v3081_v9 = vsel %vm677_vm4, %v3079_v31, %v4006_v29  ;;  %v3080_v15 = vsel %vm677_vm4, %v3078_v43, %v4005_v8 }
0x2995   :  { %v3082_v10 = vpack.c.bf16 %v3081_v9, %v3080_v15 }
0x2997   :  { %3907 = vmatmul.mubr.msk.bf16.vlgmr.msra.gmra.mrb[80].mxu0 %vm62_vm0, %v3082_v10 }
0x2998   :  { %3926 = vmatprep.mubr.msk.bf16.mxu0 %vm4192_vm1, %v4191_v14  ;;  %3919 = vmatpush3.bf16.msra.mxu0 %v4027_v45 }
0x2999   :  { %3920 = vmatprep.subr.bf16.mxu0 %v4191_v14 }
0x299c   :  { %3921 = vmatpush3.bf16.msra.mxu0 %v4028_v26 }
0x299d   :  { %3922 = vmatprep.subr.bf16.mxu0 %v4191_v14 }
0x29a0   :  { %3923 = vmatpush3.bf16.msra.mxu0 %v4029_v59 }
0x29a1   :  { %3924 = vmatprep.subr.bf16.mxu0 %v4191_v14  ;;  %v3318_v14 = vrot.slane %v5098_v11, %v4473_v12 }
0x29a4   :  { %3925 = vmatpush3.bf16.msra.mxu0 %v4030_v3 }
0x2a6a   :  { %v3126_v18 = vpop.f32.mrb[80].mxu0 }
0x2a6b   :  { %v3133_v19 = vadd.f32 %v3126_v18, %v4861_v35  ;;  %v3908_v21 = vpop.f32.mrb[81].mxu0 }
0x2a6c   :  { %v3129_v27 = vpop.f32.mrb[82].mxu0 }
0x2a6d   :  { %v5103_v28 = vadd.f32 %v3138_v17, %v3133_v19  ;;  %v3134_v36 = vadd.f32 %v3129_v27, %v4864_v57  ;;  %v3909_v37 = vpop.f32.mrb[83].mxu0 }
0x2a6f   :  { %v5106_v40 = vadd.f32 %v3138_v17, %v3134_v36  ;;  %v3143_v46 = vsel %vm62_vm0, %v5103_v28, 0.0 }
0x2a70   :  { %3144 = vadd.xlane.f32.xlu0 %v3143_v46 }
0x2a71   :  { %v3146_v63 = vsel %vm62_vm0, %v5106_v40, 0.0 }
0x2a72   :  { %3147 = vadd.xlane.f32.xlu1 %v3146_v63 }
0x2afd   :  { %v3145_v16 = vpop.xlane.xlu0 %3144 }
0x2afe   :  { %v3149_v13 = vmul.f32 0.03125, %v3145_v16 }
0x2aff   :  { %v3148_v35 = vpop.xlane.xlu1 %3147 }
0x2b00   :  { %v3151_v42 = vsub.f32 %v5103_v28, %v3149_v13  ;;  %v3150_v1 = vmul.f32 0.03125, %v3148_v35 }
0x2b02   :  { %v3152_v55 = vsub.f32 %v5106_v40, %v3150_v1  ;;  %v3153_v57 = vmul.f32 %v3151_v42, %v3151_v42 }
0x2b04   :  { %v3155_v53 = vsel %vm62_vm0, %v3153_v57, 0.0  ;;  %v3154_v56 = vmul.f32 %v3152_v55, %v3152_v55 }
0x2b05   :  { %3156 = vadd.xlane.f32.xlu0 %v3155_v53 }
0x2b06   :  { %v3158_v22 = vsel %vm62_vm0, %v3154_v56, 0.0  ;;  %v3321_v56 = vld [vmem:[%s5175_s7] sm:$0x3] }
0x2b07   :  { %v3357_v62 = vrot.slane %v3321_v56, %v4309_v30 }
0x2b09   :  { %3159 = vadd.xlane.f32.xlu0 %v3158_v22  ;;  %v3351_v22 = vrot.slane %v3321_v56, %v4299_v25 }
0x2b92   :  { %v3157_v20 = vpop.xlane.xlu0 %3156 }
0x2b93   :  { %v3161_v52 = vmul.f32 0.03125, %v3157_v20 }
0x2b95   :  { %v3163_v44 = vadd.f32 1e-05, %v3161_v52 }
0x2b96   :  { %v3160_v32 = vpop.xlane.xlu0 %3159 }
0x2b97   :  { %4179 = vrsqrt.f32 %v3163_v44  ;;  %v3162_v58 = vmul.f32 0.03125, %v3160_v32 }
0x2b99   :  { %v3164_v34 = vadd.f32 1e-05, %v3162_v58 }
0x2b9b   :  { %4181 = vrsqrt.f32 %v3164_v34 }
0x2ba1   :  { %v4180_v50 = vpop.eup %4179 }
0x2ba2   :  { %v3167_v51 = vmul.f32 %v4180_v50, %v3151_v42 }
0x2ba4   :  { %v3173_v33 = vmul.f32 %v3172_v61, %v3167_v51 }
0x2ba5   :  { %v4182_v49 = vpop.eup %4181 }
0x2ba6   :  { %v3168_v47 = vmul.f32 %v4182_v49, %v3152_v55  ;;  %v3179_v24 = vadd.f32 %v3178_v54, %v3173_v33 }
0x2ba8   :  { %v3174_v0 = vmul.f32 %v3172_v61, %v3168_v47 }
0x2baa   :  { %v3180_v6 = vadd.f32 %v3178_v54, %v3174_v0 }
0x2bac   :  { %v3181_v2 = vpack.c.bf16 %v3180_v6, %v3179_v24 }
0x2bae   :  { %3915 = vmatmul.mubr.msk.bf16.vlgmr.msra.gmra.mrb[92].mxu1 %vm62_vm0, %v3181_v2 }
0x2c81   :  { %v3235_v4 = vpop.f32.mrb[92].mxu1 }
0x2c82   :  { %v3236_v60 = vadd.f32 %v3235_v4, %v3185_v39  ;;  %v3916_v5 = vpop.f32.mrb[93].mxu1 }
0x2c83   :  { %v3238_v48 = vpop.f32.mrb[94].mxu1 }
0x2c84   :  { %v3239_v41 = vadd.f32 %v3238_v48, %v3185_v39  ;;  %v3917_v7 = vpop.f32.mrb[95].mxu1  ;;  %v3242_v29 = vmax.f32 %v3236_v60, 0.0 }
0x2c86   :  { %v3243_v8 = vmax.f32 %v3239_v41, 0.0 }
0x2c88   :  { %v3244_v43 = vpack.c.bf16 %v3243_v8, %v3242_v29 }
0x2c8a   :  { %3927 = vmatmul.mubr.msk.bf16.vlgmr.msra.gmra.mrb[84].mxu0 %vm1630_vm5, %v3244_v43 }
0x2d5d   :  { %v3306_v31 = vpop.f32.mrb[84].mxu0 }
0x2d5e   :  { %v3313_v9 = vadd.f32 %v3306_v31, %v5103_v28  ;;  %v3928_v15 = vpop.f32.mrb[85].mxu0 }
0x2d5f   :  { %v3309_v10 = vpop.f32.mrb[86].mxu0 }
0x2d60   :  { %v3319_v38 = vadd.f32 %v3318_v14, %v3313_v9  ;;  %v3314_v17 = vadd.f32 %v3309_v10, %v5106_v40  ;;  %v3929_v18 = vpop.f32.mrb[87].mxu0 }
0x2d62   :  { %v3320_v19 = vadd.f32 %v3318_v14, %v3314_v17  ;;  %v3322_v21 = vsel %vm62_vm0, %v3319_v38, 0.0 }
0x2d63   :  { %3323 = vadd.xlane.f32.xlu0 %v3322_v21 }
0x2d64   :  { %v3325_v27 = vsel %vm62_vm0, %v3320_v19, 0.0 }
0x2d65   :  { %3326 = vadd.xlane.f32.xlu1 %v3325_v27 }
0x2df0   :  { %v3324_v36 = vpop.xlane.xlu0 %3323 }
0x2df1   :  { %v3328_v37 = vmul.f32 0.03125, %v3324_v36 }
0x2df2   :  { %v3327_v46 = vpop.xlane.xlu1 %3326 }
0x2df3   :  { %v3330_v12 = vsub.f32 %v3319_v38, %v3328_v37  ;;  %v3329_v11 = vmul.f32 0.03125, %v3327_v46 }
0x2df5   :  { %v3331_v63 = vsub.f32 %v3320_v19, %v3329_v11  ;;  %v3332_v28 = vmul.f32 %v3330_v12, %v3330_v12 }
0x2df7   :  { %v3334_v16 = vsel %vm62_vm0, %v3332_v28, 0.0  ;;  %v3333_v13 = vmul.f32 %v3331_v63, %v3331_v63 }
0x2df8   :  { %3335 = vadd.xlane.f32.xlu0 %v3334_v16 }
0x2df9   :  { %v3337_v40 = vsel %vm62_vm0, %v3333_v13, 0.0 }
0x2dfa   :  { %3338 = vadd.xlane.f32.xlu1 %v3337_v40 }
0x2e85   :  { %v3336_v35 = vpop.xlane.xlu0 %3335 }
0x2e86   :  { %v3340_v42 = vmul.f32 0.03125, %v3336_v35 }
0x2e87   :  { %v3339_v1 = vpop.xlane.xlu1 %3338 }
0x2e88   :  { %v3342_v55 = vadd.f32 1e-05, %v3340_v42  ;;  %v3341_v57 = vmul.f32 0.03125, %v3339_v1 }
0x2e8a   :  { %4183 = vrsqrt.f32 %v3342_v55  ;;  %v3343_v53 = vadd.f32 1e-05, %v3341_v57 }
0x2e8c   :  { %4185 = vrsqrt.f32 %v3343_v53 }
0x2e94   :  { %v4184_v23 = vpop.eup %4183 }
0x2e95   :  { %v3346_v45 = vmul.f32 %v4184_v23, %v3330_v12 }
0x2e96   :  { %v4186_v26 = vpop.eup %4185 }
0x2e97   :  { %v3352_v20 = vmul.f32 %v3351_v22, %v3346_v45  ;;  %v3347_v52 = vmul.f32 %v4186_v26, %v3331_v63 }
0x2e99   :  { %v3358_v44 = vadd.f32 %v3357_v62, %v3352_v20  ;;  %v3353_v32 = vmul.f32 %v3351_v22, %v3347_v52 }
0x2e9b   :  { %3360 = vst.msk [vmem:[%s5176_s8] sm:$0xff] %vm62_vm0, %v3358_v44  ;;  %v3359_v58 = vadd.f32 %v3357_v62, %v3353_v32 }
0x2e9d   :  { %3361 = vst.msk [vmem:[%s5176_s8 + $0x8] sm:$0xff] %vm62_vm0, %v3359_v58 }

</bundles_post_ra>
